<compile_context>
chip_gen: v5e
topology: v5e:2x2
jax: 0.10.0
libtpu: 0.0.40
codegen_flags: <defaults>
</compile_context>

<pallas_src>
import jax
import jax.numpy as jnp
from jax.experimental import pallas as pl
from jax.experimental.pallas import tpu as pltpu


MXU_DTYPE = jnp.bfloat16   # MXU feed dtype (accumulation is always f32).


def _zero_halo_border(pad_ref, H, W):
    """Zero only the 1-px halo ring of a (H+2, W+2, C) pad scratch.

    The interior is overwritten immediately afterwards, so a full-tile zero
    fill would double the store traffic; this is O(perimeter) not O(area).
    """
    C = pad_ref.shape[-1]
    dt = pad_ref.dtype
    z_row = jnp.zeros((1, W + 2, C), dt)
    pad_ref[0:1, :, :] = z_row                    # top halo row
    pad_ref[H + 1:H + 2, :, :] = z_row            # bottom halo row
    z_col = jnp.zeros((H + 2, 1, C), dt)
    pad_ref[:, 0:1, :] = z_col                    # left halo column
    pad_ref[:, W + 1:W + 2, :] = z_col            # right halo column


def _conv3x3_relu(pad_ref, col_ref, w_ref, b_ref, H, W):
    """3x3 SAME conv + bias + ReLU from an already-padded VMEM tile.

    pad_ref: (H+2, W+2, Cin) VMEM f32   (halo ring already zeroed)
    col_ref: (H*W, 9*Cin)    VMEM bf16  im2col scratch (streamed, not a value)
    w_ref:   (9*Cin, Cout)   VMEM bf16  tap-major flattened weights
    b_ref:   (1, Cout)       VMEM f32   bias
    returns: (H*W, Cout) float32
    """
    Cin = pad_ref.shape[-1]
    # Stream the 9 shifted windows into the im2col scratch one tap at a time
    # (plain vst traffic) instead of concatenating them into one live value:
    # keeps vreg pressure at ~one tap and lets the MXU stream from VMEM.
    # NOTE: keep W a multiple of 8 so the (H, W, C) -> (H*W, C) regrouping
    # stays a view-like relayout (sublane-aligned).
    for kh in range(3):
        for kw in range(3):
            c0 = (kh * 3 + kw) * Cin
            win = pad_ref[kh:kh + H, kw:kw + W, :].reshape(H * W, Cin)
            col_ref[:, c0:c0 + Cin] = win.astype(col_ref.dtype)
    # Single K = 9*Cin contraction on the MXU: bf16 feeds, f32 accumulate.
    y = jnp.dot(col_ref[...], w_ref[...], preferred_element_type=jnp.float32)
    return jnp.maximum(y + b_ref[...], 0.0)       # bias + ReLU in f32


def convblock2_kernel(x_ref, w1_ref, b1_ref, w2_ref, b2_ref, o_ref,
                      xpad_ref, mpad_ref, col1_ref, col2_ref):
    """Fused [conv3x3 -> ReLU] x 2 for one batch element.

    x_ref : (1, H, W, Cin)        input tile
    w1_ref: (9*Cin, Cmid)  bf16;  b1_ref: (1, Cmid)  f32
    w2_ref: (9*Cmid, Cout) bf16;  b2_ref: (1, Cout)  f32
    o_ref : (1, H*W, Cout)        output tile
    xpad_ref: VMEM (H+2, W+2, Cin)  f32  (padded input)
    mpad_ref: VMEM (H+2, W+2, Cmid) f32  (padded intermediate)
    col1_ref: VMEM (H*W, 9*Cin)  bf16    (stage-1 im2col scratch)
    col2_ref: VMEM (H*W, 9*Cmid) bf16    (stage-2 im2col scratch)
    """
    H = x_ref.shape[1]
    W = x_ref.shape[2]
    Cmid = b1_ref.shape[1]

    # Stage 1: zero halo ring, write interior, conv + ReLU.
    _zero_halo_border(xpad_ref, H, W)
    xpad_ref[1:H + 1, 1:W + 1, :] = x_ref[0].astype(xpad_ref.dtype)
    y1 = _conv3x3_relu(xpad_ref, col1_ref, w1_ref, b1_ref, H, W)   # (H*W, Cmid) f32

    # Stage 2: intermediate stays on-chip (never written to HBM).
    _zero_halo_border(mpad_ref, H, W)
    mpad_ref[1:H + 1, 1:W + 1, :] = y1.reshape(H, W, Cmid).astype(mpad_ref.dtype)
    y2 = _conv3x3_relu(mpad_ref, col2_ref, w2_ref, b2_ref, H, W)   # (H*W, Cout) f32

    o_ref[0] = y2.astype(o_ref.dtype)


def _pick_vmem_limit():
    """Raise the scoped-VMEM cap (default 16/32 MiB) toward physical capacity
    (128 MiB on v5e/v6e, 64 MiB on v7x), leaving headroom."""
    try:
        phys = pltpu.get_tpu_info().vmem_capacity_bytes
    except Exception:
        phys = 64 * 1024 * 1024        # conservative fallback (v7x-sized)
    return int(min(phys * 3 // 4, 100 * 1024 * 1024))


def oihw_to_hwio(w_oihw):
    """PyTorch Conv2d weight (O, I, kH, kW) -> HWIO (kH, kW, I, O).

    Required before passing real checkpoint weights to conv_block_nhwc."""
    return jnp.transpose(w_oihw, (2, 3, 1, 0))


def conv_block_nhwc(x_nhwc, params):
    """Fused ConvBlock on NHWC input.  params = [(w1, b1), (w2, b2)], HWIO."""
    assert len(params) == 2, "fused kernel implements the default repeat=2"
    # TODO(synk): for repeat != 2, chain fused pairs / add a single-conv kernel.
    (w1, b1), (w2, b2) = params
    N, H, W, Cin = x_nhwc.shape
    Cmid = w1.shape[-1]
    Cout = w2.shape[-1]

    # Tap-major flatten (kh, kw, cin) -> (9*Cin, Cout), matching the im2col
    # column order; cast to bf16 so the MXU runs at full rate.
    w1f = w1.reshape(9 * Cin, Cmid).astype(MXU_DTYPE)
    w2f = w2.reshape(9 * Cmid, Cout).astype(MXU_DTYPE)
    b1r = b1.reshape(1, Cmid).astype(jnp.float32)
    b2r = b2.reshape(1, Cout).astype(jnp.float32)

    # Weights/biases: whole-array VMEM residents.  They are not windowed by
    # the grid pipeline, so they are copied in once and held single-buffered
    # (no per-step re-DMA, no double-buffer duplicates).
    weight_spec = pl.BlockSpec(memory_space=pltpu.MemorySpace.VMEM)

    out = pl.pallas_call(
        convblock2_kernel,
        out_shape=jax.ShapeDtypeStruct((N, H * W, Cout), x_nhwc.dtype),
        grid=(N,),
        in_specs=[
            pl.BlockSpec((1, H, W, Cin), lambda n: (n, 0, 0, 0)),
            weight_spec,   # w1
            weight_spec,   # b1
            weight_spec,   # w2
            weight_spec,   # b2
        ],
        out_specs=pl.BlockSpec((1, H * W, Cout), lambda n: (n, 0, 0)),
        scratch_shapes=[
            pltpu.VMEM((H + 2, W + 2, Cin), jnp.float32),    # padded input
            pltpu.VMEM((H + 2, W + 2, Cmid), jnp.float32),   # padded intermediate
            pltpu.VMEM((H * W, 9 * Cin), MXU_DTYPE),         # stage-1 im2col
            pltpu.VMEM((H * W, 9 * Cmid), MXU_DTYPE),        # stage-2 im2col
        ],
        compiler_params=pltpu.CompilerParams(
            # Batch axis is independent -> megacore-shardable on v7x.
            dimension_semantics=("parallel",),
            vmem_limit_bytes=_pick_vmem_limit(),
        ),
        # TODO(synk): for realistic H*W*C (v7x: 64 MiB VMEM) add a second
        # "parallel" H-strip grid axis: input via memory_space=pl.ANY with a
        # manual 2-row-halo DMA per strip so input/pad/im2col scratches are
        # strip-sized; keep K = 9*Cin un-split (MXU wants K,N dense / x256).
        # TODO(synk): for Cout < 128 emit a lane-dense output block (e.g. a
        # transposed (Cout, H*W) tile == NCHW directly); needs a minor-dim
        # repack of y2 before the store.  No-op once Cout >= 128.
    )(x_nhwc, w1f, b1r, w2f, b2r)

    return out.reshape(N, H, W, Cout)


def conv_block_forward(x_nchw, params):
    """ConvBlock.forward: NCHW in / NCHW out (PyTorch convention), HWIO weights."""
    x = jnp.transpose(x_nchw, (0, 2, 3, 1))      # NCHW -> NHWC
    y = conv_block_nhwc(x, params)
    return jnp.transpose(y, (0, 3, 1, 2))        # NHWC -> NCHW


def conv_block_reference(x_nchw, params, mxu_dtype=None):
    """Pure-JAX reference: [conv3x3(SAME) + bias -> ReLU] * repeat.

    mxu_dtype=None     -> exact f32 module semantics.
    mxu_dtype=bfloat16 -> mimics the kernel's MXU feed rounding (operands cast
                          to bf16; products/accumulation/bias/ReLU in f32).
    """
    x = x_nchw
    for (w, b) in params:
        lhs, rhs = x, w
        if mxu_dtype is not None:
            lhs = lhs.astype(mxu_dtype).astype(jnp.float32)
            rhs = rhs.astype(mxu_dtype).astype(jnp.float32)
        y = jax.lax.conv_general_dilated(
            lhs, rhs, window_strides=(1, 1), padding="SAME",
            dimension_numbers=("NCHW", "HWIO", "NCHW"),
            precision=jax.lax.Precision.HIGHEST)
        x = jnp.maximum(y + b.reshape(1, -1, 1, 1), 0.0)
    return x


def init_conv_block_params(key, channels, repeat=2, dtype=jnp.float32):
    """Deterministic synthetic HWIO weights: repeat * (3x3 conv weight, bias)."""
    params = []
    fan_in = channels * 3 * 3
    scale = 1.0 / jnp.sqrt(jnp.float32(fan_in))
    for _ in range(repeat):
        key, kw, kb = jax.random.split(key, 3)
        w = jax.random.normal(kw, (3, 3, channels, channels), dtype) * scale
        b = jax.random.normal(kb, (channels,), dtype) * scale
        params.append((w, b))
    return params


if __name__ == "__main__":
    key = jax.random.PRNGKey(0)
    k_x, k_p = jax.random.split(key)

    N, C, H, W = 2, 4, 16, 16
    x = jax.random.normal(k_x, (N, C, H, W), jnp.float32)
    params = init_conv_block_params(k_p, channels=C, repeat=2)

    out = jax.jit(conv_block_forward)(x, params)
    out = jax.block_until_ready(out)
    assert out.shape == (N, C, H, W), out.shape

    # Structural check: reference that mimics the kernel's bf16 MXU feeds
    # (operands rounded to bf16, f32 accumulate) -- must agree tightly
    # (only f32 summation-order / 1-ulp re-rounding differences remain).
    ref_mxu = conv_block_reference(x, params, mxu_dtype=MXU_DTYPE)
    err_mxu = float(jnp.max(jnp.abs(out - ref_mxu)))
    assert err_mxu < 1e-2, f"max abs err vs bf16-feed reference {err_mxu}"

    # End-to-end check vs. the exact f32 module semantics: difference is the
    # bf16 quantization of the MXU inputs across the two stacked convs.
    ref_f32 = conv_block_reference(x, params)
    err_f32 = float(jnp.max(jnp.abs(out - ref_f32)))
    assert err_f32 < 5e-2, f"max abs err vs f32 reference {err_f32}"

    print("KERNEL_OK")
</pallas_src>

<mosaic_0001>
module attributes {stable_mosaic.version = 11 : i64} {
  func.func @convblock2_kernel(%arg0: i32, %arg1: memref<1x16x16x4xf32, #tpu.memory_space<vmem>>, %arg2: memref<36x4xbf16, #tpu.memory_space<vmem>>, %arg3: memref<1x4xf32, #tpu.memory_space<vmem>>, %arg4: memref<36x4xbf16, #tpu.memory_space<vmem>>, %arg5: memref<1x4xf32, #tpu.memory_space<vmem>>, %arg6: memref<1x256x4xf32, #tpu.memory_space<vmem>>, %arg7: memref<18x18x4xf32, #tpu.memory_space<vmem>>, %arg8: memref<18x18x4xf32, #tpu.memory_space<vmem>>, %arg9: memref<256x36xbf16, #tpu.memory_space<vmem>>, %arg10: memref<256x36xbf16, #tpu.memory_space<vmem>>) attributes {dimension_semantics = [#tpu.dimension_semantics<parallel>], iteration_bounds = array<i64: 2>, scalar_prefetch = 0 : i64, scratch_operands = 4 : i64, tpu.core_type = #tpu.core_type<tc>, window_params = [{transform_indices = @transform_0, window_bounds = array<i64: 1, 16, 16, 4>}, {pipeline_mode = #tpu.pipeline_mode<synchronous>, transform_indices = @transform_1, window_bounds = array<i64: 36, 4>}, {pipeline_mode = #tpu.pipeline_mode<synchronous>, transform_indices = @transform_2, window_bounds = array<i64: 1, 4>}, {pipeline_mode = #tpu.pipeline_mode<synchronous>, transform_indices = @transform_3, window_bounds = array<i64: 36, 4>}, {pipeline_mode = #tpu.pipeline_mode<synchronous>, transform_indices = @transform_4, window_bounds = array<i64: 1, 4>}, {transform_indices = @transform_5, window_bounds = array<i64: 1, 256, 4>}]} {
    %cst = arith.constant 0.000000e+00 : f32
    %0 = vector.broadcast %cst : f32 to vector<1x18x4xf32>
    %c0 = arith.constant 0 : index
    %c0_0 = arith.constant 0 : index
    %c0_1 = arith.constant 0 : index
    %1 = vector.load %arg7[%c0, %c0_0, %c0_1] : memref<18x18x4xf32, #tpu.memory_space<vmem>>, vector<1x18x4xf32>
    tpu.vector_store %arg7[%c0, %c0_0, %c0_1], %0 {strides = array<i32>} : memref<18x18x4xf32, #tpu.memory_space<vmem>>, vector<1x18x4xf32>,
    %c17 = arith.constant 17 : index
    %c0_2 = arith.constant 0 : index
    %c0_3 = arith.constant 0 : index
    %2 = vector.load %arg7[%c17, %c0_2, %c0_3] : memref<18x18x4xf32, #tpu.memory_space<vmem>>, vector<1x18x4xf32>
    tpu.vector_store %arg7[%c17, %c0_2, %c0_3], %0 {strides = array<i32>} : memref<18x18x4xf32, #tpu.memory_space<vmem>>, vector<1x18x4xf32>,
    %cst_4 = arith.constant 0.000000e+00 : f32
    %3 = vector.broadcast %cst_4 : f32 to vector<18x1x4xf32>
    %c0_5 = arith.constant 0 : index
    %c0_6 = arith.constant 0 : index
    %c0_7 = arith.constant 0 : index
    %4 = vector.load %arg7[%c0_5, %c0_6, %c0_7] : memref<18x18x4xf32, #tpu.memory_space<vmem>>, vector<18x1x4xf32>
    tpu.vector_store %arg7[%c0_5, %c0_6, %c0_7], %3 {strides = array<i32>} : memref<18x18x4xf32, #tpu.memory_space<vmem>>, vector<18x1x4xf32>,
    %c0_8 = arith.constant 0 : index
    %c17_9 = arith.constant 17 : index
    %c0_10 = arith.constant 0 : index
    %5 = vector.load %arg7[%c0_8, %c17_9, %c0_10] : memref<18x18x4xf32, #tpu.memory_space<vmem>>, vector<18x1x4xf32>
    tpu.vector_store %arg7[%c0_8, %c17_9, %c0_10], %3 {strides = array<i32>} : memref<18x18x4xf32, #tpu.memory_space<vmem>>, vector<18x1x4xf32>,
    %c0_11 = arith.constant 0 : index
    %c0_12 = arith.constant 0 : index
    %c0_13 = arith.constant 0 : index
    %c0_14 = arith.constant 0 : index
    %6 = vector.load %arg1[%c0_11, %c0_12, %c0_13, %c0_14] : memref<1x16x16x4xf32, #tpu.memory_space<vmem>>, vector<1x16x16x4xf32>
    %7 = vector.shape_cast %6 : vector<1x16x16x4xf32> to vector<16x16x4xf32>
    %c1 = arith.constant 1 : index
    %c1_15 = arith.constant 1 : index
    %c0_16 = arith.constant 0 : index
    %8 = vector.load %arg7[%c1, %c1_15, %c0_16] : memref<18x18x4xf32, #tpu.memory_space<vmem>>, vector<16x16x4xf32>
    tpu.vector_store %arg7[%c1, %c1_15, %c0_16], %7 {strides = array<i32>} : memref<18x18x4xf32, #tpu.memory_space<vmem>>, vector<16x16x4xf32>,
    %c0_17 = arith.constant 0 : index
    %c0_18 = arith.constant 0 : index
    %c0_19 = arith.constant 0 : index
    %9 = vector.load %arg7[%c0_17, %c0_18, %c0_19] : memref<18x18x4xf32, #tpu.memory_space<vmem>>, vector<16x16x4xf32>
    %10 = vector.shape_cast %9 : vector<16x16x4xf32> to vector<256x4xf32>
    %11 = arith.truncf %10 : vector<256x4xf32> to vector<256x4xbf16>
    %c0_20 = arith.constant 0 : index
    %c0_21 = arith.constant 0 : index
    %12 = vector.load %arg9[%c0_20, %c0_21] : memref<256x36xbf16, #tpu.memory_space<vmem>>, vector<256x4xbf16>
    tpu.vector_store %arg9[%c0_20, %c0_21], %11 {strides = array<i32>} : memref<256x36xbf16, #tpu.memory_space<vmem>>, vector<256x4xbf16>,
    %c0_22 = arith.constant 0 : index
    %c1_23 = arith.constant 1 : index
    %c0_24 = arith.constant 0 : index
    %13 = vector.load %arg7[%c0_22, %c1_23, %c0_24] : memref<18x18x4xf32, #tpu.memory_space<vmem>>, vector<16x16x4xf32>
    %14 = vector.shape_cast %13 : vector<16x16x4xf32> to vector<256x4xf32>
    %15 = arith.truncf %14 : vector<256x4xf32> to vector<256x4xbf16>
    %c0_25 = arith.constant 0 : index
    %c4 = arith.constant 4 : index
    %16 = vector.load %arg9[%c0_25, %c4] : memref<256x36xbf16, #tpu.memory_space<vmem>>, vector<256x4xbf16>
    tpu.vector_store %arg9[%c0_25, %c4], %15 {strides = array<i32>} : memref<256x36xbf16, #tpu.memory_space<vmem>>, vector<256x4xbf16>,
    %c0_26 = arith.constant 0 : index
    %c2 = arith.constant 2 : index
    %c0_27 = arith.constant 0 : index
    %17 = vector.load %arg7[%c0_26, %c2, %c0_27] : memref<18x18x4xf32, #tpu.memory_space<vmem>>, vector<16x16x4xf32>
    %18 = vector.shape_cast %17 : vector<16x16x4xf32> to vector<256x4xf32>
    %19 = arith.truncf %18 : vector<256x4xf32> to vector<256x4xbf16>
    %c0_28 = arith.constant 0 : index
    %c8 = arith.constant 8 : index
    %20 = vector.load %arg9[%c0_28, %c8] : memref<256x36xbf16, #tpu.memory_space<vmem>>, vector<256x4xbf16>
    tpu.vector_store %arg9[%c0_28, %c8], %19 {strides = array<i32>} : memref<256x36xbf16, #tpu.memory_space<vmem>>, vector<256x4xbf16>,
    %c1_29 = arith.constant 1 : index
    %c0_30 = arith.constant 0 : index
    %c0_31 = arith.constant 0 : index
    %21 = vector.load %arg7[%c1_29, %c0_30, %c0_31] : memref<18x18x4xf32, #tpu.memory_space<vmem>>, vector<16x16x4xf32>
    %22 = vector.shape_cast %21 : vector<16x16x4xf32> to vector<256x4xf32>
    %23 = arith.truncf %22 : vector<256x4xf32> to vector<256x4xbf16>
    %c0_32 = arith.constant 0 : index
    %c12 = arith.constant 12 : index
    %24 = vector.load %arg9[%c0_32, %c12] : memref<256x36xbf16, #tpu.memory_space<vmem>>, vector<256x4xbf16>
    tpu.vector_store %arg9[%c0_32, %c12], %23 {strides = array<i32>} : memref<256x36xbf16, #tpu.memory_space<vmem>>, vector<256x4xbf16>,
    %c1_33 = arith.constant 1 : index
    %c1_34 = arith.constant 1 : index
    %c0_35 = arith.constant 0 : index
    %25 = vector.load %arg7[%c1_33, %c1_34, %c0_35] : memref<18x18x4xf32, #tpu.memory_space<vmem>>, vector<16x16x4xf32>
    %26 = vector.shape_cast %25 : vector<16x16x4xf32> to vector<256x4xf32>
    %27 = arith.truncf %26 : vector<256x4xf32> to vector<256x4xbf16>
    %c0_36 = arith.constant 0 : index
    %c16 = arith.constant 16 : index
    %28 = vector.load %arg9[%c0_36, %c16] : memref<256x36xbf16, #tpu.memory_space<vmem>>, vector<256x4xbf16>
    tpu.vector_store %arg9[%c0_36, %c16], %27 {strides = array<i32>} : memref<256x36xbf16, #tpu.memory_space<vmem>>, vector<256x4xbf16>,
    %c1_37 = arith.constant 1 : index
    %c2_38 = arith.constant 2 : index
    %c0_39 = arith.constant 0 : index
    %29 = vector.load %arg7[%c1_37, %c2_38, %c0_39] : memref<18x18x4xf32, #tpu.memory_space<vmem>>, vector<16x16x4xf32>
    %30 = vector.shape_cast %29 : vector<16x16x4xf32> to vector<256x4xf32>
    %31 = arith.truncf %30 : vector<256x4xf32> to vector<256x4xbf16>
    %c0_40 = arith.constant 0 : index
    %c20 = arith.constant 20 : index
    %32 = vector.load %arg9[%c0_40, %c20] : memref<256x36xbf16, #tpu.memory_space<vmem>>, vector<256x4xbf16>
    tpu.vector_store %arg9[%c0_40, %c20], %31 {strides = array<i32>} : memref<256x36xbf16, #tpu.memory_space<vmem>>, vector<256x4xbf16>,
    %c2_41 = arith.constant 2 : index
    %c0_42 = arith.constant 0 : index
    %c0_43 = arith.constant 0 : index
    %33 = vector.load %arg7[%c2_41, %c0_42, %c0_43] : memref<18x18x4xf32, #tpu.memory_space<vmem>>, vector<16x16x4xf32>
    %34 = vector.shape_cast %33 : vector<16x16x4xf32> to vector<256x4xf32>
    %35 = arith.truncf %34 : vector<256x4xf32> to vector<256x4xbf16>
    %c0_44 = arith.constant 0 : index
    %c24 = arith.constant 24 : index
    %36 = vector.load %arg9[%c0_44, %c24] : memref<256x36xbf16, #tpu.memory_space<vmem>>, vector<256x4xbf16>
    tpu.vector_store %arg9[%c0_44, %c24], %35 {strides = array<i32>} : memref<256x36xbf16, #tpu.memory_space<vmem>>, vector<256x4xbf16>,
    %c2_45 = arith.constant 2 : index
    %c1_46 = arith.constant 1 : index
    %c0_47 = arith.constant 0 : index
    %37 = vector.load %arg7[%c2_45, %c1_46, %c0_47] : memref<18x18x4xf32, #tpu.memory_space<vmem>>, vector<16x16x4xf32>
    %38 = vector.shape_cast %37 : vector<16x16x4xf32> to vector<256x4xf32>
    %39 = arith.truncf %38 : vector<256x4xf32> to vector<256x4xbf16>
    %c0_48 = arith.constant 0 : index
    %c28 = arith.constant 28 : index
    %40 = vector.load %arg9[%c0_48, %c28] : memref<256x36xbf16, #tpu.memory_space<vmem>>, vector<256x4xbf16>
    tpu.vector_store %arg9[%c0_48, %c28], %39 {strides = array<i32>} : memref<256x36xbf16, #tpu.memory_space<vmem>>, vector<256x4xbf16>,
    %c2_49 = arith.constant 2 : index
    %c2_50 = arith.constant 2 : index
    %c0_51 = arith.constant 0 : index
    %41 = vector.load %arg7[%c2_49, %c2_50, %c0_51] : memref<18x18x4xf32, #tpu.memory_space<vmem>>, vector<16x16x4xf32>
    %42 = vector.shape_cast %41 : vector<16x16x4xf32> to vector<256x4xf32>
    %43 = arith.truncf %42 : vector<256x4xf32> to vector<256x4xbf16>
    %c0_52 = arith.constant 0 : index
    %c32 = arith.constant 32 : index
    %44 = vector.load %arg9[%c0_52, %c32] : memref<256x36xbf16, #tpu.memory_space<vmem>>, vector<256x4xbf16>
    tpu.vector_store %arg9[%c0_52, %c32], %43 {strides = array<i32>} : memref<256x36xbf16, #tpu.memory_space<vmem>>, vector<256x4xbf16>,
    %c0_53 = arith.constant 0 : index
    %c0_54 = arith.constant 0 : index
    %45 = vector.load %arg9[%c0_53, %c0_54] : memref<256x36xbf16, #tpu.memory_space<vmem>>, vector<256x36xbf16>
    %c0_55 = arith.constant 0 : index
    %c0_56 = arith.constant 0 : index
    %46 = vector.load %arg2[%c0_55, %c0_56] : memref<36x4xbf16, #tpu.memory_space<vmem>>, vector<36x4xbf16>
    %cst_57 = arith.constant dense<0.000000e+00> : vector<256x4xf32>
    %47 = tpu.matmul %45, %46, %cst_57 {dimension_numbers = #tpu.dot_dimension_numbers<[1], [0], [0], [1], [0, 0, 1, 1], [], []>} : vector<256x36xbf16>, vector<36x4xbf16>, vector<256x4xf32> -> vector<256x4xf32>
    %c0_58 = arith.constant 0 : index
    %c0_59 = arith.constant 0 : index
    %48 = vector.load %arg3[%c0_58, %c0_59] : memref<1x4xf32, #tpu.memory_space<vmem>>, vector<1x4xf32>
    %49 = vector.broadcast %48 : vector<1x4xf32> to vector<256x4xf32>
    %50 = arith.addf %47, %49 : vector<256x4xf32>
    %cst_60 = arith.constant 0.000000e+00 : f32
    %51 = vector.broadcast %cst_60 : f32 to vector<256x4xf32>
    %52 = arith.maximumf %50, %51 : vector<256x4xf32>
    %cst_61 = arith.constant 0.000000e+00 : f32
    %53 = vector.broadcast %cst_61 : f32 to vector<1x18x4xf32>
    %c0_62 = arith.constant 0 : index
    %c0_63 = arith.constant 0 : index
    %c0_64 = arith.constant 0 : index
    %54 = vector.load %arg8[%c0_62, %c0_63, %c0_64] : memref<18x18x4xf32, #tpu.memory_space<vmem>>, vector<1x18x4xf32>
    tpu.vector_store %arg8[%c0_62, %c0_63, %c0_64], %53 {strides = array<i32>} : memref<18x18x4xf32, #tpu.memory_space<vmem>>, vector<1x18x4xf32>,
    %c17_65 = arith.constant 17 : index
    %c0_66 = arith.constant 0 : index
    %c0_67 = arith.constant 0 : index
    %55 = vector.load %arg8[%c17_65, %c0_66, %c0_67] : memref<18x18x4xf32, #tpu.memory_space<vmem>>, vector<1x18x4xf32>
    tpu.vector_store %arg8[%c17_65, %c0_66, %c0_67], %53 {strides = array<i32>} : memref<18x18x4xf32, #tpu.memory_space<vmem>>, vector<1x18x4xf32>,
    %cst_68 = arith.constant 0.000000e+00 : f32
    %56 = vector.broadcast %cst_68 : f32 to vector<18x1x4xf32>
    %c0_69 = arith.constant 0 : index
    %c0_70 = arith.constant 0 : index
    %c0_71 = arith.constant 0 : index
    %57 = vector.load %arg8[%c0_69, %c0_70, %c0_71] : memref<18x18x4xf32, #tpu.memory_space<vmem>>, vector<18x1x4xf32>
    tpu.vector_store %arg8[%c0_69, %c0_70, %c0_71], %56 {strides = array<i32>} : memref<18x18x4xf32, #tpu.memory_space<vmem>>, vector<18x1x4xf32>,
    %c0_72 = arith.constant 0 : index
    %c17_73 = arith.constant 17 : index
    %c0_74 = arith.constant 0 : index
    %58 = vector.load %arg8[%c0_72, %c17_73, %c0_74] : memref<18x18x4xf32, #tpu.memory_space<vmem>>, vector<18x1x4xf32>
    tpu.vector_store %arg8[%c0_72, %c17_73, %c0_74], %56 {strides = array<i32>} : memref<18x18x4xf32, #tpu.memory_space<vmem>>, vector<18x1x4xf32>,
    %59 = vector.shape_cast %52 : vector<256x4xf32> to vector<16x16x4xf32>
    %c1_75 = arith.constant 1 : index
    %c1_76 = arith.constant 1 : index
    %c0_77 = arith.constant 0 : index
    %60 = vector.load %arg8[%c1_75, %c1_76, %c0_77] : memref<18x18x4xf32, #tpu.memory_space<vmem>>, vector<16x16x4xf32>
    tpu.vector_store %arg8[%c1_75, %c1_76, %c0_77], %59 {strides = array<i32>} : memref<18x18x4xf32, #tpu.memory_space<vmem>>, vector<16x16x4xf32>,
    %c0_78 = arith.constant 0 : index
    %c0_79 = arith.constant 0 : index
    %c0_80 = arith.constant 0 : index
    %61 = vector.load %arg8[%c0_78, %c0_79, %c0_80] : memref<18x18x4xf32, #tpu.memory_space<vmem>>, vector<16x16x4xf32>
    %62 = vector.shape_cast %61 : vector<16x16x4xf32> to vector<256x4xf32>
    %63 = arith.truncf %62 : vector<256x4xf32> to vector<256x4xbf16>
    %c0_81 = arith.constant 0 : index
    %c0_82 = arith.constant 0 : index
    %64 = vector.load %arg10[%c0_81, %c0_82] : memref<256x36xbf16, #tpu.memory_space<vmem>>, vector<256x4xbf16>
    tpu.vector_store %arg10[%c0_81, %c0_82], %63 {strides = array<i32>} : memref<256x36xbf16, #tpu.memory_space<vmem>>, vector<256x4xbf16>,
    %c0_83 = arith.constant 0 : index
    %c1_84 = arith.constant 1 : index
    %c0_85 = arith.constant 0 : index
    %65 = vector.load %arg8[%c0_83, %c1_84, %c0_85] : memref<18x18x4xf32, #tpu.memory_space<vmem>>, vector<16x16x4xf32>
    %66 = vector.shape_cast %65 : vector<16x16x4xf32> to vector<256x4xf32>
    %67 = arith.truncf %66 : vector<256x4xf32> to vector<256x4xbf16>
    %c0_86 = arith.constant 0 : index
    %c4_87 = arith.constant 4 : index
    %68 = vector.load %arg10[%c0_86, %c4_87] : memref<256x36xbf16, #tpu.memory_space<vmem>>, vector<256x4xbf16>
    tpu.vector_store %arg10[%c0_86, %c4_87], %67 {strides = array<i32>} : memref<256x36xbf16, #tpu.memory_space<vmem>>, vector<256x4xbf16>,
    %c0_88 = arith.constant 0 : index
    %c2_89 = arith.constant 2 : index
    %c0_90 = arith.constant 0 : index
    %69 = vector.load %arg8[%c0_88, %c2_89, %c0_90] : memref<18x18x4xf32, #tpu.memory_space<vmem>>, vector<16x16x4xf32>
    %70 = vector.shape_cast %69 : vector<16x16x4xf32> to vector<256x4xf32>
    %71 = arith.truncf %70 : vector<256x4xf32> to vector<256x4xbf16>
    %c0_91 = arith.constant 0 : index
    %c8_92 = arith.constant 8 : index
    %72 = vector.load %arg10[%c0_91, %c8_92] : memref<256x36xbf16, #tpu.memory_space<vmem>>, vector<256x4xbf16>
    tpu.vector_store %arg10[%c0_91, %c8_92], %71 {strides = array<i32>} : memref<256x36xbf16, #tpu.memory_space<vmem>>, vector<256x4xbf16>,
    %c1_93 = arith.constant 1 : index
    %c0_94 = arith.constant 0 : index
    %c0_95 = arith.constant 0 : index
    %73 = vector.load %arg8[%c1_93, %c0_94, %c0_95] : memref<18x18x4xf32, #tpu.memory_space<vmem>>, vector<16x16x4xf32>
    %74 = vector.shape_cast %73 : vector<16x16x4xf32> to vector<256x4xf32>
    %75 = arith.truncf %74 : vector<256x4xf32> to vector<256x4xbf16>
    %c0_96 = arith.constant 0 : index
    %c12_97 = arith.constant 12 : index
    %76 = vector.load %arg10[%c0_96, %c12_97] : memref<256x36xbf16, #tpu.memory_space<vmem>>, vector<256x4xbf16>
    tpu.vector_store %arg10[%c0_96, %c12_97], %75 {strides = array<i32>} : memref<256x36xbf16, #tpu.memory_space<vmem>>, vector<256x4xbf16>,
    %c1_98 = arith.constant 1 : index
    %c1_99 = arith.constant 1 : index
    %c0_100 = arith.constant 0 : index
    %77 = vector.load %arg8[%c1_98, %c1_99, %c0_100] : memref<18x18x4xf32, #tpu.memory_space<vmem>>, vector<16x16x4xf32>
    %78 = vector.shape_cast %77 : vector<16x16x4xf32> to vector<256x4xf32>
    %79 = arith.truncf %78 : vector<256x4xf32> to vector<256x4xbf16>
    %c0_101 = arith.constant 0 : index
    %c16_102 = arith.constant 16 : index
    %80 = vector.load %arg10[%c0_101, %c16_102] : memref<256x36xbf16, #tpu.memory_space<vmem>>, vector<256x4xbf16>
    tpu.vector_store %arg10[%c0_101, %c16_102], %79 {strides = array<i32>} : memref<256x36xbf16, #tpu.memory_space<vmem>>, vector<256x4xbf16>,
    %c1_103 = arith.constant 1 : index
    %c2_104 = arith.constant 2 : index
    %c0_105 = arith.constant 0 : index
    %81 = vector.load %arg8[%c1_103, %c2_104, %c0_105] : memref<18x18x4xf32, #tpu.memory_space<vmem>>, vector<16x16x4xf32>
    %82 = vector.shape_cast %81 : vector<16x16x4xf32> to vector<256x4xf32>
    %83 = arith.truncf %82 : vector<256x4xf32> to vector<256x4xbf16>
    %c0_106 = arith.constant 0 : index
    %c20_107 = arith.constant 20 : index
    %84 = vector.load %arg10[%c0_106, %c20_107] : memref<256x36xbf16, #tpu.memory_space<vmem>>, vector<256x4xbf16>
    tpu.vector_store %arg10[%c0_106, %c20_107], %83 {strides = array<i32>} : memref<256x36xbf16, #tpu.memory_space<vmem>>, vector<256x4xbf16>,
    %c2_108 = arith.constant 2 : index
    %c0_109 = arith.constant 0 : index
    %c0_110 = arith.constant 0 : index
    %85 = vector.load %arg8[%c2_108, %c0_109, %c0_110] : memref<18x18x4xf32, #tpu.memory_space<vmem>>, vector<16x16x4xf32>
    %86 = vector.shape_cast %85 : vector<16x16x4xf32> to vector<256x4xf32>
    %87 = arith.truncf %86 : vector<256x4xf32> to vector<256x4xbf16>
    %c0_111 = arith.constant 0 : index
    %c24_112 = arith.constant 24 : index
    %88 = vector.load %arg10[%c0_111, %c24_112] : memref<256x36xbf16, #tpu.memory_space<vmem>>, vector<256x4xbf16>
    tpu.vector_store %arg10[%c0_111, %c24_112], %87 {strides = array<i32>} : memref<256x36xbf16, #tpu.memory_space<vmem>>, vector<256x4xbf16>,
    %c2_113 = arith.constant 2 : index
    %c1_114 = arith.constant 1 : index
    %c0_115 = arith.constant 0 : index
    %89 = vector.load %arg8[%c2_113, %c1_114, %c0_115] : memref<18x18x4xf32, #tpu.memory_space<vmem>>, vector<16x16x4xf32>
    %90 = vector.shape_cast %89 : vector<16x16x4xf32> to vector<256x4xf32>
    %91 = arith.truncf %90 : vector<256x4xf32> to vector<256x4xbf16>
    %c0_116 = arith.constant 0 : index
    %c28_117 = arith.constant 28 : index
    %92 = vector.load %arg10[%c0_116, %c28_117] : memref<256x36xbf16, #tpu.memory_space<vmem>>, vector<256x4xbf16>
    tpu.vector_store %arg10[%c0_116, %c28_117], %91 {strides = array<i32>} : memref<256x36xbf16, #tpu.memory_space<vmem>>, vector<256x4xbf16>,
    %c2_118 = arith.constant 2 : index
    %c2_119 = arith.constant 2 : index
    %c0_120 = arith.constant 0 : index
    %93 = vector.load %arg8[%c2_118, %c2_119, %c0_120] : memref<18x18x4xf32, #tpu.memory_space<vmem>>, vector<16x16x4xf32>
    %94 = vector.shape_cast %93 : vector<16x16x4xf32> to vector<256x4xf32>
    %95 = arith.truncf %94 : vector<256x4xf32> to vector<256x4xbf16>
    %c0_121 = arith.constant 0 : index
    %c32_122 = arith.constant 32 : index
    %96 = vector.load %arg10[%c0_121, %c32_122] : memref<256x36xbf16, #tpu.memory_space<vmem>>, vector<256x4xbf16>
    tpu.vector_store %arg10[%c0_121, %c32_122], %95 {strides = array<i32>} : memref<256x36xbf16, #tpu.memory_space<vmem>>, vector<256x4xbf16>,
    %c0_123 = arith.constant 0 : index
    %c0_124 = arith.constant 0 : index
    %97 = vector.load %arg10[%c0_123, %c0_124] : memref<256x36xbf16, #tpu.memory_space<vmem>>, vector<256x36xbf16>
    %c0_125 = arith.constant 0 : index
    %c0_126 = arith.constant 0 : index
    %98 = vector.load %arg4[%c0_125, %c0_126] : memref<36x4xbf16, #tpu.memory_space<vmem>>, vector<36x4xbf16>
    %cst_127 = arith.constant dense<0.000000e+00> : vector<256x4xf32>
    %99 = tpu.matmul %97, %98, %cst_127 {dimension_numbers = #tpu.dot_dimension_numbers<[1], [0], [0], [1], [0, 0, 1, 1], [], []>} : vector<256x36xbf16>, vector<36x4xbf16>, vector<256x4xf32> -> vector<256x4xf32>
    %c0_128 = arith.constant 0 : index
    %c0_129 = arith.constant 0 : index
    %100 = vector.load %arg5[%c0_128, %c0_129] : memref<1x4xf32, #tpu.memory_space<vmem>>, vector<1x4xf32>
    %101 = vector.broadcast %100 : vector<1x4xf32> to vector<256x4xf32>
    %102 = arith.addf %99, %101 : vector<256x4xf32>
    %cst_130 = arith.constant 0.000000e+00 : f32
    %103 = vector.broadcast %cst_130 : f32 to vector<256x4xf32>
    %104 = arith.maximumf %102, %103 : vector<256x4xf32>
    %c0_131 = arith.constant 0 : index
    %c0_132 = arith.constant 0 : index
    %c0_133 = arith.constant 0 : index
    %105 = vector.load %arg6[%c0_131, %c0_132, %c0_133] : memref<1x256x4xf32, #tpu.memory_space<vmem>>, vector<1x256x4xf32>
    %106 = vector.shape_cast %105 : vector<1x256x4xf32> to vector<256x4xf32>
    %107 = vector.shape_cast %104 : vector<256x4xf32> to vector<1x256x4xf32>
    tpu.vector_store %arg6[%c0_131, %c0_132, %c0_133], %107 {strides = array<i32>} : memref<1x256x4xf32, #tpu.memory_space<vmem>>, vector<1x256x4xf32>,
    return
  }
  func.func @transform_0(%arg0: i32) -> (i32, i32, i32, i32) {
    %c0_i32 = arith.constant 0 : i32
    %c0_i32_0 = arith.constant 0 : i32
    %c0_i32_1 = arith.constant 0 : i32
    %c0_i32_2 = arith.constant 0 : i32
    return %arg0, %c0_i32, %c0_i32_0, %c0_i32_1 : i32, i32, i32, i32
  }
  func.func @transform_1(%arg0: i32) -> (i32, i32) {
    %c0_i32 = arith.constant 0 : i32
    %c0_i32_0 = arith.constant 0 : i32
    %c0_i32_1 = arith.constant 0 : i32
    return %c0_i32, %c0_i32_0 : i32, i32
  }
  func.func @transform_2(%arg0: i32) -> (i32, i32) {
    %c0_i32 = arith.constant 0 : i32
    %c0_i32_0 = arith.constant 0 : i32
    %c0_i32_1 = arith.constant 0 : i32
    return %c0_i32, %c0_i32_0 : i32, i32
  }
  func.func @transform_3(%arg0: i32) -> (i32, i32) {
    %c0_i32 = arith.constant 0 : i32
    %c0_i32_0 = arith.constant 0 : i32
    %c0_i32_1 = arith.constant 0 : i32
    return %c0_i32, %c0_i32_0 : i32, i32
  }
  func.func @transform_4(%arg0: i32) -> (i32, i32) {
    %c0_i32 = arith.constant 0 : i32
    %c0_i32_0 = arith.constant 0 : i32
    %c0_i32_1 = arith.constant 0 : i32
    return %c0_i32, %c0_i32_0 : i32, i32
  }
  func.func @transform_5(%arg0: i32) -> (i32, i32, i32) {
    %c0_i32 = arith.constant 0 : i32
    %c0_i32_0 = arith.constant 0 : i32
    %c0_i32_1 = arith.constant 0 : i32
    return %arg0, %c0_i32, %c0_i32_0 : i32, i32, i32
  }
}

</mosaic_0001>

<bundles_post_ra>
// kernel: conv_block_forward.1
= control target key start
LH: loop header
LB: loop body
LE: loop exit
PB: predicated region body
PF: predicated region fallthrough
CT: control target
= control target key end

     0   :  { %s5202_s18 = smov 0   ;;  %s7341_s0 = inlined_call_operand.vmem [shape: f32[2,16,16,4], index: 0, kind: input, shape index: {}]   ;;  %s7342_s1 = inlined_call_operand.vmem [shape: bf16[36,4], index: 1, kind: input, shape index: {}]   ;;  %s7343_s2 = inlined_call_operand.vmem [shape: f32[1,4], index: 2, kind: input, shape index: {}]   ;;  %s7344_s3 = inlined_call_operand.vmem [shape: bf16[36,4], index: 3, kind: input, shape index: {}]   ;;  %s7345_s4 = inlined_call_operand.vmem [shape: f32[1,4], index: 4, kind: input, shape index: {}]   ;;  %s7346_s5 = inlined_call_operand.vmem [shape: f32[2,256,4], index: 5, kind: output, shape index: {}]  }
   0x1 LB: > { %s4905_s19 = sadd.s32 4294967295, %s5161_s18   ;;  %p4909_p0 = scmp.ge.s32.totalorder %s5161_s18, 1  ;;  %s5161_s18 = sphi %s5202_s18, %s15_s18  }
   0x2   : > { %p187_p1 = scmp.lt.s32.totalorder %s5161_s18, 3 }
   0x4   : > { %p188_p2 = pnand %p4909_p0, %p187_p1 }
   0x5   : > { %s5164_s20 = smov (!%p188_p2), 4   ;;  %p215_p3 = scmp.lt.s32.totalorder (!%p188_p2), %s4905_s19, 1 }
   0x6   : > { %191 = sbr.rel (%p188_p2) target bundleno = 1969 (0x7b1), region = 40  ;;  %s5165_s25 = smov (!%p188_p2), 8  }
   0x7   : > { %s5166_s26 = smov (!%p188_p2), 12   ;;  %s5167_s27 = smov (!%p188_p2), 16  }
   0x8   : > { %s5168_s28 = smov (!%p188_p2), 20   ;;  %s5169_s29 = smov (!%p188_p2), 24  }
   0x9   : > { %s5170_s30 = smov (!%p188_p2), 28   ;;  %s5171_s6 = smov (!%p188_p2), 32  }
   0xb   : > { %vm226_vm0 = vcmask 31744   ;;  %v5163_v0 = vmov 0.0   ;;  %vm235_vm1 = vcmask 24576   ;;  %s7348_s19 = smov (!%p215_p3, %s4905_s19), 1  ;;  %vm229_vm2 = vcmask 25600  }
   0xc   : > { %227 = vst.msk [vmem:[#allocation2] sm:$0xff] %vm226_vm0, %v5163_v0  ;;  %s5092_s21 = sshll.u32 %s7348_s19, 8  ;;  %vm401_vm3 = vcmask 27648   ;;  %vm626_vm4 = vcmask 60448   ;;  %vm851_vm5 = vcmask 93248   ;;  %vm1076_vm6 = vcmask 126048  }
   0xd   : > { %228 = vst.msk [vmem:[#allocation2 + $0x8] sm:$0xff] %vm226_vm0, %v5163_v0  ;;  %s5359_s24 = scalar_lea.vmem %s7341_s0, %s5092_s21  ;;  %vm1301_vm7 = vcmask 158848   ;;  %vm1526_vm8 = vcmask 191648   ;;  %vm1752_vm9 = vcmask 224448   ;;  %vm1977_vm10 = vcmask 257248  }
   0xe   : > { %236 = vst.msk [vmem:[#allocation2] sm:$0x1] %vm235_vm1, %v5163_v0  ;;  %v272_v3 = vld [vmem:[%s5359_s24] sm:$0xff]  ;;  %v273_v4 = vld [vmem:[%s5359_s24 + $0x8] sm:$0xff]  ;;  %v279_v11 = vld [vmem:[%s5359_s24 + $0x38] sm:$0xff]  ;;  %vm2420_vm11 = vcmask 1041408  }
   0xf   : > { %232 = vst.msk [vmem:[#allocation2 + $0x198] sm:$0xff] %vm226_vm0, %v5163_v0  ;;  %v276_v7 = vld [vmem:[%s5359_s24 + $0x20] sm:$0xff]  ;;  %v277_v9 = vld [vmem:[%s5359_s24 + $0x28] sm:$0xff]  ;;  %v282_v13 = vld [vmem:[%s5359_s24 + $0x50] sm:$0xff]  ;;  %vm2202_vm12 = vcmask 290048   ;;  %vm2371_vm13 = vcmask 293888  }
  0x10   : > { %233 = vst.msk [vmem:[#allocation2 + $0x1a0] sm:$0xff] %vm226_vm0, %v5163_v0  ;;  %v280_v12 = vld [vmem:[%s5359_s24 + $0x40] sm:$0xff]  ;;  %v274_v14 = vld [vmem:[%s5359_s24 + $0x10] sm:$0xff]  ;;  %v283_v16 = vld [vmem:[%s5359_s24 + $0x58] sm:$0xff] }
  0x11   : > { %237 = vst.msk [vmem:[#allocation2 + $0x18] sm:$0x1] %vm235_vm1, %v5163_v0  ;;  %v285_v18 = vld [vmem:[%s5359_s24 + $0x68] sm:$0xff]  ;;  %v275_v19 = vld [vmem:[%s5359_s24 + $0x18] sm:$0xff]  ;;  %v286_v20 = vld [vmem:[%s5359_s24 + $0x70] sm:$0xff] }
  0x12   : > { %238 = vst.msk [vmem:[#allocation2 + $0x30] sm:$0x1] %vm235_vm1, %v5163_v0  ;;  %v288_v22 = vld [vmem:[%s5359_s24 + $0x80] sm:$0xff]  ;;  %v278_v25 = vld [vmem:[%s5359_s24 + $0x30] sm:$0xff]  ;;  %v289_v26 = vld [vmem:[%s5359_s24 + $0x88] sm:$0xff] }
  0x13   : > { %239 = vst.msk [vmem:[#allocation2 + $0x48] sm:$0x1] %vm235_vm1, %v5163_v0  ;;  %v291_v28 = vld [vmem:[%s5359_s24 + $0x98] sm:$0xff]  ;;  %v281_v30 = vld [vmem:[%s5359_s24 + $0x48] sm:$0xff]  ;;  %v292_v33 = vld [vmem:[%s5359_s24 + $0xa0] sm:$0xff] }
  0x14   : > { %v434_v1 = vld [vmem:[#allocation2 + $0x1] sm:$0xff]  ;;  %240 = vst.msk [vmem:[#allocation2 + $0x60] sm:$0x1] %vm235_vm1, %v5163_v0  ;;  %v294_v36 = vld [vmem:[%s5359_s24 + $0xb0] sm:$0xff]  ;;  %v295_v42 = vld [vmem:[%s5359_s24 + $0xb8] sm:$0xff] }
  0x15   : > { %v466_v2 = vpack.c.bf16 %v434_v1, %v434_v1  ;;  %241 = vst.msk [vmem:[#allocation2 + $0x78] sm:$0x1] %vm235_vm1, %v5163_v0  ;;  %v284_v37 = vld [vmem:[%s5359_s24 + $0x60] sm:$0xff]  ;;  %v297_v45 = vld [vmem:[%s5359_s24 + $0xc8] sm:$0xff]  ;;  %v287_v46 = vld [vmem:[%s5359_s24 + $0x78] sm:$0xff] }
  0x16   : > { %242 = vst.msk [vmem:[#allocation2 + $0x90] sm:$0x1] %vm235_vm1, %v5163_v0  ;;  %v298_v51 = vld [vmem:[%s5359_s24 + $0xd0] sm:$0xff]  ;;  %v300_v54 = vld [vmem:[%s5359_s24 + $0xe0] sm:$0xff]  ;;  %v301_v60 = vld [vmem:[%s5359_s24 + $0xe8] sm:$0xff] }
  0x17   : > { %530 = vrot.lane.b32.xlu0 %v466_v2, %s5164_s20  ;;  %243 = vst.msk [vmem:[#allocation2 + $0xa8] sm:$0x1] %vm235_vm1, %v5163_v0  ;;  %v290_v55 = vld [vmem:[%s5359_s24 + $0x90] sm:$0xff]  ;;  %v293_v63 = vld [vmem:[%s5359_s24 + $0xa8] sm:$0xff] }
  0x18   : > { %244 = vst.msk [vmem:[#allocation2 + $0xc0] sm:$0x1] %vm235_vm1, %v5163_v0 }
  0x19   : > { %245 = vst.msk [vmem:[#allocation2 + $0xd8] sm:$0x1] %vm235_vm1, %v5163_v0 }
  0x1a   : > { %246 = vst.msk [vmem:[#allocation2 + $0xf0] sm:$0x1] %vm235_vm1, %v5163_v0 }
  0x1b   : > { %247 = vst.msk [vmem:[#allocation2 + $0x108] sm:$0x1] %vm235_vm1, %v5163_v0 }
  0x1c   : > { %248 = vst.msk [vmem:[#allocation2 + $0x120] sm:$0x1] %vm235_vm1, %v5163_v0 }
  0x1d   : > { %249 = vst.msk [vmem:[#allocation2 + $0x138] sm:$0x1] %vm235_vm1, %v5163_v0 }
  0x1e   : > { %250 = vst.msk [vmem:[#allocation2 + $0x150] sm:$0x1] %vm235_vm1, %v5163_v0 }
  0x1f   : > { %251 = vst.msk [vmem:[#allocation2 + $0x168] sm:$0x1] %vm235_vm1, %v5163_v0 }
  0x20   : > { %252 = vst.msk [vmem:[#allocation2 + $0x180] sm:$0x1] %vm235_vm1, %v5163_v0 }
  0x21   : > { %255 = vst.msk [vmem:[#allocation2 + $0x29] sm:$0x1] %vm235_vm1, %v5163_v0 }
  0x22   : > { %256 = vst.msk [vmem:[#allocation2 + $0x41] sm:$0x1] %vm235_vm1, %v5163_v0 }
  0x23   : > { %257 = vst.msk [vmem:[#allocation2 + $0x59] sm:$0x1] %vm235_vm1, %v5163_v0 }
  0x24   : > { %258 = vst.msk [vmem:[#allocation2 + $0x71] sm:$0x1] %vm235_vm1, %v5163_v0 }
  0x25   : > { %259 = vst.msk [vmem:[#allocation2 + $0x89] sm:$0x1] %vm235_vm1, %v5163_v0 }
  0x26   : > { %260 = vst.msk [vmem:[#allocation2 + $0xa1] sm:$0x1] %vm235_vm1, %v5163_v0 }
  0x27   : > { %261 = vst.msk [vmem:[#allocation2 + $0xb9] sm:$0x1] %vm235_vm1, %v5163_v0 }
  0x28   : > { %262 = vst.msk [vmem:[#allocation2 + $0xd1] sm:$0x1] %vm235_vm1, %v5163_v0 }
  0x29   : > { %263 = vst.msk [vmem:[#allocation2 + $0xe9] sm:$0x1] %vm235_vm1, %v5163_v0 }
  0x2a   : > { %264 = vst.msk [vmem:[#allocation2 + $0x101] sm:$0x1] %vm235_vm1, %v5163_v0 }
  0x2b   : > { %265 = vst.msk [vmem:[#allocation2 + $0x119] sm:$0x1] %vm235_vm1, %v5163_v0 }
  0x2c   : > { %266 = vst.msk [vmem:[#allocation2 + $0x131] sm:$0x1] %vm235_vm1, %v5163_v0 }
  0x2d   : > { %267 = vst.msk [vmem:[#allocation2 + $0x149] sm:$0x1] %vm235_vm1, %v5163_v0 }
  0x2e   : > { %268 = vst.msk [vmem:[#allocation2 + $0x161] sm:$0x1] %vm235_vm1, %v5163_v0 }
  0x2f   : > { %269 = vst.msk [vmem:[#allocation2 + $0x179] sm:$0x1] %vm235_vm1, %v5163_v0 }
  0x30   : > { %270 = vst.msk [vmem:[#allocation2 + $0x191] sm:$0x1] %vm235_vm1, %v5163_v0 }
  0x31   : > { %2545 = vst.msk [vmem:[#allocation3] sm:$0xff] %vm226_vm0, %v5163_v0 }
  0x32   : > { %2546 = vst.msk [vmem:[#allocation3 + $0x8] sm:$0xff] %vm226_vm0, %v5163_v0 }
  0x33   : > { %2549 = vst.msk [vmem:[#allocation3 + $0x198] sm:$0xff] %vm226_vm0, %v5163_v0 }
  0x34   : > { %2550 = vst.msk [vmem:[#allocation3 + $0x1a0] sm:$0xff] %vm226_vm0, %v5163_v0 }
  0x35   : > { %2553 = vst.msk [vmem:[#allocation3 + $0x18] sm:$0x1] %vm235_vm1, %v5163_v0 }
  0x36   : > { %2554 = vst.msk [vmem:[#allocation3 + $0x30] sm:$0x1] %vm235_vm1, %v5163_v0 }
  0x37   : > { %2555 = vst.msk [vmem:[#allocation3 + $0x48] sm:$0x1] %vm235_vm1, %v5163_v0 }
  0x38   : > { %2556 = vst.msk [vmem:[#allocation3 + $0x60] sm:$0x1] %vm235_vm1, %v5163_v0 }
  0x39   : > { %2557 = vst.msk [vmem:[#allocation3 + $0x78] sm:$0x1] %vm235_vm1, %v5163_v0 }
  0x3a   : > { %2558 = vst.msk [vmem:[#allocation3 + $0x90] sm:$0x1] %vm235_vm1, %v5163_v0 }
  0x3b   : > { %2559 = vst.msk [vmem:[#allocation3 + $0xa8] sm:$0x1] %vm235_vm1, %v5163_v0 }
  0x3c   : > { %2560 = vst.msk [vmem:[#allocation3 + $0xc0] sm:$0x1] %vm235_vm1, %v5163_v0 }
  0x3d   : > { %2561 = vst.msk [vmem:[#allocation3 + $0xd8] sm:$0x1] %vm235_vm1, %v5163_v0 }
  0x3e   : > { %2562 = vst.msk [vmem:[#allocation3 + $0xf0] sm:$0x1] %vm235_vm1, %v5163_v0 }
  0x3f   : > { %2563 = vst.msk [vmem:[#allocation3 + $0x108] sm:$0x1] %vm235_vm1, %v5163_v0 }
  0x40   : > { %2564 = vst.msk [vmem:[#allocation3 + $0x120] sm:$0x1] %vm235_vm1, %v5163_v0 }
  0x41   : > { %2565 = vst.msk [vmem:[#allocation3 + $0x138] sm:$0x1] %vm235_vm1, %v5163_v0 }
  0x42   : > { %2566 = vst.msk [vmem:[#allocation3 + $0x150] sm:$0x1] %vm235_vm1, %v5163_v0 }
  0x43   : > { %2567 = vst.msk [vmem:[#allocation3 + $0x168] sm:$0x1] %vm235_vm1, %v5163_v0 }
  0x44   : > { %2568 = vst.msk [vmem:[#allocation3 + $0x180] sm:$0x1] %vm235_vm1, %v5163_v0 }
  0x45   : > { %2571 = vst.msk [vmem:[#allocation3 + $0x29] sm:$0x1] %vm235_vm1, %v5163_v0 }
  0x46   : > { %2572 = vst.msk [vmem:[#allocation3 + $0x41] sm:$0x1] %vm235_vm1, %v5163_v0 }
  0x47   : > { %2573 = vst.msk [vmem:[#allocation3 + $0x59] sm:$0x1] %vm235_vm1, %v5163_v0 }
  0x48   : > { %2574 = vst.msk [vmem:[#allocation3 + $0x71] sm:$0x1] %vm235_vm1, %v5163_v0 }
  0x49   : > { %2575 = vst.msk [vmem:[#allocation3 + $0x89] sm:$0x1] %vm235_vm1, %v5163_v0 }
  0x4a   : > { %2576 = vst.msk [vmem:[#allocation3 + $0xa1] sm:$0x1] %vm235_vm1, %v5163_v0 }
  0x4b   : > { %2577 = vst.msk [vmem:[#allocation3 + $0xb9] sm:$0x1] %vm235_vm1, %v5163_v0 }
  0x4c   : > { %2578 = vst.msk [vmem:[#allocation3 + $0xd1] sm:$0x1] %vm235_vm1, %v5163_v0 }
  0x4d   : > { %2579 = vst.msk [vmem:[#allocation3 + $0xe9] sm:$0x1] %vm235_vm1, %v5163_v0 }
  0x4e   : > { %2580 = vst.msk [vmem:[#allocation3 + $0x101] sm:$0x1] %vm235_vm1, %v5163_v0 }
  0x4f   : > { %2581 = vst.msk [vmem:[#allocation3 + $0x119] sm:$0x1] %vm235_vm1, %v5163_v0 }
  0x50   : > { %2582 = vst.msk [vmem:[#allocation3 + $0x131] sm:$0x1] %vm235_vm1, %v5163_v0 }
  0x51   : > { %2583 = vst.msk [vmem:[#allocation3 + $0x149] sm:$0x1] %vm235_vm1, %v5163_v0 }
  0x52   : > { %2584 = vst.msk [vmem:[#allocation3 + $0x161] sm:$0x1] %vm235_vm1, %v5163_v0 }
  0x53   : > { %2585 = vst.msk [vmem:[#allocation3 + $0x179] sm:$0x1] %vm235_vm1, %v5163_v0 }
  0x54   : > { %2586 = vst.msk [vmem:[#allocation3 + $0x191] sm:$0x1] %vm235_vm1, %v5163_v0 }
  0x55   : > { %305 = vst.msk [vmem:[#allocation2 + $0x19] sm:$0xff] %vm226_vm0, %v272_v3 }
  0x56   : > { %253 = vst.msk [vmem:[#allocation2 + $0x198] sm:$0x1] %vm235_vm1, %v5163_v0 }
  0x57   : > { %2552 = vst.msk [vmem:[#allocation3] sm:$0x1] %vm235_vm1, %v5163_v0 }
  0x58   : > { %2569 = vst.msk [vmem:[#allocation3 + $0x198] sm:$0x1] %vm235_vm1, %v5163_v0 }
  0x59   : > { %230 = vst.msk [vmem:[#allocation2 + $0x10] sm:$0x3] %vm229_vm2, %v5163_v0 }
  0x5a   : > { %234 = vst.msk [vmem:[#allocation2 + $0x1a8] sm:$0x3] %vm229_vm2, %v5163_v0 }
  0x5b   : > { %254 = vst.msk [vmem:[#allocation2 + $0x11] sm:$0x1] %vm235_vm1, %v5163_v0 }
  0x5c   : > { %v436_v5 = vld [vmem:[#allocation2 + $0x19] sm:$0xff]  ;;  %2547 = vst.msk [vmem:[#allocation3 + $0x10] sm:$0x3] %vm229_vm2, %v5163_v0 }
  0x5d   : > { %v468_v6 = vpack.c.bf16 %v436_v5, %v436_v5  ;;  %2551 = vst.msk [vmem:[#allocation3 + $0x1a8] sm:$0x3] %vm229_vm2, %v5163_v0 }
  0x5e   : > { %306 = vst.msk [vmem:[#allocation2 + $0x21] sm:$0xff] %vm226_vm0, %v273_v4 }
  0x5f   : > { %534 = vrot.lane.b32.xlu1 %v468_v6, %s5164_s20  ;;  %271 = vst.msk [vmem:[#allocation2 + $0x1a9] sm:$0x1] %vm235_vm1, %v5163_v0  ;;  %v296_v6 = vld [vmem:[%s5359_s24 + $0xc0] sm:$0xff] }
  0x60   : > { %v435_v8 = vld [vmem:[#allocation2 + $0x9] sm:$0xff]  ;;  %2570 = vst.msk [vmem:[#allocation3 + $0x11] sm:$0x1] %vm235_vm1, %v5163_v0 }
  0x61   : > { %v467_v10 = vpack.c.bf16 %v435_v8, %v435_v8  ;;  %2587 = vst.msk [vmem:[#allocation3 + $0x1a9] sm:$0x1] %vm235_vm1, %v5163_v0 }
  0x62   : > { %309 = vst.msk [vmem:[#allocation2 + $0x49] sm:$0xff] %vm226_vm0, %v276_v7 }
  0x63   : > { %532 = vrot.lane.b32.xlu0 %v467_v10, %s5164_s20  ;;  %310 = vst.msk [vmem:[#allocation2 + $0x51] sm:$0xff] %vm226_vm0, %v277_v9 }
  0x64   : > { %312 = vst.msk [vmem:[#allocation2 + $0x69] sm:$0xff] %vm226_vm0, %v279_v11 }
  0x65   : > { %v437_v15 = vld [vmem:[#allocation2 + $0x21] sm:$0xff]  ;;  %313 = vst.msk [vmem:[#allocation2 + $0x79] sm:$0xff] %vm226_vm0, %v280_v12 }
  0x66   : > { %v469_v17 = vpack.c.bf16 %v437_v15, %v437_v15  ;;  %315 = vst.msk [vmem:[#allocation2 + $0x91] sm:$0xff] %vm226_vm0, %v282_v13  ;;  %v299_v13 = vld [vmem:[%s5359_s24 + $0xd8] sm:$0xff] }
  0x67   : > { %307 = vst.msk [vmem:[#allocation2 + $0x31] sm:$0xff] %vm226_vm0, %v274_v14 }
  0x68   : > { %536 = vrot.lane.b32.xlu1 %v469_v17, %s5164_s20  ;;  %316 = vst.msk [vmem:[#allocation2 + $0x99] sm:$0xff] %vm226_vm0, %v283_v16 }
  0x69   : > { %v440_v21 = vld [vmem:[#allocation2 + $0x49] sm:$0xff]  ;;  %318 = vst.msk [vmem:[#allocation2 + $0xb1] sm:$0xff] %vm226_vm0, %v285_v18 }
  0x6a   : > { %v472_v23 = vpack.c.bf16 %v440_v21, %v440_v21  ;;  %v441_v24 = vld [vmem:[#allocation2 + $0x51] sm:$0xff]  ;;  %308 = vst.msk [vmem:[#allocation2 + $0x39] sm:$0xff] %vm226_vm0, %v275_v19 }
  0x6b   : > { %319 = vst.msk [vmem:[#allocation2 + $0xc1] sm:$0xff] %vm226_vm0, %v286_v20  ;;  %v473_v27 = vpack.c.bf16 %v441_v24, %v441_v24  ;;  %v443_v29 = vld [vmem:[#allocation2 + $0x69] sm:$0xff] }
  0x6c   : > { %542 = vrot.lane.b32.xlu0 %v472_v23, %s5164_s20  ;;  %321 = vst.msk [vmem:[#allocation2 + $0xd9] sm:$0xff] %vm226_vm0, %v288_v22  ;;  %v475_v34 = vpack.c.bf16 %v443_v29, %v443_v29  ;;  %v444_v35 = vld [vmem:[#allocation2 + $0x79] sm:$0xff] }
  0x6d   : > { %311 = vst.msk [vmem:[#allocation2 + $0x61] sm:$0xff] %vm226_vm0, %v278_v25  ;;  %v476_v39 = vpack.c.bf16 %v444_v35, %v444_v35  ;;  %v446_v40 = vld [vmem:[#allocation2 + $0x91] sm:$0xff] }
  0x6e   : > { %v438_v31 = vld [vmem:[#allocation2 + $0x31] sm:$0xff]  ;;  %322 = vst.msk [vmem:[#allocation2 + $0xe1] sm:$0xff] %vm226_vm0, %v289_v26  ;;  %v478_v43 = vpack.c.bf16 %v446_v40, %v446_v40 }
  0x6f   : > { %v470_v32 = vpack.c.bf16 %v438_v31, %v438_v31  ;;  %324 = vst.msk [vmem:[#allocation2 + $0xf9] sm:$0xff] %vm226_vm0, %v291_v28  ;;  %v447_v44 = vld [vmem:[#allocation2 + $0x99] sm:$0xff]  ;;  %v660_v31 = vld [vmem:[#allocation2 + $0xa] sm:$0xff] }
  0x70   : > { %544 = vrot.lane.b32.xlu1 %v473_v27, %s5164_s20  ;;  %314 = vst.msk [vmem:[#allocation2 + $0x81] sm:$0xff] %vm226_vm0, %v281_v30  ;;  %v479_v48 = vpack.c.bf16 %v447_v44, %v447_v44  ;;  %v449_v49 = vld [vmem:[#allocation2 + $0xb1] sm:$0xff]  ;;  %v337_v27 = vld [vmem:[#allocation2] sm:$0xff] }
  0x71   : > { %538 = vrot.lane.b32.xlu2 %v470_v32, %s5164_s20  ;;  %325 = vst.msk [vmem:[#allocation2 + $0x109] sm:$0xff] %vm226_vm0, %v292_v33  ;;  %v439_v38 = vld [vmem:[#allocation2 + $0x39] sm:$0xff]  ;;  %v481_v52 = vpack.c.bf16 %v449_v49, %v449_v49  ;;  %v369_v30 = vpack.c.bf16 %v337_v27, %v337_v27  ;;  %v692_v33 = vpack.c.bf16 %v660_v31, %v660_v31  ;;  %v343_v49 = vld [vmem:[#allocation2 + $0x48] sm:$0xff] }
  0x72   : > { %327 = vst.msk [vmem:[#allocation2 + $0x121] sm:$0xff] %vm226_vm0, %v294_v36  ;;  %v5436_v41 = vpack.c.bf16 %v439_v38, %v439_v38  ;;  %v450_v53 = vld [vmem:[#allocation2 + $0xc1] sm:$0xff] }
  0x73   : > { %317 = vst.msk [vmem:[#allocation2 + $0xa9] sm:$0xff] %vm226_vm0, %v284_v37  ;;  %v482_v57 = vpack.c.bf16 %v450_v53, %v450_v53  ;;  %v452_v58 = vld [vmem:[#allocation2 + $0xd9] sm:$0xff]  ;;  %v338_v36 = vld [vmem:[#allocation2 + $0x8] sm:$0xff]  ;;  %v341_v37 = vld [vmem:[#allocation2 + $0x30] sm:$0xff] }
  0x74   : > { %548 = vrot.lane.b32.xlu0 %v475_v34, %s5164_s20  ;;  %328 = vst.msk [vmem:[#allocation2 + $0x129] sm:$0xff] %vm226_vm0, %v295_v42  ;;  %v442_v47 = vld [vmem:[#allocation2 + $0x61] sm:$0xff]  ;;  %v484_v61 = vpack.c.bf16 %v452_v58, %v452_v58  ;;  %v370_v40 = vpack.c.bf16 %v338_v36, %v338_v36  ;;  %v5506_v42 = vpack.c.bf16 %v341_v37, %v341_v37 }
  0x75   : > { %330 = vst.msk [vmem:[#allocation2 + $0x141] sm:$0xff] %vm226_vm0, %v297_v45  ;;  %v5448_v50 = vpack.c.bf16 %v442_v47, %v442_v47  ;;  %v453_v62 = vld [vmem:[#allocation2 + $0xe1] sm:$0xff] }
  0x76   : > { %320 = vst.msk [vmem:[#allocation2 + $0xc9] sm:$0xff] %vm226_vm0, %v287_v46  ;;  %v485_v1 = vpack.c.bf16 %v453_v62, %v453_v62  ;;  %v455_v2 = vld [vmem:[#allocation2 + $0xf9] sm:$0xff]  ;;  %v662_v62 = vld [vmem:[#allocation2 + $0x22] sm:$0xff] }
  0x77   : > { %331 = vst.msk [vmem:[#allocation2 + $0x151] sm:$0xff] %vm226_vm0, %v298_v51  ;;  %v445_v56 = vld [vmem:[#allocation2 + $0x81] sm:$0xff]  ;;  %v487_v4 = vpack.c.bf16 %v455_v2, %v455_v2  ;;  %v342_v51 = vld [vmem:[#allocation2 + $0x38] sm:$0xff]  ;;  %v344_v2 = vld [vmem:[#allocation2 + $0x50] sm:$0xff] }
  0x78   : > { %550 = vrot.lane.b32.xlu1 %v476_v39, %s5164_s20  ;;  %333 = vst.msk [vmem:[#allocation2 + $0x169] sm:$0xff] %vm226_vm0, %v300_v54  ;;  %v5460_v59 = vpack.c.bf16 %v445_v56, %v445_v56  ;;  %v456_v5 = vld [vmem:[#allocation2 + $0x109] sm:$0xff]  ;;  %v661_v34 = vld [vmem:[#allocation2 + $0x1a] sm:$0xff]  ;;  %v5518_v54 = vpack.c.bf16 %v343_v49, %v343_v49  ;;  %v666_v56 = vld [vmem:[#allocation2 + $0x52] sm:$0xff] }
  0x79   : > { %540 = vrot.lane.b32.xlu2 %v5436_v41, %s5164_s20  ;;  %323 = vst.msk [vmem:[#allocation2 + $0xf1] sm:$0xff] %vm226_vm0, %v290_v55  ;;  %v488_v8 = vpack.c.bf16 %v456_v5, %v456_v5  ;;  %v458_v9 = vld [vmem:[#allocation2 + $0x121] sm:$0xff]  ;;  %v693_v38 = vpack.c.bf16 %v661_v34, %v661_v34  ;;  %v339_v39 = vld [vmem:[#allocation2 + $0x18] sm:$0xff]  ;;  %v5520_v55 = vpack.c.bf16 %v342_v51, %v342_v51 }
  0x7a   : > { %334 = vst.msk [vmem:[#allocation2 + $0x171] sm:$0xff] %vm226_vm0, %v301_v60  ;;  %v448_v0 = vld [vmem:[#allocation2 + $0xa9] sm:$0xff]  ;;  %v490_v11 = vpack.c.bf16 %v458_v9, %v458_v9  ;;  %v5508_v45 = vpack.c.bf16 %v339_v39, %v339_v39  ;;  %v664_v47 = vld [vmem:[#allocation2 + $0x3a] sm:$0xff]  ;;  %v698_v60 = vpack.c.bf16 %v666_v56, %v666_v56 }
  0x7b   : > { %326 = vst.msk [vmem:[#allocation2 + $0x111] sm:$0xff] %vm226_vm0, %v293_v63  ;;  %v5470_v3 = vpack.c.bf16 %v448_v0, %v448_v0  ;;  %v459_v12 = vld [vmem:[#allocation2 + $0x129] sm:$0xff]  ;;  %v340_v53 = vld [vmem:[#allocation2 + $0x20] sm:$0xff]  ;;  %v350_v34 = vld [vmem:[#allocation2 + $0x98] sm:$0xff] }
  0x7c   : > { %554 = vrot.lane.b32.xlu0 %v478_v43, %s5164_s20  ;;  %329 = vst.msk [vmem:[#allocation2 + $0x139] sm:$0xff] %vm226_vm0, %v296_v6  ;;  %v491_v15 = vpack.c.bf16 %v459_v12, %v459_v12  ;;  %v461_v16 = vld [vmem:[#allocation2 + $0x141] sm:$0xff]  ;;  %v663_v43 = vld [vmem:[#allocation2 + $0x32] sm:$0xff]  ;;  %v5522_v58 = vpack.c.bf16 %v340_v53, %v340_v53  ;;  %v665_v12 = vld [vmem:[#allocation2 + $0x4a] sm:$0xff]  ;;  %v5573_v39 = vpack.c.bf16 %v350_v34, %v350_v34 }
  0x7d   : > { %v451_v7 = vld [vmem:[#allocation2 + $0xc9] sm:$0xff]  ;;  %332 = vst.msk [vmem:[#allocation2 + $0x159] sm:$0xff] %vm226_vm0, %v299_v13  ;;  %v493_v18 = vpack.c.bf16 %v461_v16, %v461_v16  ;;  %v695_v46 = vpack.c.bf16 %v663_v43, %v663_v43  ;;  %v345_v0 = vld [vmem:[#allocation2 + $0x60] sm:$0xff]  ;;  %v355_v49 = vld [vmem:[#allocation2 + $0xd8] sm:$0xff] }
  0x7e   : > { %v5478_v10 = vpack.c.bf16 %v451_v7, %v451_v7  ;;  %v462_v19 = vld [vmem:[#allocation2 + $0x151] sm:$0xff]  ;;  %402 = vst.msk [vmem:[#allocation4] sm:$0xf] %vm401_vm3, %v369_v30  ;;  %v346_v63 = vld [vmem:[#allocation2 + $0x68] sm:$0xff]  ;;  %v5535_v5 = vpack.c.bf16 %v345_v0, %v345_v0  ;;  %v669_v6 = vld [vmem:[#allocation2 + $0x7a] sm:$0xff]  ;;  %v694_v7 = vpack.c.bf16 %v662_v62, %v662_v62  ;;  %v5590_v56 = vpack.c.bf16 %v355_v49, %v355_v49 }
  0x7f   : > { %v494_v21 = vpack.c.bf16 %v462_v19, %v462_v19  ;;  %v464_v22 = vld [vmem:[#allocation2 + $0x169] sm:$0xff]  ;;  %403 = vst.msk [vmem:[#allocation4 + $0x4] sm:$0xf] %vm401_vm3, %v370_v40  ;;  %v701_v9 = vpack.c.bf16 %v669_v6, %v669_v6  ;;  %v353_v53 = vld [vmem:[#allocation2 + $0xc0] sm:$0xff]  ;;  %v674_v6 = vld [vmem:[#allocation2 + $0xb2] sm:$0xff] }
  0x80   : > { %556 = vrot.lane.b32.xlu1 %v479_v48, %s5164_s20  ;;  %v454_v14 = vld [vmem:[#allocation2 + $0xf1] sm:$0xff]  ;;  %v496_v24 = vpack.c.bf16 %v464_v22, %v464_v22  ;;  %404 = vst.msk [vmem:[#allocation4 + $0x8] sm:$0xf] %vm401_vm3, %v5508_v45  ;;  %v659_v48 = vld [vmem:[#allocation2 + $0x2] sm:$0xff]  ;;  %v5553_v22 = vpack.c.bf16 %v665_v12, %v665_v12 }
  0x81   : > { %546 = vrot.lane.b32.xlu2 %v5448_v50, %s5164_s20  ;;  %v5486_v17 = vpack.c.bf16 %v454_v14, %v454_v14  ;;  %v465_v25 = vld [vmem:[#allocation2 + $0x171] sm:$0xff]  ;;  %406 = vst.msk [vmem:[#allocation4 + $0x10] sm:$0xf] %vm401_vm3, %v5506_v42  ;;  %v351_v31 = vld [vmem:[#allocation2 + $0xa8] sm:$0xff] }
  0x82   : > { %v457_v20 = vld [vmem:[#allocation2 + $0x111] sm:$0xff]  ;;  %v497_v28 = vpack.c.bf16 %v465_v25, %v465_v25  ;;  %408 = vst.msk [vmem:[#allocation4 + $0x18] sm:$0xf] %vm401_vm3, %v5518_v54  ;;  %v675_v37 = vld [vmem:[#allocation2 + $0xc2] sm:$0xff]  ;;  %v5575_v40 = vpack.c.bf16 %v351_v31, %v351_v31 }
  0x83   : > { %v5492_v23 = vpack.c.bf16 %v457_v20, %v457_v20  ;;  %v460_v26 = vld [vmem:[#allocation2 + $0x139] sm:$0xff]  ;;  %405 = vst.msk [vmem:[#allocation4 + $0xc] sm:$0xf] %vm401_vm3, %v5522_v58  ;;  %v349_v14 = vld [vmem:[#allocation2 + $0x90] sm:$0xff]  ;;  %v707_v43 = vpack.c.bf16 %v675_v37, %v675_v37  ;;  %v354_v51 = vld [vmem:[#allocation2 + $0xc8] sm:$0xff] }
  0x84   : > { %560 = vrot.lane.b32.xlu0 %v481_v52, %s5164_s20  ;;  %v5498_v32 = vpack.c.bf16 %v460_v26, %v460_v26  ;;  %v463_v35 = vld [vmem:[#allocation2 + $0x159] sm:$0xff]  ;;  %v696_v52 = vpack.c.bf16 %v664_v47, %v664_v47  ;;  %407 = vst.msk [vmem:[#allocation4 + $0x14] sm:$0xf] %vm401_vm3, %v5520_v55  ;;  %v5549_v19 = vpack.c.bf16 %v349_v14, %v349_v14  ;;  %v673_v27 = vld [vmem:[#allocation2 + $0xaa] sm:$0xff] }
  0x85   : > { %v495_v44 = vpack.c.bf16 %v463_v35, %v463_v35  ;;  %410 = vst.msk [vmem:[#allocation4 + $0x20] sm:$0xf] %vm401_vm3, %v5535_v5  ;;  %v352_v30 = vld [vmem:[#allocation2 + $0xb0] sm:$0xff]  ;;  %v5596_v62 = vpack.c.bf16 %v354_v51, %v354_v51  ;;  %v361_v31 = vld [vmem:[#allocation2 + $0x120] sm:$0xff] }
  0x86   : > { %414 = vst.msk [vmem:[#allocation4 + $0x30] sm:$0xf] %vm401_vm3, %v5549_v19  ;;  %v5569_v35 = vpack.c.bf16 %v352_v30, %v352_v30  ;;  %v671_v47 = vld [vmem:[#allocation2 + $0x92] sm:$0xff]  ;;  %v5632_v37 = vpack.c.bf16 %v361_v31, %v361_v31  ;;  %v685_v51 = vld [vmem:[#allocation2 + $0x13a] sm:$0xff] }
  0x87   : > { %415 = vst.msk [vmem:[#allocation4 + $0x34] sm:$0xf] %vm401_vm3, %v5573_v39 }
  0x88   : > { %562 = vrot.lane.b32.xlu1 %v482_v57, %s5164_s20  ;;  %v691_v57 = vpack.c.bf16 %v659_v48, %v659_v48  ;;  %417 = vst.msk [vmem:[#allocation4 + $0x3c] sm:$0xf] %vm401_vm3, %v5569_v35 }
  0x89   : > { %552 = vrot.lane.b32.xlu2 %v5460_v59, %s5164_s20  ;;  %v531_v29 = vpop.permute.xlu0 %530  ;;  %416 = vst.msk [vmem:[#allocation4 + $0x38] sm:$0xf] %vm401_vm3, %v5575_v40 }
  0x8a   : > { %627 = vst.msk [vmem:[#allocation4] sm:$0xf] %vm626_vm4, %v531_v29 }
  0x8b   : > { %420 = vst.msk [vmem:[#allocation4 + $0x48] sm:$0xf] %vm401_vm3, %v5590_v56 }
  0x8c   : > { %566 = vrot.lane.b32.xlu0 %v484_v61, %s5164_s20  ;;  %v667_v61 = vld [vmem:[#allocation2 + $0x62] sm:$0xff]  ;;  %419 = vst.msk [vmem:[#allocation4 + $0x44] sm:$0xf] %vm401_vm3, %v5596_v62 }
  0x8d   : > { %426 = vst.msk [vmem:[#allocation4 + $0x60] sm:$0xf] %vm401_vm3, %v5632_v37 }
  0x90   : > { %568 = vrot.lane.b32.xlu1 %v485_v1, %s5164_s20  ;;  %v699_v1 = vpack.c.bf16 %v667_v61, %v667_v61  ;;  %v5594_v61 = vpack.c.bf16 %v353_v53, %v353_v53  ;;  %v680_v53 = vld [vmem:[#allocation2 + $0xfa] sm:$0xff] }
  0x91   : > { %558 = vrot.lane.b32.xlu2 %v5470_v3, %s5164_s20 }
  0x92   : > { %418 = vst.msk [vmem:[#allocation4 + $0x40] sm:$0xf] %vm401_vm3, %v5594_v61 }
  0x94   : > { %572 = vrot.lane.b32.xlu0 %v487_v4, %s5164_s20  ;;  %v5533_v4 = vpack.c.bf16 %v346_v63, %v346_v63 }
  0x96   : > { %411 = vst.msk [vmem:[#allocation4 + $0x24] sm:$0xf] %vm401_vm3, %v5533_v4 }
  0x98   : > { %574 = vrot.lane.b32.xlu1 %v488_v8, %s5164_s20  ;;  %v5537_v8 = vpack.c.bf16 %v344_v2, %v344_v2 }
  0x99   : > { %564 = vrot.lane.b32.xlu2 %v5478_v10, %s5164_s20 }
  0x9a   : > { %409 = vst.msk [vmem:[#allocation4 + $0x1c] sm:$0xf] %vm401_vm3, %v5537_v8 }
  0x9c   : > { %578 = vrot.lane.b32.xlu0 %v490_v11, %s5164_s20  ;;  %v670_v11 = vld [vmem:[#allocation2 + $0x82] sm:$0xff] }
  0x9d   : > { %v702_v16 = vpack.c.bf16 %v670_v11, %v670_v11  ;;  %v357_v11 = vld [vmem:[#allocation2 + $0xf0] sm:$0xff] }
  0xa0   : > { %580 = vrot.lane.b32.xlu1 %v491_v15, %s5164_s20  ;;  %v348_v15 = vld [vmem:[#allocation2 + $0x80] sm:$0xff] }
  0xa1   : > { %570 = vrot.lane.b32.xlu2 %v5486_v17, %s5164_s20  ;;  %v5551_v20 = vpack.c.bf16 %v348_v15, %v348_v15  ;;  %v681_v15 = vld [vmem:[#allocation2 + $0x10a] sm:$0xff] }
  0xa3   : > { %413 = vst.msk [vmem:[#allocation4 + $0x2c] sm:$0xf] %vm401_vm3, %v5551_v20 }
  0xa4   : > { %584 = vrot.lane.b32.xlu0 %v493_v18, %s5164_s20  ;;  %v347_v18 = vld [vmem:[#allocation2 + $0x78] sm:$0xff] }
  0xa8   : > { %586 = vrot.lane.b32.xlu1 %v494_v21, %s5164_s20  ;;  %v672_v21 = vld [vmem:[#allocation2 + $0x9a] sm:$0xff] }
  0xa9   : > { %576 = vrot.lane.b32.xlu2 %v5492_v23, %s5164_s20  ;;  %v704_v25 = vpack.c.bf16 %v672_v21, %v672_v21  ;;  %v5617_v21 = vpack.c.bf16 %v357_v11, %v357_v11 }
  0xab   : > { %422 = vst.msk [vmem:[#allocation4 + $0x50] sm:$0xf] %vm401_vm3, %v5617_v21 }
  0xac   : > { %590 = vrot.lane.b32.xlu0 %v496_v24, %s5164_s20  ;;  %v5555_v24 = vpack.c.bf16 %v347_v18, %v347_v18 }
  0xae   : > { %412 = vst.msk [vmem:[#allocation4 + $0x28] sm:$0xf] %vm401_vm3, %v5555_v24 }
  0xb0   : > { %592 = vrot.lane.b32.xlu1 %v497_v28, %s5164_s20  ;;  %v668_v28 = vld [vmem:[#allocation2 + $0x6a] sm:$0xff] }
  0xb1   : > { %582 = vrot.lane.b32.xlu2 %v5498_v32, %s5164_s20 }
  0xb4   : > { %757 = vrot.lane.b32.xlu0 %v692_v33, %s5165_s25  ;;  %v705_v33 = vpack.c.bf16 %v673_v27, %v673_v27  ;;  %v682_v27 = vld [vmem:[#allocation2 + $0x112] sm:$0xff] }
  0xb5   : > { %v714_v34 = vpack.c.bf16 %v682_v27, %v682_v27  ;;  %v683_v27 = vld [vmem:[#allocation2 + $0x122] sm:$0xff] }
  0xb8   : > { %759 = vrot.lane.b32.xlu1 %v693_v38, %s5165_s25  ;;  %v5571_v38 = vpack.c.bf16 %v668_v28, %v668_v28 }
  0xb9   : > { %588 = vrot.lane.b32.xlu2 %v495_v44, %s5164_s20  ;;  %v676_v44 = vld [vmem:[#allocation2 + $0xca] sm:$0xff] }
  0xbc   : > { %763 = vrot.lane.b32.xlu0 %v695_v46, %s5165_s25 }
  0xc0   : > { %765 = vrot.lane.b32.xlu1 %v696_v52, %s5165_s25  ;;  %v708_v52 = vpack.c.bf16 %v676_v44, %v676_v44 }
  0xc1   : > { %755 = vrot.lane.b32.xlu2 %v691_v57, %s5165_s25  ;;  %v678_v57 = vld [vmem:[#allocation2 + $0xe2] sm:$0xff] }
  0xc2   : > { %v710_v0 = vpack.c.bf16 %v678_v57, %v678_v57 }
  0xc4   : > { %769 = vrot.lane.b32.xlu0 %v698_v60, %s5165_s25  ;;  %v5592_v60 = vpack.c.bf16 %v671_v47, %v671_v47 }
  0xc8   : > { %771 = vrot.lane.b32.xlu1 %v699_v1, %s5165_s25  ;;  %v679_v1 = vld [vmem:[#allocation2 + $0xf2] sm:$0xff] }
  0xc9   : > { %761 = vrot.lane.b32.xlu2 %v694_v7, %s5165_s25  ;;  %v711_v12 = vpack.c.bf16 %v679_v1, %v679_v1  ;;  %v717_v1 = vpack.c.bf16 %v685_v51, %v685_v51 }
  0xcb   : > { %v539_v13 = vpop.permute.xlu2 %538 }
  0xcc   : > { %775 = vrot.lane.b32.xlu0 %v701_v9, %s5165_s25  ;;  %631 = vst.msk [vmem:[#allocation4 + $0x10] sm:$0xf] %vm626_vm4, %v539_v13  ;;  %v358_v9 = vld [vmem:[#allocation2 + $0xf8] sm:$0xff]  ;;  %v356_v13 = vld [vmem:[#allocation2 + $0xe0] sm:$0xff] }
  0xcd   : > { %v5611_v14 = vpack.c.bf16 %v358_v9, %v358_v9  ;;  %v5615_v18 = vpack.c.bf16 %v356_v13, %v356_v13  ;;  %v5655_v9 = vpack.c.bf16 %v680_v53, %v680_v53 }
  0xcf   : > { %423 = vst.msk [vmem:[#allocation4 + $0x54] sm:$0xf] %vm401_vm3, %v5611_v14 }
  0xd0   : > { %777 = vrot.lane.b32.xlu1 %v702_v16, %s5165_s25  ;;  %v5613_v16 = vpack.c.bf16 %v674_v6, %v674_v6  ;;  %421 = vst.msk [vmem:[#allocation4 + $0x4c] sm:$0xf] %vm401_vm3, %v5615_v18 }
  0xd1   : > { %v535_v26 = vpop.permute.xlu1 %534  ;;  %767 = vrot.lane.b32.xlu2 %v5553_v22, %s5165_s25 }
  0xd2   : > { %629 = vst.msk [vmem:[#allocation4 + $0x8] sm:$0xf] %vm626_vm4, %v535_v26  ;;  %v713_v26 = vpack.c.bf16 %v681_v15, %v681_v15 }
  0xd3   : > { %v541_v29 = vpop.permute.xlu2 %540 }
  0xd4   : > { %781 = vrot.lane.b32.xlu0 %v704_v25, %s5165_s25  ;;  %632 = vst.msk [vmem:[#allocation4 + $0x14] sm:$0xf] %vm626_vm4, %v541_v29  ;;  %v677_v29 = vld [vmem:[#allocation2 + $0xda] sm:$0xff] }
  0xd5   : > { %v533_v36 = vpop.permute.xlu0 %532  ;;  %v5634_v44 = vpack.c.bf16 %v677_v29, %v677_v29  ;;  %v367_v29 = vld [vmem:[#allocation2 + $0x168] sm:$0xff] }
  0xd6   : > { %628 = vst.msk [vmem:[#allocation4 + $0x4] sm:$0xf] %vm626_vm4, %v533_v36  ;;  %v359_v36 = vld [vmem:[#allocation2 + $0x108] sm:$0xff] }
  0xd8   : > { %783 = vrot.lane.b32.xlu1 %v705_v33, %s5165_s25  ;;  %v360_v33 = vld [vmem:[#allocation2 + $0x110] sm:$0xff] }
  0xd9   : > { %773 = vrot.lane.b32.xlu2 %v5571_v38, %s5165_s25  ;;  %v5638_v47 = vpack.c.bf16 %v360_v33, %v360_v33  ;;  %v365_v33 = vld [vmem:[#allocation2 + $0x150] sm:$0xff] }
  0xda   : > { %v537_v46 = vpop.permute.xlu1 %536 }
  0xdb   : > { %630 = vst.msk [vmem:[#allocation4 + $0xc] sm:$0xf] %vm626_vm4, %v537_v46  ;;  %v547_v48 = vpop.permute.xlu2 %546  ;;  %v5636_v46 = vpack.c.bf16 %v359_v36, %v359_v36  ;;  %v690_v36 = vld [vmem:[#allocation2 + $0x172] sm:$0xff] }
  0xdc   : > { %787 = vrot.lane.b32.xlu0 %v707_v43, %s5165_s25  ;;  %635 = vst.msk [vmem:[#allocation4 + $0x20] sm:$0xf] %vm626_vm4, %v547_v48  ;;  %v684_v43 = vld [vmem:[#allocation2 + $0x12a] sm:$0xff] }
  0xdd   : > { %v716_v49 = vpack.c.bf16 %v684_v43, %v684_v43  ;;  %424 = vst.msk [vmem:[#allocation4 + $0x58] sm:$0xf] %vm401_vm3, %v5636_v46  ;;  %v5676_v43 = vpack.c.bf16 %v683_v27, %v683_v27 }
  0xde   : > { %v543_v63 = vpop.permute.xlu0 %542  ;;  %425 = vst.msk [vmem:[#allocation4 + $0x5c] sm:$0xf] %vm401_vm3, %v5638_v47 }
  0xdf   : > { %633 = vst.msk [vmem:[#allocation4 + $0x18] sm:$0xf] %vm626_vm4, %v543_v63  ;;  %v364_v63 = vld [vmem:[#allocation2 + $0x140] sm:$0xff] }
  0xe0   : > { %789 = vrot.lane.b32.xlu1 %v708_v52, %s5165_s25  ;;  %v5653_v6 = vpack.c.bf16 %v364_v63, %v364_v63 }
  0xe1   : > { %779 = vrot.lane.b32.xlu2 %v5592_v60, %s5165_s25 }
  0xe2   : > { %v545_v2 = vpop.permute.xlu1 %544  ;;  %429 = vst.msk [vmem:[#allocation4 + $0x6c] sm:$0xf] %vm401_vm3, %v5653_v6 }
  0xe3   : > { %634 = vst.msk [vmem:[#allocation4 + $0x1c] sm:$0xf] %vm626_vm4, %v545_v2  ;;  %v553_v7 = vpop.permute.xlu2 %552  ;;  %v362_v2 = vld [vmem:[#allocation2 + $0x128] sm:$0xff] }
  0xe4   : > { %793 = vrot.lane.b32.xlu0 %v710_v0, %s5165_s25  ;;  %638 = vst.msk [vmem:[#allocation4 + $0x2c] sm:$0xf] %vm626_vm4, %v553_v7  ;;  %v363_v0 = vld [vmem:[#allocation2 + $0x138] sm:$0xff]  ;;  %v5657_v11 = vpack.c.bf16 %v362_v2, %v362_v2 }
  0xe5   : > { %v687_v7 = vld [vmem:[#allocation2 + $0x152] sm:$0xff] }
  0xe6   : > { %v549_v25 = vpop.permute.xlu0 %548  ;;  %v719_v15 = vpack.c.bf16 %v687_v7, %v687_v7  ;;  %427 = vst.msk [vmem:[#allocation4 + $0x64] sm:$0xf] %vm401_vm3, %v5657_v11 }
  0xe7   : > { %636 = vst.msk [vmem:[#allocation4 + $0x24] sm:$0xf] %vm626_vm4, %v549_v25  ;;  %v688_v25 = vld [vmem:[#allocation2 + $0x15a] sm:$0xff] }
  0xe8   : > { %795 = vrot.lane.b32.xlu1 %v711_v12, %s5165_s25  ;;  %v5659_v12 = vpack.c.bf16 %v363_v0, %v363_v0  ;;  %v720_v31 = vpack.c.bf16 %v688_v25, %v688_v25  ;;  %v368_v0 = vld [vmem:[#allocation2 + $0x170] sm:$0xff] }
  0xe9   : > { %785 = vrot.lane.b32.xlu2 %v5613_v16, %s5165_s25  ;;  %v5697_v2 = vpack.c.bf16 %v368_v0, %v368_v0  ;;  %v1113_v0 = vld [vmem:[#allocation2 + $0x49] sm:$0xff] }
  0xea   : > { %v551_v28 = vpop.permute.xlu1 %550  ;;  %428 = vst.msk [vmem:[#allocation4 + $0x68] sm:$0xf] %vm401_vm3, %v5659_v12 }
  0xeb   : > { %637 = vst.msk [vmem:[#allocation4 + $0x28] sm:$0xf] %vm626_vm4, %v551_v28  ;;  %v559_v30 = vpop.permute.xlu2 %558 }
  0xec   : > { %799 = vrot.lane.b32.xlu0 %v713_v26, %s5165_s25  ;;  %641 = vst.msk [vmem:[#allocation4 + $0x38] sm:$0xf] %vm626_vm4, %v559_v30  ;;  %v366_v30 = vld [vmem:[#allocation2 + $0x158] sm:$0xff] }
  0xed   : > { %433 = vst.msk [vmem:[#allocation4 + $0x7c] sm:$0xf] %vm401_vm3, %v5697_v2 }
  0xee   : > { %v555_v48 = vpop.permute.xlu0 %554 }
  0xef   : > { %639 = vst.msk [vmem:[#allocation4 + $0x30] sm:$0xf] %vm626_vm4, %v555_v48  ;;  %v5678_v48 = vpack.c.bf16 %v365_v33, %v365_v33 }
  0xf0   : > { %801 = vrot.lane.b32.xlu1 %v714_v34, %s5165_s25  ;;  %v5674_v34 = vpack.c.bf16 %v367_v29, %v367_v29 }
  0xf1   : > { %791 = vrot.lane.b32.xlu2 %v5634_v44, %s5165_s25  ;;  %430 = vst.msk [vmem:[#allocation4 + $0x70] sm:$0xf] %vm401_vm3, %v5678_v48 }
  0xf2   : > { %v557_v52 = vpop.permute.xlu1 %556  ;;  %432 = vst.msk [vmem:[#allocation4 + $0x78] sm:$0xf] %vm401_vm3, %v5674_v34 }
  0xf3   : > { %640 = vst.msk [vmem:[#allocation4 + $0x34] sm:$0xf] %vm626_vm4, %v557_v52  ;;  %v565_v57 = vpop.permute.xlu2 %564  ;;  %v722_v52 = vpack.c.bf16 %v690_v36, %v690_v36 }
  0xf4   : > { %805 = vrot.lane.b32.xlu0 %v716_v49, %s5165_s25  ;;  %644 = vst.msk [vmem:[#allocation4 + $0x44] sm:$0xf] %vm626_vm4, %v565_v57  ;;  %v5680_v49 = vpack.c.bf16 %v366_v30, %v366_v30  ;;  %v686_v57 = vld [vmem:[#allocation2 + $0x142] sm:$0xff]  ;;  %v302_v30 = vld [vmem:[%s5359_s24 + $0xf0] sm:$0xff] }
  0xf5   : > { %335 = vst.msk [vmem:[#allocation2 + $0x181] sm:$0xff] %vm226_vm0, %v302_v30  ;;  %v1117_v30 = vld [vmem:[#allocation2 + $0x79] sm:$0xff] }
  0xf6   : > { %v561_v13 = vpop.permute.xlu0 %560  ;;  %431 = vst.msk [vmem:[#allocation4 + $0x74] sm:$0xf] %vm401_vm3, %v5680_v49 }
  0xf7   : > { %642 = vst.msk [vmem:[#allocation4 + $0x3c] sm:$0xf] %vm626_vm4, %v561_v13 }
  0xf8   : > { %807 = vrot.lane.b32.xlu1 %v717_v1, %s5165_s25  ;;  %v5695_v1 = vpack.c.bf16 %v686_v57, %v686_v57 }
  0xf9   : > { %797 = vrot.lane.b32.xlu2 %v5655_v9, %s5165_s25 }
  0xfa   : > { %v563_v26 = vpop.permute.xlu1 %562 }
  0xfb   : > { %643 = vst.msk [vmem:[#allocation4 + $0x40] sm:$0xf] %vm626_vm4, %v563_v26  ;;  %v571_v28 = vpop.permute.xlu2 %570 }
  0xfc   : > { %811 = vrot.lane.b32.xlu0 %v719_v15, %s5165_s25  ;;  %647 = vst.msk [vmem:[#allocation4 + $0x50] sm:$0xf] %vm626_vm4, %v571_v28  ;;  %v689_v15 = vld [vmem:[#allocation2 + $0x16a] sm:$0xff] }
  0xfd   : > { %v5710_v26 = vpack.c.bf16 %v689_v15, %v689_v15 }
  0xfe   : > { %v567_v51 = vpop.permute.xlu0 %566 }
  0xff   : > { %645 = vst.msk [vmem:[#allocation4 + $0x48] sm:$0xf] %vm626_vm4, %v567_v51 }
 0x100   : > { %813 = vrot.lane.b32.xlu1 %v720_v31, %s5165_s25 }
 0x101   : > { %803 = vrot.lane.b32.xlu2 %v5676_v43, %s5165_s25 }
 0x102   : > { %v569_v53 = vpop.permute.xlu1 %568 }
 0x103   : > { %646 = vst.msk [vmem:[#allocation4 + $0x4c] sm:$0xf] %vm626_vm4, %v569_v53  ;;  %v577_v63 = vpop.permute.xlu2 %576 }
 0x104   : > { %817 = vrot.lane.b32.xlu0 %v722_v52, %s5165_s25  ;;  %650 = vst.msk [vmem:[#allocation4 + $0x5c] sm:$0xf] %vm626_vm4, %v577_v63  ;;  %v1110_v52 = vld [vmem:[#allocation2 + $0x21] sm:$0xff] }
 0x105   : > { %v1142_v57 = vpack.c.bf16 %v1110_v52, %v1110_v52 }
 0x106   : > { %v573_v7 = vpop.permute.xlu0 %572 }
 0x107   : > { %648 = vst.msk [vmem:[#allocation4 + $0x54] sm:$0xf] %vm626_vm4, %v573_v7 }
 0x108   : > { %980 = vrot.lane.b32.xlu1 %v5508_v45, %s5166_s26 }
 0x109   : > { %809 = vrot.lane.b32.xlu2 %v5695_v1, %s5165_s25 }
 0x10a   : > { %v575_v13 = vpop.permute.xlu1 %574 }
 0x10b   : > { %649 = vst.msk [vmem:[#allocation4 + $0x58] sm:$0xf] %vm626_vm4, %v575_v13  ;;  %v583_v25 = vpop.permute.xlu2 %582  ;;  %v1145_v13 = vpack.c.bf16 %v1113_v0, %v1113_v0  ;;  %v1136_v0 = vld [vmem:[#allocation2 + $0x159] sm:$0xff] }
 0x10c   : > { %984 = vrot.lane.b32.xlu0 %v5506_v42, %s5166_s26  ;;  %653 = vst.msk [vmem:[#allocation4 + $0x68] sm:$0xf] %vm626_vm4, %v583_v25 }
 0x10e   : > { %v579_v27 = vpop.permute.xlu0 %578 }
 0x10f   : > { %651 = vst.msk [vmem:[#allocation4 + $0x60] sm:$0xf] %vm626_vm4, %v579_v27  ;;  %v1116_v27 = vld [vmem:[#allocation2 + $0x69] sm:$0xff] }
 0x110   : > { %986 = vrot.lane.b32.xlu1 %v5520_v55, %s5166_s26 }
 0x111   : > { %815 = vrot.lane.b32.xlu2 %v5710_v26, %s5165_s25 }
 0x112   : > { %v581_v45 = vpop.permute.xlu1 %580 }
 0x113   : > { %652 = vst.msk [vmem:[#allocation4 + $0x64] sm:$0xf] %vm626_vm4, %v581_v45  ;;  %v589_v28 = vpop.permute.xlu2 %588  ;;  %v1111_v45 = vld [vmem:[#allocation2 + $0x31] sm:$0xff] }
 0x114   : > { %990 = vrot.lane.b32.xlu0 %v5537_v8, %s5166_s26  ;;  %656 = vst.msk [vmem:[#allocation4 + $0x74] sm:$0xf] %vm626_vm4, %v589_v28 }
 0x116   : > { %v585_v42 = vpop.permute.xlu0 %584 }
 0x117   : > { %654 = vst.msk [vmem:[#allocation4 + $0x6c] sm:$0xf] %vm626_vm4, %v585_v42  ;;  %v5822_v42 = vpack.c.bf16 %v1111_v45, %v1111_v45  ;;  %v1139_v45 = vld [vmem:[#allocation2 + $0x181] sm:$0xff] }
 0x118   : > { %992 = vrot.lane.b32.xlu1 %v5535_v5, %s5166_s26 }
 0x119   : > { %982 = vrot.lane.b32.xlu2 %v5522_v58, %s5166_s26 }
 0x11a   : > { %v587_v55 = vpop.permute.xlu1 %586 }
 0x11b   : > { %655 = vst.msk [vmem:[#allocation4 + $0x70] sm:$0xf] %vm626_vm4, %v587_v55  ;;  %v756_v29 = vpop.permute.xlu2 %755 }
 0x11c   : > { %996 = vrot.lane.b32.xlu0 %v5555_v24, %s5166_s26  ;;  %852 = vst.msk [vmem:[#allocation4] sm:$0xf] %vm851_vm5, %v756_v29  ;;  %v1119_v29 = vld [vmem:[#allocation2 + $0x91] sm:$0xff] }
 0x11e   : > { %v591_v8 = vpop.permute.xlu0 %590 }
 0x11f   : > { %657 = vst.msk [vmem:[#allocation4 + $0x78] sm:$0xf] %vm626_vm4, %v591_v8 }
 0x120   : > { %998 = vrot.lane.b32.xlu1 %v5551_v20, %s5166_s26 }
 0x121   : > { %988 = vrot.lane.b32.xlu2 %v5518_v54, %s5166_s26 }
 0x122   : > { %v593_v58 = vpop.permute.xlu1 %592 }
 0x123   : > { %658 = vst.msk [vmem:[#allocation4 + $0x7c] sm:$0xf] %vm626_vm4, %v593_v58  ;;  %v762_v5 = vpop.permute.xlu2 %761  ;;  %v1114_v58 = vld [vmem:[#allocation2 + $0x51] sm:$0xff] }
 0x124   : > { %1002 = vrot.lane.b32.xlu0 %v5573_v39, %s5166_s26  ;;  %855 = vst.msk [vmem:[#allocation4 + $0xc] sm:$0xf] %vm851_vm5, %v762_v5  ;;  %v1151_v5 = vpack.c.bf16 %v1119_v29, %v1119_v29 }
 0x126   : > { %v758_v24 = vpop.permute.xlu0 %757 }
 0x127   : > { %853 = vst.msk [vmem:[#allocation4 + $0x4] sm:$0xf] %vm851_vm5, %v758_v24  ;;  %v5832_v24 = vpack.c.bf16 %v1114_v58, %v1114_v58  ;;  %v1135_v58 = vld [vmem:[#allocation2 + $0x151] sm:$0xff] }
 0x128   : > { %1004 = vrot.lane.b32.xlu1 %v5575_v40, %s5166_s26 }
 0x129   : > { %994 = vrot.lane.b32.xlu2 %v5533_v4, %s5166_s26 }
 0x12a   : > { %v760_v54 = vpop.permute.xlu1 %759 }
 0x12b   : > { %854 = vst.msk [vmem:[#allocation4 + $0x8] sm:$0xf] %vm851_vm5, %v760_v54  ;;  %v768_v20 = vpop.permute.xlu2 %767 }
 0x12c   : > { %1008 = vrot.lane.b32.xlu0 %v5594_v61, %s5166_s26  ;;  %858 = vst.msk [vmem:[#allocation4 + $0x18] sm:$0xf] %vm851_vm5, %v768_v20  ;;  %v1122_v20 = vld [vmem:[#allocation2 + $0xb1] sm:$0xff] }
 0x12e   : > { %v764_v39 = vpop.permute.xlu0 %763 }
 0x12f   : > { %856 = vst.msk [vmem:[#allocation4 + $0x10] sm:$0xf] %vm851_vm5, %v764_v39 }
 0x130   : > { %1010 = vrot.lane.b32.xlu1 %v5596_v62, %s5166_s26 }
 0x131   : > { %1000 = vrot.lane.b32.xlu2 %v5549_v19, %s5166_s26 }
 0x132   : > { %v766_v4 = vpop.permute.xlu1 %765 }
 0x133   : > { %857 = vst.msk [vmem:[#allocation4 + $0x14] sm:$0xf] %vm851_vm5, %v766_v4  ;;  %v774_v40 = vpop.permute.xlu2 %773 }
 0x134   : > { %1014 = vrot.lane.b32.xlu0 %v5615_v18, %s5166_s26  ;;  %861 = vst.msk [vmem:[#allocation4 + $0x24] sm:$0xf] %vm851_vm5, %v774_v40  ;;  %v5842_v40 = vpack.c.bf16 %v1117_v30, %v1117_v30 }
 0x136   : > { %v770_v61 = vpop.permute.xlu0 %769 }
 0x137   : > { %859 = vst.msk [vmem:[#allocation4 + $0x1c] sm:$0xf] %vm851_vm5, %v770_v61 }
 0x138   : > { %1016 = vrot.lane.b32.xlu1 %v5617_v21, %s5166_s26 }
 0x139   : > { %1006 = vrot.lane.b32.xlu2 %v5569_v35, %s5166_s26 }
 0x13a   : > { %v772_v62 = vpop.permute.xlu1 %771 }
 0x13b   : > { %860 = vst.msk [vmem:[#allocation4 + $0x20] sm:$0xf] %vm851_vm5, %v772_v62  ;;  %v780_v19 = vpop.permute.xlu2 %779  ;;  %v1125_v62 = vld [vmem:[#allocation2 + $0xd9] sm:$0xff] }
 0x13c   : > { %1020 = vrot.lane.b32.xlu0 %v5636_v46, %s5166_s26  ;;  %864 = vst.msk [vmem:[#allocation4 + $0x30] sm:$0xf] %vm851_vm5, %v780_v19 }
 0x13e   : > { %v776_v18 = vpop.permute.xlu0 %775 }
 0x13f   : > { %862 = vst.msk [vmem:[#allocation4 + $0x28] sm:$0xf] %vm851_vm5, %v776_v18  ;;  %v1120_v18 = vld [vmem:[#allocation2 + $0x99] sm:$0xff] }
 0x140   : > { %1022 = vrot.lane.b32.xlu1 %v5638_v47, %s5166_s26  ;;  %v303_v47 = vld [vmem:[%s5359_s24 + $0xf8] sm:$0xff] }
 0x141   : > { %1012 = vrot.lane.b32.xlu2 %v5590_v56, %s5166_s26  ;;  %336 = vst.msk [vmem:[#allocation2 + $0x189] sm:$0xff] %vm226_vm0, %v303_v47  ;;  %v1128_v47 = vld [vmem:[#allocation2 + $0xf9] sm:$0xff] }
 0x142   : > { %v778_v35 = vpop.permute.xlu1 %777 }
 0x143   : > { %863 = vst.msk [vmem:[#allocation4 + $0x2c] sm:$0xf] %vm851_vm5, %v778_v35  ;;  %v786_v21 = vpop.permute.xlu2 %785 }
 0x144   : > { %1026 = vrot.lane.b32.xlu0 %v5657_v11, %s5166_s26  ;;  %867 = vst.msk [vmem:[#allocation4 + $0x3c] sm:$0xf] %vm851_vm5, %v786_v21  ;;  %v5852_v21 = vpack.c.bf16 %v1120_v18, %v1120_v18 }
 0x146   : > { %v782_v46 = vpop.permute.xlu0 %781 }
 0x147   : > { %865 = vst.msk [vmem:[#allocation4 + $0x34] sm:$0xf] %vm851_vm5, %v782_v46 }
 0x148   : > { %1028 = vrot.lane.b32.xlu1 %v5659_v12, %s5166_s26  ;;  %v914_v12 = vld [vmem:[#allocation2 + $0x180] sm:$0xff]  ;;  %v1140_v29 = vld [vmem:[#allocation2 + $0x189] sm:$0xff] }
 0x149   : > { %1018 = vrot.lane.b32.xlu2 %v5611_v14, %s5166_s26  ;;  %v946_v36 = vpack.c.bf16 %v914_v12, %v914_v12 }
 0x14a   : > { %v784_v56 = vpop.permute.xlu1 %783 }
 0x14b   : > { %866 = vst.msk [vmem:[#allocation4 + $0x38] sm:$0xf] %vm851_vm5, %v784_v56  ;;  %v792_v31 = vpop.permute.xlu2 %791 }
 0x14c   : > { %1032 = vrot.lane.b32.xlu0 %v5678_v48, %s5166_s26  ;;  %870 = vst.msk [vmem:[#allocation4 + $0x48] sm:$0xf] %vm851_vm5, %v792_v31  ;;  %v1109_v48 = vld [vmem:[#allocation2 + $0x19] sm:$0xff]  ;;  %v1123_v31 = vld [vmem:[#allocation2 + $0xc1] sm:$0xff] }
 0x14d   : > { %v5862_v12 = vpack.c.bf16 %v1123_v31, %v1123_v31 }
 0x14e   : > { %v788_v11 = vpop.permute.xlu0 %787 }
 0x14f   : > { %868 = vst.msk [vmem:[#allocation4 + $0x40] sm:$0xf] %vm851_vm5, %v788_v11 }
 0x150   : > { %1034 = vrot.lane.b32.xlu1 %v5680_v49, %s5166_s26  ;;  %v1141_v49 = vpack.c.bf16 %v1109_v48, %v1109_v48  ;;  %v1126_v48 = vld [vmem:[#allocation2 + $0xe1] sm:$0xff] }
 0x151   : > { %1024 = vrot.lane.b32.xlu2 %v5632_v37, %s5166_s26 }
 0x152   : > { %v790_v14 = vpop.permute.xlu1 %789 }
 0x153   : > { %869 = vst.msk [vmem:[#allocation4 + $0x44] sm:$0xf] %vm851_vm5, %v790_v14  ;;  %v798_v33 = vpop.permute.xlu2 %797 }
 0x154   : > { %1038 = vrot.lane.b32.xlu0 %v5697_v2, %s5166_s26  ;;  %873 = vst.msk [vmem:[#allocation4 + $0x54] sm:$0xf] %vm851_vm5, %v798_v33  ;;  %v915_v2 = vld [vmem:[#allocation2 + $0x188] sm:$0xff] }
 0x155   : > { %v5812_v15 = vpack.c.bf16 %v915_v2, %v915_v2  ;;  %v1131_v33 = vld [vmem:[#allocation2 + $0x121] sm:$0xff] }
 0x156   : > { %v794_v51 = vpop.permute.xlu0 %793 }
 0x157   : > { %871 = vst.msk [vmem:[#allocation4 + $0x4c] sm:$0xf] %vm851_vm5, %v794_v51 }
 0x158   : > { %1040 = vrot.lane.b32.xlu1 %v946_v36, %s5166_s26 }
 0x159   : > { %1030 = vrot.lane.b32.xlu2 %v5653_v6, %s5166_s26 }
 0x15a   : > { %v796_v37 = vpop.permute.xlu1 %795 }
 0x15b   : > { %872 = vst.msk [vmem:[#allocation4 + $0x50] sm:$0xf] %vm851_vm5, %v796_v37  ;;  %v804_v53 = vpop.permute.xlu2 %803  ;;  %v1134_v37 = vld [vmem:[#allocation2 + $0x141] sm:$0xff] }
 0x15c   : > { %1205 = vrot.lane.b32.xlu0 %v1141_v49, %s5167_s27  ;;  %876 = vst.msk [vmem:[#allocation4 + $0x60] sm:$0xf] %vm851_vm5, %v804_v53  ;;  %v5872_v49 = vpack.c.bf16 %v1126_v48, %v1126_v48 }
 0x15e   : > { %v800_v63 = vpop.permute.xlu0 %799 }
 0x15f   : > { %874 = vst.msk [vmem:[#allocation4 + $0x58] sm:$0xf] %vm851_vm5, %v800_v63 }
 0x160   : > { %1207 = vrot.lane.b32.xlu1 %v1142_v57, %s5167_s27  ;;  %v1129_v57 = vld [vmem:[#allocation2 + $0x109] sm:$0xff] }
 0x161   : > { %1036 = vrot.lane.b32.xlu2 %v5674_v34, %s5166_s26 }
 0x162   : > { %v802_v6 = vpop.permute.xlu1 %801 }
 0x163   : > { %875 = vst.msk [vmem:[#allocation4 + $0x5c] sm:$0xf] %vm851_vm5, %v802_v6  ;;  %v810_v7 = vpop.permute.xlu2 %809  ;;  %v5882_v6 = vpack.c.bf16 %v1129_v57, %v1129_v57 }
 0x164   : > { %1211 = vrot.lane.b32.xlu0 %v5436_v41, %s5167_s27  ;;  %879 = vst.msk [vmem:[#allocation4 + $0x6c] sm:$0xf] %vm851_vm5, %v810_v7  ;;  %v1148_v41 = vpack.c.bf16 %v1116_v27, %v1116_v27  ;;  %v5886_v7 = vpack.c.bf16 %v1136_v0, %v1136_v0  ;;  %v1132_v27 = vld [vmem:[#allocation2 + $0x129] sm:$0xff] }
 0x165   : > { %v1348_v0 = vld [vmem:[#allocation2 + $0xc2] sm:$0xff] }
 0x166   : > { %v806_v25 = vpop.permute.xlu0 %805 }
 0x167   : > { %877 = vst.msk [vmem:[#allocation4 + $0x64] sm:$0xf] %vm851_vm5, %v806_v25 }
 0x168   : > { %1213 = vrot.lane.b32.xlu1 %v1145_v13, %s5167_s27  ;;  %v1137_v13 = vld [vmem:[#allocation2 + $0x169] sm:$0xff] }
 0x169   : > { %1042 = vrot.lane.b32.xlu2 %v5812_v15, %s5166_s26 }
 0x16a   : > { %v808_v34 = vpop.permute.xlu1 %807 }
 0x16b   : > { %878 = vst.msk [vmem:[#allocation4 + $0x68] sm:$0xf] %vm851_vm5, %v808_v34  ;;  %v816_v28 = vpop.permute.xlu2 %815  ;;  %v1169_v34 = vpack.c.bf16 %v1137_v13, %v1137_v13  ;;  %v1343_v13 = vld [vmem:[#allocation2 + $0x82] sm:$0xff] }
 0x16c   : > { %1217 = vrot.lane.b32.xlu0 %v5448_v50, %s5167_s27  ;;  %882 = vst.msk [vmem:[#allocation4 + $0x78] sm:$0xf] %vm851_vm5, %v816_v28  ;;  %v5894_v28 = vpack.c.bf16 %v1132_v27, %v1132_v27  ;;  %v5952_v27 = vpack.c.bf16 %v1343_v13, %v1343_v13 }
 0x16e   : > { %v812_v55 = vpop.permute.xlu0 %811 }
 0x16f   : > { %880 = vst.msk [vmem:[#allocation4 + $0x70] sm:$0xf] %vm851_vm5, %v812_v55  ;;  %v5898_v55 = vpack.c.bf16 %v1139_v45, %v1139_v45 }
 0x170   : > { %1219 = vrot.lane.b32.xlu1 %v1148_v41, %s5167_s27 }
 0x171   : > { %1209 = vrot.lane.b32.xlu2 %v5822_v42, %s5167_s27 }
 0x172   : > { %v814_v8 = vpop.permute.xlu1 %813 }
 0x173   : > { %881 = vst.msk [vmem:[#allocation4 + $0x74] sm:$0xf] %vm851_vm5, %v814_v8  ;;  %v983_v50 = vpop.permute.xlu2 %982 }
 0x174   : > { %1223 = vrot.lane.b32.xlu0 %v5460_v59, %s5167_s27  ;;  %1078 = vst.msk [vmem:[#allocation4 + $0x4] sm:$0xf] %vm1076_vm6, %v983_v50  ;;  %v1154_v59 = vpack.c.bf16 %v1122_v20, %v1122_v20  ;;  %v5906_v20 = vpack.c.bf16 %v1135_v58, %v1135_v58 }
 0x176   : > { %v818_v54 = vpop.permute.xlu0 %817 }
 0x177   : > { %883 = vst.msk [vmem:[#allocation4 + $0x7c] sm:$0xf] %vm851_vm5, %v818_v54  ;;  %v1335_v54 = vld [vmem:[#allocation2 + $0x22] sm:$0xff] }
 0x178   : > { %1225 = vrot.lane.b32.xlu1 %v1151_v5, %s5167_s27  ;;  %v1172_v5 = vpack.c.bf16 %v1140_v29, %v1140_v29  ;;  %v1367_v30 = vpack.c.bf16 %v1335_v54, %v1335_v54  ;;  %v1349_v54 = vld [vmem:[#allocation2 + $0xca] sm:$0xff] }
 0x179   : > { %1215 = vrot.lane.b32.xlu2 %v5832_v24, %s5167_s27 }
 0x17a   : > { %v981_v39 = vpop.permute.xlu1 %980 }
 0x17b   : > { %1077 = vst.msk [vmem:[#allocation4] sm:$0xf] %vm1076_vm6, %v981_v39  ;;  %v989_v4 = vpop.permute.xlu2 %988 }
 0x17c   : > { %1229 = vrot.lane.b32.xlu0 %v5470_v3, %s5167_s27  ;;  %1081 = vst.msk [vmem:[#allocation4 + $0x10] sm:$0xf] %vm1076_vm6, %v989_v4  ;;  %v1157_v3 = vpack.c.bf16 %v1125_v62, %v1125_v62  ;;  %v1336_v4 = vld [vmem:[#allocation2 + $0x32] sm:$0xff] }
 0x17e   : > { %v985_v61 = vpop.permute.xlu0 %984 }
 0x17f   : > { %1079 = vst.msk [vmem:[#allocation4 + $0x8] sm:$0xf] %vm1076_vm6, %v985_v61  ;;  %v1138_v61 = vld [vmem:[#allocation2 + $0x171] sm:$0xff] }
 0x180   : > { %1231 = vrot.lane.b32.xlu1 %v1154_v59, %s5167_s27  ;;  %v5915_v18 = vpack.c.bf16 %v1138_v61, %v1138_v61 }
 0x181   : > { %1221 = vrot.lane.b32.xlu2 %v5842_v40, %s5167_s27 }
 0x182   : > { %v987_v19 = vpop.permute.xlu1 %986 }
 0x183   : > { %1080 = vst.msk [vmem:[#allocation4 + $0xc] sm:$0xf] %vm1076_vm6, %v987_v19  ;;  %v995_v35 = vpop.permute.xlu2 %994  ;;  %v1368_v19 = vpack.c.bf16 %v1336_v4, %v1336_v4 }
 0x184   : > { %1235 = vrot.lane.b32.xlu0 %v5478_v10, %s5167_s27  ;;  %1084 = vst.msk [vmem:[#allocation4 + $0x1c] sm:$0xf] %vm1076_vm6, %v995_v35  ;;  %v1160_v10 = vpack.c.bf16 %v1128_v47, %v1128_v47  ;;  %v1334_v47 = vld [vmem:[#allocation2 + $0x1a] sm:$0xff] }
 0x186   : > { %v991_v46 = vpop.permute.xlu0 %990 }
 0x187   : > { %1082 = vst.msk [vmem:[#allocation4 + $0x14] sm:$0xf] %vm1076_vm6, %v991_v46 }
 0x188   : > { %1237 = vrot.lane.b32.xlu1 %v1157_v3, %s5167_s27  ;;  %v1339_v3 = vld [vmem:[#allocation2 + $0x52] sm:$0xff] }
 0x189   : > { %1227 = vrot.lane.b32.xlu2 %v5852_v21, %s5167_s27  ;;  %v1371_v31 = vpack.c.bf16 %v1339_v3, %v1339_v3 }
 0x18a   : > { %v993_v56 = vpop.permute.xlu1 %992 }
 0x18b   : > { %1083 = vst.msk [vmem:[#allocation4 + $0x18] sm:$0xf] %vm1076_vm6, %v993_v56  ;;  %v1001_v11 = vpop.permute.xlu2 %1000 }
 0x18c   : > { %1241 = vrot.lane.b32.xlu0 %v5486_v17, %s5167_s27  ;;  %1087 = vst.msk [vmem:[#allocation4 + $0x28] sm:$0xf] %vm1076_vm6, %v1001_v11  ;;  %v1163_v17 = vpack.c.bf16 %v1131_v33, %v1131_v33  ;;  %v1366_v11 = vpack.c.bf16 %v1334_v47, %v1334_v47 }
 0x18e   : > { %v997_v14 = vpop.permute.xlu0 %996 }
 0x18f   : > { %1085 = vst.msk [vmem:[#allocation4 + $0x20] sm:$0xf] %vm1076_vm6, %v997_v14  ;;  %v1342_v14 = vld [vmem:[#allocation2 + $0x7a] sm:$0xff] }
 0x190   : > { %1243 = vrot.lane.b32.xlu1 %v1160_v10, %s5167_s27 }
 0x191   : > { %1233 = vrot.lane.b32.xlu2 %v5862_v12, %s5167_s27 }
 0x192   : > { %v999_v36 = vpop.permute.xlu1 %998 }
 0x193   : > { %1086 = vst.msk [vmem:[#allocation4 + $0x24] sm:$0xf] %vm1076_vm6, %v999_v36  ;;  %v1007_v51 = vpop.permute.xlu2 %1006  ;;  %v1337_v36 = vld [vmem:[#allocation2 + $0x3a] sm:$0xff] }
 0x194   : > { %1247 = vrot.lane.b32.xlu0 %v5492_v23, %s5167_s27  ;;  %1090 = vst.msk [vmem:[#allocation4 + $0x34] sm:$0xf] %vm1076_vm6, %v1007_v51  ;;  %v1166_v23 = vpack.c.bf16 %v1134_v37, %v1134_v37  ;;  %v5932_v51 = vpack.c.bf16 %v1337_v36, %v1337_v36  ;;  %v1358_v36 = vld [vmem:[#allocation2 + $0x13a] sm:$0xff] }
 0x196   : > { %v1003_v52 = vpop.permute.xlu0 %1002 }
 0x197   : > { %1088 = vst.msk [vmem:[#allocation4 + $0x2c] sm:$0xf] %vm1076_vm6, %v1003_v52  ;;  %v1345_v52 = vld [vmem:[#allocation2 + $0x9a] sm:$0xff] }
 0x198   : > { %1249 = vrot.lane.b32.xlu1 %v1163_v17, %s5167_s27  ;;  %v1377_v57 = vpack.c.bf16 %v1345_v52, %v1345_v52 }
 0x199   : > { %1239 = vrot.lane.b32.xlu2 %v5872_v49, %s5167_s27 }
 0x19a   : > { %v1005_v53 = vpop.permute.xlu1 %1004 }
 0x19b   : > { %1089 = vst.msk [vmem:[#allocation4 + $0x30] sm:$0xf] %vm1076_vm6, %v1005_v53  ;;  %v1013_v63 = vpop.permute.xlu2 %1012  ;;  %v1340_v53 = vld [vmem:[#allocation2 + $0x62] sm:$0xff] }
 0x19c   : > { %1253 = vrot.lane.b32.xlu0 %v5498_v32, %s5167_s27  ;;  %1093 = vst.msk [vmem:[#allocation4 + $0x40] sm:$0xf] %vm1076_vm6, %v1013_v63  ;;  %v5942_v63 = vpack.c.bf16 %v1340_v53, %v1340_v53  ;;  %v1560_v53 = vld [vmem:[#allocation2 + $0x30] sm:$0xff] }
 0x19e   : > { %v1009_v2 = vpop.permute.xlu0 %1008 }
 0x19f   : > { %1091 = vst.msk [vmem:[#allocation4 + $0x38] sm:$0xf] %vm1076_vm6, %v1009_v2 }
 0x1a0   : > { %1255 = vrot.lane.b32.xlu1 %v1166_v23, %s5167_s27 }
 0x1a1   : > { %1245 = vrot.lane.b32.xlu2 %v5882_v6, %s5167_s27 }
 0x1a2   : > { %v1011_v25 = vpop.permute.xlu1 %1010 }
 0x1a3   : > { %1092 = vst.msk [vmem:[#allocation4 + $0x3c] sm:$0xf] %vm1076_vm6, %v1011_v25  ;;  %v1019_v32 = vpop.permute.xlu2 %1018 }
 0x1a4   : > { %1259 = vrot.lane.b32.xlu0 %v5886_v7, %s5167_s27  ;;  %1096 = vst.msk [vmem:[#allocation4 + $0x4c] sm:$0xf] %vm1076_vm6, %v1019_v32 }
 0x1a6   : > { %v1015_v41 = vpop.permute.xlu0 %1014 }
 0x1a7   : > { %1094 = vst.msk [vmem:[#allocation4 + $0x44] sm:$0xf] %vm1076_vm6, %v1015_v41  ;;  %v1346_v41 = vld [vmem:[#allocation2 + $0xaa] sm:$0xff] }
 0x1a8   : > { %1261 = vrot.lane.b32.xlu1 %v1169_v34, %s5167_s27  ;;  %v1351_v34 = vld [vmem:[#allocation2 + $0xe2] sm:$0xff] }
 0x1a9   : > { %1251 = vrot.lane.b32.xlu2 %v5894_v28, %s5167_s27 }
 0x1aa   : > { %v1017_v8 = vpop.permute.xlu1 %1016 }
 0x1ab   : > { %1095 = vst.msk [vmem:[#allocation4 + $0x48] sm:$0xf] %vm1076_vm6, %v1017_v8  ;;  %v1025_v50 = vpop.permute.xlu2 %1024  ;;  %v5962_v8 = vpack.c.bf16 %v1346_v41, %v1346_v41 }
 0x1ac   : > { %1265 = vrot.lane.b32.xlu0 %v5898_v55, %s5167_s27  ;;  %1099 = vst.msk [vmem:[#allocation4 + $0x58] sm:$0xf] %vm1076_vm6, %v1025_v50  ;;  %v1354_v50 = vld [vmem:[#allocation2 + $0x10a] sm:$0xff] }
 0x1ae   : > { %v1021_v39 = vpop.permute.xlu0 %1020 }
 0x1af   : > { %1097 = vst.msk [vmem:[#allocation4 + $0x50] sm:$0xf] %vm1076_vm6, %v1021_v39 }
 0x1b0   : > { %1267 = vrot.lane.b32.xlu1 %v1172_v5, %s5167_s27 }
 0x1b1   : > { %1257 = vrot.lane.b32.xlu2 %v5906_v20, %s5167_s27 }
 0x1b2   : > { %v1023_v59 = vpop.permute.xlu1 %1022 }
 0x1b3   : > { %1098 = vst.msk [vmem:[#allocation4 + $0x54] sm:$0xf] %vm1076_vm6, %v1023_v59  ;;  %v1031_v62 = vpop.permute.xlu2 %1030  ;;  %v1357_v59 = vld [vmem:[#allocation2 + $0x12a] sm:$0xff] }
 0x1b4   : > { %1432 = vrot.lane.b32.xlu0 %v1367_v30, %s5168_s28  ;;  %1102 = vst.msk [vmem:[#allocation4 + $0x64] sm:$0xf] %vm1076_vm6, %v1031_v62  ;;  %v5972_v30 = vpack.c.bf16 %v1349_v54, %v1349_v54  ;;  %v1352_v62 = vld [vmem:[#allocation2 + $0xf2] sm:$0xff] }
 0x1b6   : > { %v1027_v35 = vpop.permute.xlu0 %1026 }
 0x1b7   : > { %1100 = vst.msk [vmem:[#allocation4 + $0x5c] sm:$0xf] %vm1076_vm6, %v1027_v35  ;;  %v5982_v35 = vpack.c.bf16 %v1352_v62, %v1352_v62 }
 0x1b8   : > { %1434 = vrot.lane.b32.xlu1 %v1368_v19, %s5168_s28 }
 0x1b9   : > { %1263 = vrot.lane.b32.xlu2 %v5915_v18, %s5167_s27 }
 0x1ba   : > { %v1029_v46 = vpop.permute.xlu1 %1028 }
 0x1bb   : > { %1101 = vst.msk [vmem:[#allocation4 + $0x60] sm:$0xf] %vm1076_vm6, %v1029_v46  ;;  %v1037_v56 = vpop.permute.xlu2 %1036  ;;  %v1360_v46 = vld [vmem:[#allocation2 + $0x152] sm:$0xff] }
 0x1bc   : > { %1438 = vrot.lane.b32.xlu0 %v5553_v22, %s5168_s28  ;;  %1105 = vst.msk [vmem:[#allocation4 + $0x70] sm:$0xf] %vm1076_vm6, %v1037_v56  ;;  %v1374_v22 = vpack.c.bf16 %v1342_v14, %v1342_v14  ;;  %v1355_v56 = vld [vmem:[#allocation2 + $0x112] sm:$0xff] }
 0x1bd   : > { %v1363_v14 = vld [vmem:[#allocation2 + $0x172] sm:$0xff] }
 0x1be   : > { %v1033_v10 = vpop.permute.xlu0 %1032 }
 0x1bf   : > { %1103 = vst.msk [vmem:[#allocation4 + $0x68] sm:$0xf] %vm1076_vm6, %v1033_v10 }
 0x1c0   : > { %1440 = vrot.lane.b32.xlu1 %v1371_v31, %s5168_s28 }
 0x1c1   : > { %1430 = vrot.lane.b32.xlu2 %v1366_v11, %s5168_s28  ;;  %v5992_v11 = vpack.c.bf16 %v1355_v56, %v1355_v56 }
 0x1c2   : > { %v1035_v33 = vpop.permute.xlu1 %1034 }
 0x1c3   : > { %1104 = vst.msk [vmem:[#allocation4 + $0x6c] sm:$0xf] %vm1076_vm6, %v1035_v33  ;;  %v1043_v48 = vpop.permute.xlu2 %1042 }
 0x1c4   : > { %1444 = vrot.lane.b32.xlu0 %v5571_v38, %s5168_s28  ;;  %1108 = vst.msk [vmem:[#allocation4 + $0x7c] sm:$0xf] %vm1076_vm6, %v1043_v48 }
 0x1c6   : > { %v1039_v17 = vpop.permute.xlu0 %1038 }
 0x1c7   : > { %1106 = vst.msk [vmem:[#allocation4 + $0x74] sm:$0xf] %vm1076_vm6, %v1039_v17  ;;  %v6002_v17 = vpack.c.bf16 %v1358_v36, %v1358_v36 }
 0x1c8   : > { %1446 = vrot.lane.b32.xlu1 %v1374_v22, %s5168_s28  ;;  %v1365_v22 = vld [vmem:[#allocation2 + $0x18a] sm:$0xff] }
 0x1c9   : > { %1436 = vrot.lane.b32.xlu2 %v5932_v51, %s5168_s28 }
 0x1ca   : > { %v1041_v37 = vpop.permute.xlu1 %1040 }
 0x1cb   : > { %1107 = vst.msk [vmem:[#allocation4 + $0x78] sm:$0xf] %vm1076_vm6, %v1041_v37  ;;  %v1210_v38 = vpop.permute.xlu2 %1209  ;;  %v1397_v37 = vpack.c.bf16 %v1365_v22, %v1365_v22 }
 0x1cc   : > { %1450 = vrot.lane.b32.xlu0 %v5592_v60, %s5168_s28  ;;  %1304 = vst.msk [vmem:[#allocation4 + $0x8] sm:$0xf] %vm1301_vm7, %v1210_v38  ;;  %v1380_v60 = vpack.c.bf16 %v1348_v0, %v1348_v0  ;;  %v1562_v0 = vld [vmem:[#allocation2 + $0x48] sm:$0xff] }
 0x1ce   : > { %v1206_v23 = vpop.permute.xlu0 %1205 }
 0x1cf   : > { %1302 = vst.msk [vmem:[#allocation4] sm:$0xf] %vm1301_vm7, %v1206_v23  ;;  %v1592_v23 = vpack.c.bf16 %v1560_v53, %v1560_v53 }
 0x1d0   : > { %1452 = vrot.lane.b32.xlu1 %v1377_v57, %s5168_s28  ;;  %v1361_v57 = vld [vmem:[#allocation2 + $0x15a] sm:$0xff] }
 0x1d1   : > { %1442 = vrot.lane.b32.xlu2 %v5942_v63, %s5168_s28 }
 0x1d2   : > { %v1208_v2 = vpop.permute.xlu1 %1207 }
 0x1d3   : > { %1303 = vst.msk [vmem:[#allocation4 + $0x4] sm:$0xf] %vm1301_vm7, %v1208_v2  ;;  %v1216_v25 = vpop.permute.xlu2 %1215  ;;  %v6011_v2 = vpack.c.bf16 %v1361_v57, %v1361_v57  ;;  %v1575_v57 = vld [vmem:[#allocation2 + $0xe0] sm:$0xff] }
 0x1d4   : > { %1456 = vrot.lane.b32.xlu0 %v5613_v16, %s5168_s28  ;;  %1307 = vst.msk [vmem:[#allocation4 + $0x14] sm:$0xf] %vm1301_vm7, %v1216_v25  ;;  %v1383_v16 = vpack.c.bf16 %v1351_v34, %v1351_v34  ;;  %v1594_v25 = vpack.c.bf16 %v1562_v0, %v1562_v0  ;;  %v1364_v34 = vld [vmem:[#allocation2 + $0x182] sm:$0xff] }
 0x1d6   : > { %v1212_v32 = vpop.permute.xlu0 %1211 }
 0x1d7   : > { %1305 = vst.msk [vmem:[#allocation4 + $0xc] sm:$0xf] %vm1301_vm7, %v1212_v32 }
 0x1d8   : > { %1458 = vrot.lane.b32.xlu1 %v1380_v60, %s5168_s28  ;;  %v1563_v60 = vld [vmem:[#allocation2 + $0x50] sm:$0xff] }
 0x1d9   : > { %1448 = vrot.lane.b32.xlu2 %v5952_v27, %s5168_s28  ;;  %v1595_v41 = vpack.c.bf16 %v1563_v60, %v1563_v60 }
 0x1da   : > { %v1214_v45 = vpop.permute.xlu1 %1213 }
 0x1db   : > { %1306 = vst.msk [vmem:[#allocation4 + $0x10] sm:$0xf] %vm1301_vm7, %v1214_v45  ;;  %v1222_v29 = vpop.permute.xlu2 %1221 }
 0x1dc   : > { %1462 = vrot.lane.b32.xlu0 %v5634_v44, %s5168_s28  ;;  %1310 = vst.msk [vmem:[#allocation4 + $0x20] sm:$0xf] %vm1301_vm7, %v1222_v29  ;;  %v1386_v44 = vpack.c.bf16 %v1354_v50, %v1354_v50  ;;  %v1565_v29 = vld [vmem:[#allocation2 + $0x68] sm:$0xff] }
 0x1dd   : > { %v1597_v50 = vpack.c.bf16 %v1565_v29, %v1565_v29  ;;  %v1573_v29 = vld [vmem:[#allocation2 + $0xc8] sm:$0xff] }
 0x1de   : > { %v1218_v58 = vpop.permute.xlu0 %1217 }
 0x1df   : > { %1308 = vst.msk [vmem:[#allocation4 + $0x18] sm:$0xf] %vm1301_vm7, %v1218_v58 }
 0x1e0   : > { %1464 = vrot.lane.b32.xlu1 %v1383_v16, %s5168_s28  ;;  %v6020_v16 = vpack.c.bf16 %v1364_v34, %v1364_v34 }
 0x1e1   : > { %1454 = vrot.lane.b32.xlu2 %v5962_v8, %s5168_s28 }
 0x1e2   : > { %v1220_v5 = vpop.permute.xlu1 %1219 }
 0x1e3   : > { %1309 = vst.msk [vmem:[#allocation4 + $0x1c] sm:$0xf] %vm1301_vm7, %v1220_v5  ;;  %v1228_v39 = vpop.permute.xlu2 %1227  ;;  %v1566_v5 = vld [vmem:[#allocation2 + $0x78] sm:$0xff] }
 0x1e4   : > { %1468 = vrot.lane.b32.xlu0 %v5655_v9, %s5168_s28  ;;  %1313 = vst.msk [vmem:[#allocation4 + $0x2c] sm:$0xf] %vm1301_vm7, %v1228_v39  ;;  %v1389_v9 = vpack.c.bf16 %v1357_v59, %v1357_v59  ;;  %v1561_v39 = vld [vmem:[#allocation2 + $0x38] sm:$0xff]  ;;  %v1568_v59 = vld [vmem:[#allocation2 + $0x90] sm:$0xff] }
 0x1e6   : > { %v1224_v4 = vpop.permute.xlu0 %1223 }
 0x1e7   : > { %1311 = vst.msk [vmem:[#allocation4 + $0x24] sm:$0xf] %vm1301_vm7, %v1224_v4  ;;  %v1598_v4 = vpack.c.bf16 %v1566_v5, %v1566_v5  ;;  %v1580_v5 = vld [vmem:[#allocation2 + $0x120] sm:$0xff] }
 0x1e8   : > { %1470 = vrot.lane.b32.xlu1 %v1386_v44, %s5168_s28 }
 0x1e9   : > { %1460 = vrot.lane.b32.xlu2 %v5972_v30, %s5168_s28 }
 0x1ea   : > { %v1226_v61 = vpop.permute.xlu1 %1225 }
 0x1eb   : > { %1312 = vst.msk [vmem:[#allocation4 + $0x28] sm:$0xf] %vm1301_vm7, %v1226_v61  ;;  %v1234_v19 = vpop.permute.xlu2 %1233  ;;  %v1593_v61 = vpack.c.bf16 %v1561_v39, %v1561_v39 }
 0x1ec   : > { %1474 = vrot.lane.b32.xlu0 %v5676_v43, %s5168_s28  ;;  %1316 = vst.msk [vmem:[#allocation4 + $0x38] sm:$0xf] %vm1301_vm7, %v1234_v19  ;;  %v1392_v43 = vpack.c.bf16 %v1360_v46, %v1360_v46  ;;  %v1600_v19 = vpack.c.bf16 %v1568_v59, %v1568_v59  ;;  %v1564_v46 = vld [vmem:[#allocation2 + $0x60] sm:$0xff] }
 0x1ee   : > { %v1230_v3 = vpop.permute.xlu0 %1229 }
 0x1ef   : > { %1314 = vst.msk [vmem:[#allocation4 + $0x30] sm:$0xf] %vm1301_vm7, %v1230_v3 }
 0x1f0   : > { %1476 = vrot.lane.b32.xlu1 %v1389_v9, %s5168_s28  ;;  %v1569_v9 = vld [vmem:[#allocation2 + $0x98] sm:$0xff] }
 0x1f1   : > { %1466 = vrot.lane.b32.xlu2 %v5982_v35, %s5168_s28  ;;  %v1601_v56 = vpack.c.bf16 %v1569_v9, %v1569_v9  ;;  %v1583_v9 = vld [vmem:[#allocation2 + $0x140] sm:$0xff] }
 0x1f2   : > { %v1232_v47 = vpop.permute.xlu1 %1231 }
 0x1f3   : > { %1315 = vst.msk [vmem:[#allocation4 + $0x34] sm:$0xf] %vm1301_vm7, %v1232_v47  ;;  %v1240_v31 = vpop.permute.xlu2 %1239 }
 0x1f4   : > { %1480 = vrot.lane.b32.xlu0 %v5695_v1, %s5168_s28  ;;  %1319 = vst.msk [vmem:[#allocation4 + $0x44] sm:$0xf] %vm1301_vm7, %v1240_v31  ;;  %v1395_v1 = vpack.c.bf16 %v1363_v14, %v1363_v14  ;;  %v1571_v31 = vld [vmem:[#allocation2 + $0xb0] sm:$0xff] }
 0x1f5   : > { %v1603_v14 = vpack.c.bf16 %v1571_v31, %v1571_v31 }
 0x1f6   : > { %v1236_v10 = vpop.permute.xlu0 %1235 }
 0x1f7   : > { %1317 = vst.msk [vmem:[#allocation4 + $0x3c] sm:$0xf] %vm1301_vm7, %v1236_v10 }
 0x1f8   : > { %1482 = vrot.lane.b32.xlu1 %v1392_v43, %s5168_s28  ;;  %v1596_v43 = vpack.c.bf16 %v1564_v46, %v1564_v46 }
 0x1f9   : > { %1472 = vrot.lane.b32.xlu2 %v5992_v11, %s5168_s28 }
 0x1fa   : > { %v1238_v33 = vpop.permute.xlu1 %1237 }
 0x1fb   : > { %1318 = vst.msk [vmem:[#allocation4 + $0x40] sm:$0xf] %vm1301_vm7, %v1238_v33  ;;  %v1246_v48 = vpop.permute.xlu2 %1245  ;;  %v1572_v33 = vld [vmem:[#allocation2 + $0xc0] sm:$0xff] }
 0x1fc   : > { %1486 = vrot.lane.b32.xlu0 %v5710_v26, %s5168_s28  ;;  %1322 = vst.msk [vmem:[#allocation4 + $0x50] sm:$0xf] %vm1301_vm7, %v1246_v48  ;;  %v1567_v48 = vld [vmem:[#allocation2 + $0x80] sm:$0xff]  ;;  %v1604_v22 = vpack.c.bf16 %v1572_v33, %v1572_v33  ;;  %v1586_v33 = vld [vmem:[#allocation2 + $0x168] sm:$0xff] }
 0x1fe   : > { %v1242_v52 = vpop.permute.xlu0 %1241 }
 0x1ff   : > { %1320 = vst.msk [vmem:[#allocation4 + $0x48] sm:$0xf] %vm1301_vm7, %v1242_v52  ;;  %v1574_v52 = vld [vmem:[#allocation2 + $0xd8] sm:$0xff] }
 0x200   : > { %1488 = vrot.lane.b32.xlu1 %v1395_v1, %s5168_s28 }
 0x201   : > { %1478 = vrot.lane.b32.xlu2 %v6002_v17, %s5168_s28 }
 0x202   : > { %v1244_v38 = vpop.permute.xlu1 %1243 }
 0x203   : > { %1321 = vst.msk [vmem:[#allocation4 + $0x4c] sm:$0xf] %vm1301_vm7, %v1244_v38  ;;  %v1252_v26 = vpop.permute.xlu2 %1251  ;;  %v1606_v38 = vpack.c.bf16 %v1574_v52, %v1574_v52 }
 0x204   : > { %1492 = vrot.lane.b32.xlu0 %v1397_v37, %s5168_s28  ;;  %1325 = vst.msk [vmem:[#allocation4 + $0x5c] sm:$0xf] %vm1301_vm7, %v1252_v26  ;;  %v1599_v37 = vpack.c.bf16 %v1567_v48, %v1567_v48 }
 0x206   : > { %v1248_v13 = vpop.permute.xlu0 %1247 }
 0x207   : > { %1323 = vst.msk [vmem:[#allocation4 + $0x54] sm:$0xf] %vm1301_vm7, %v1248_v13  ;;  %v1607_v13 = vpack.c.bf16 %v1575_v57, %v1575_v57 }
 0x208   : > { %1656 = vrot.lane.b32.xlu1 %v1592_v23, %s5169_s29  ;;  %v1570_v23 = vld [vmem:[#allocation2 + $0xa8] sm:$0xff] }
 0x209   : > { %1484 = vrot.lane.b32.xlu2 %v6011_v2, %s5168_s28  ;;  %v1602_v60 = vpack.c.bf16 %v1570_v23, %v1570_v23  ;;  %v1590_v23 = vld [vmem:[#allocation2 + $0x198] sm:$0xff] }
 0x20a   : > { %v1250_v32 = vpop.permute.xlu1 %1249 }
 0x20b   : > { %1324 = vst.msk [vmem:[#allocation4 + $0x58] sm:$0xf] %vm1301_vm7, %v1250_v32  ;;  %v1258_v45 = vpop.permute.xlu2 %1257 }
 0x20c   : > { %1660 = vrot.lane.b32.xlu0 %v1594_v25, %s5169_s29  ;;  %1328 = vst.msk [vmem:[#allocation4 + $0x68] sm:$0xf] %vm1301_vm7, %v1258_v45  ;;  %v1577_v25 = vld [vmem:[#allocation2 + $0xf8] sm:$0xff]  ;;  %v1578_v45 = vld [vmem:[#allocation2 + $0x108] sm:$0xff] }
 0x20d   : > { %v1609_v34 = vpack.c.bf16 %v1577_v25, %v1577_v25 }
 0x20e   : > { %v1254_v58 = vpop.permute.xlu0 %1253 }
 0x20f   : > { %1326 = vst.msk [vmem:[#allocation4 + $0x60] sm:$0xf] %vm1301_vm7, %v1254_v58 }
 0x210   : > { %1662 = vrot.lane.b32.xlu1 %v1595_v41, %s5169_s29 }
 0x211   : > { %1490 = vrot.lane.b32.xlu2 %v6020_v16, %s5168_s28 }
 0x212   : > { %v1256_v54 = vpop.permute.xlu1 %1255 }
 0x213   : > { %1327 = vst.msk [vmem:[#allocation4 + $0x64] sm:$0xf] %vm1301_vm7, %v1256_v54  ;;  %v1264_v44 = vpop.permute.xlu2 %1263  ;;  %v1605_v54 = vpack.c.bf16 %v1573_v29, %v1573_v29  ;;  %v1588_v29 = vld [vmem:[#allocation2 + $0x180] sm:$0xff] }
 0x214   : > { %1666 = vrot.lane.b32.xlu0 %v1597_v50, %s5169_s29  ;;  %1331 = vst.msk [vmem:[#allocation4 + $0x74] sm:$0xf] %vm1301_vm7, %v1264_v44  ;;  %v1610_v50 = vpack.c.bf16 %v1578_v45, %v1578_v45  ;;  %v1612_v44 = vpack.c.bf16 %v1580_v5, %v1580_v5  ;;  %v1786_v45 = vld [vmem:[#allocation2 + $0x39] sm:$0xff] }
 0x216   : > { %v1260_v62 = vpop.permute.xlu0 %1259 }
 0x217   : > { %1329 = vst.msk [vmem:[#allocation4 + $0x6c] sm:$0xf] %vm1301_vm7, %v1260_v62 }
 0x218   : > { %1668 = vrot.lane.b32.xlu1 %v1598_v4, %s5169_s29  ;;  %v1581_v4 = vld [vmem:[#allocation2 + $0x128] sm:$0xff] }
 0x219   : > { %1658 = vrot.lane.b32.xlu2 %v1593_v61, %s5169_s29  ;;  %v1576_v61 = vld [vmem:[#allocation2 + $0xf0] sm:$0xff] }
 0x21a   : > { %v1262_v3 = vpop.permute.xlu1 %1261 }
 0x21b   : > { %1330 = vst.msk [vmem:[#allocation4 + $0x70] sm:$0xf] %vm1301_vm7, %v1262_v3  ;;  %v1431_v47 = vpop.permute.xlu2 %1430  ;;  %v1608_v3 = vpack.c.bf16 %v1576_v61, %v1576_v61 }
 0x21c   : > { %1672 = vrot.lane.b32.xlu0 %v1600_v19, %s5169_s29  ;;  %1527 = vst.msk [vmem:[#allocation4] sm:$0xf] %vm1526_vm8, %v1431_v47  ;;  %v1613_v19 = vpack.c.bf16 %v1581_v4, %v1581_v4  ;;  %v1615_v47 = vpack.c.bf16 %v1583_v9, %v1583_v9  ;;  %v1787_v9 = vld [vmem:[#allocation2 + $0x49] sm:$0xff] }
 0x21e   : > { %v1266_v10 = vpop.permute.xlu0 %1265 }
 0x21f   : > { %1332 = vst.msk [vmem:[#allocation4 + $0x78] sm:$0xf] %vm1301_vm7, %v1266_v10 }
 0x220   : > { %1674 = vrot.lane.b32.xlu1 %v1601_v56, %s5169_s29  ;;  %v1584_v56 = vld [vmem:[#allocation2 + $0x150] sm:$0xff] }
 0x221   : > { %1664 = vrot.lane.b32.xlu2 %v1596_v43, %s5169_s29  ;;  %v1579_v43 = vld [vmem:[#allocation2 + $0x110] sm:$0xff] }
 0x222   : > { %v1268_v36 = vpop.permute.xlu1 %1267 }
 0x223   : > { %1333 = vst.msk [vmem:[#allocation4 + $0x7c] sm:$0xf] %vm1301_vm7, %v1268_v36  ;;  %v1437_v1 = vpop.permute.xlu2 %1436  ;;  %v1611_v36 = vpack.c.bf16 %v1579_v43, %v1579_v43  ;;  %v1790_v43 = vld [vmem:[#allocation2 + $0x69] sm:$0xff] }
 0x224   : > { %1678 = vrot.lane.b32.xlu0 %v1603_v14, %s5169_s29  ;;  %1530 = vst.msk [vmem:[#allocation4 + $0xc] sm:$0xf] %vm1526_vm8, %v1437_v1  ;;  %v1616_v14 = vpack.c.bf16 %v1584_v56, %v1584_v56  ;;  %v1618_v1 = vpack.c.bf16 %v1586_v33, %v1586_v33  ;;  %v1795_v56 = vld [vmem:[#allocation2 + $0xa9] sm:$0xff] }
 0x226   : > { %v1433_v53 = vpop.permute.xlu0 %1432 }
 0x227   : > { %1528 = vst.msk [vmem:[#allocation4 + $0x4] sm:$0xf] %vm1526_vm8, %v1433_v53 }
 0x228   : > { %1680 = vrot.lane.b32.xlu1 %v1604_v22, %s5169_s29  ;;  %v1587_v22 = vld [vmem:[#allocation2 + $0x170] sm:$0xff] }
 0x229   : > { %1670 = vrot.lane.b32.xlu2 %v1599_v37, %s5169_s29  ;;  %v1582_v37 = vld [vmem:[#allocation2 + $0x138] sm:$0xff] }
 0x22a   : > { %v1435_v26 = vpop.permute.xlu1 %1434  ;;  %v1614_v57 = vpack.c.bf16 %v1582_v37, %v1582_v37 }
 0x22b   : > { %1529 = vst.msk [vmem:[#allocation4 + $0x8] sm:$0xf] %vm1526_vm8, %v1435_v26  ;;  %v1443_v0 = vpop.permute.xlu2 %1442 }
 0x22c   : > { %1684 = vrot.lane.b32.xlu0 %v1606_v38, %s5169_s29  ;;  %1533 = vst.msk [vmem:[#allocation4 + $0x18] sm:$0xf] %vm1526_vm8, %v1443_v0  ;;  %v1619_v38 = vpack.c.bf16 %v1587_v22, %v1587_v22 }
 0x22e   : > { %v1439_v32 = vpop.permute.xlu0 %1438 }
 0x22f   : > { %1531 = vst.msk [vmem:[#allocation4 + $0x10] sm:$0xf] %vm1526_vm8, %v1439_v32 }
 0x230   : > { %1686 = vrot.lane.b32.xlu1 %v1607_v13, %s5169_s29  ;;  %v1585_v13 = vld [vmem:[#allocation2 + $0x158] sm:$0xff] }
 0x231   : > { %1676 = vrot.lane.b32.xlu2 %v1602_v60, %s5169_s29  ;;  %v1622_v60 = vpack.c.bf16 %v1590_v23, %v1590_v23  ;;  %v1617_v32 = vpack.c.bf16 %v1585_v13, %v1585_v13  ;;  %v1804_v13 = vld [vmem:[#allocation2 + $0x111] sm:$0xff] }
 0x232   : > { %v1441_v41 = vpop.permute.xlu1 %1440 }
 0x233   : > { %1532 = vst.msk [vmem:[#allocation4 + $0x14] sm:$0xf] %vm1526_vm8, %v1441_v41  ;;  %v1449_v58 = vpop.permute.xlu2 %1448 }
 0x234   : > { %1690 = vrot.lane.b32.xlu0 %v1609_v34, %s5169_s29  ;;  %1536 = vst.msk [vmem:[#allocation4 + $0x24] sm:$0xf] %vm1526_vm8, %v1449_v58 }
 0x236   : > { %v1445_v39 = vpop.permute.xlu0 %1444 }
 0x237   : > { %1534 = vst.msk [vmem:[#allocation4 + $0x1c] sm:$0xf] %vm1526_vm8, %v1445_v39 }
 0x238   : > { %1692 = vrot.lane.b32.xlu1 %v1610_v50, %s5169_s29  ;;  %v1620_v50 = vpack.c.bf16 %v1588_v29, %v1588_v29 }
 0x239   : > { %1682 = vrot.lane.b32.xlu2 %v1605_v54, %s5169_s29  ;;  %v1789_v54 = vld [vmem:[#allocation2 + $0x61] sm:$0xff] }
 0x23a   : > { %v1447_v59 = vpop.permute.xlu1 %1446 }
 0x23b   : > { %1535 = vst.msk [vmem:[#allocation4 + $0x20] sm:$0xf] %vm1526_vm8, %v1447_v59  ;;  %v1455_v62 = vpop.permute.xlu2 %1454 }
 0x23c   : > { %1696 = vrot.lane.b32.xlu0 %v1612_v44, %s5169_s29  ;;  %1539 = vst.msk [vmem:[#allocation4 + $0x30] sm:$0xf] %vm1526_vm8, %v1455_v62  ;;  %v1591_v44 = vld [vmem:[#allocation2 + $0x1a0] sm:$0xff] }
 0x23d   : > { %v1623_v59 = vpack.c.bf16 %v1591_v44, %v1591_v44  ;;  %v1792_v62 = vld [vmem:[#allocation2 + $0x81] sm:$0xff] }
 0x23e   : > { %v1451_v46 = vpop.permute.xlu0 %1450 }
 0x23f   : > { %1537 = vst.msk [vmem:[#allocation4 + $0x28] sm:$0xf] %vm1526_vm8, %v1451_v46  ;;  %v1819_v46 = vpack.c.bf16 %v1787_v9, %v1787_v9  ;;  %v1816_v9 = vld [vmem:[#allocation2 + $0x1a1] sm:$0xff] }
 0x240   : > { %1698 = vrot.lane.b32.xlu1 %v1613_v19, %s5169_s29 }
 0x241   : > { %1688 = vrot.lane.b32.xlu2 %v1608_v3, %s5169_s29 }
 0x242   : > { %v1453_v31 = vpop.permute.xlu1 %1452 }
 0x243   : > { %1538 = vst.msk [vmem:[#allocation4 + $0x2c] sm:$0xf] %vm1526_vm8, %v1453_v31  ;;  %v1461_v10 = vpop.permute.xlu2 %1460 }
 0x244   : > { %1702 = vrot.lane.b32.xlu0 %v1615_v47, %s5169_s29  ;;  %1542 = vst.msk [vmem:[#allocation4 + $0x3c] sm:$0xf] %vm1526_vm8, %v1461_v10 }
 0x246   : > { %v1457_v48 = vpop.permute.xlu0 %1456 }
 0x247   : > { %1540 = vst.msk [vmem:[#allocation4 + $0x34] sm:$0xf] %vm1526_vm8, %v1457_v48 }
 0x248   : > { %1704 = vrot.lane.b32.xlu1 %v1616_v14, %s5169_s29  ;;  %v1822_v14 = vpack.c.bf16 %v1790_v43, %v1790_v43  ;;  %v1814_v43 = vld [vmem:[#allocation2 + $0x189] sm:$0xff] }
 0x249   : > { %1694 = vrot.lane.b32.xlu2 %v1611_v36, %s5169_s29  ;;  %v1798_v36 = vld [vmem:[#allocation2 + $0xc9] sm:$0xff] }
 0x24a   : > { %v1459_v52 = vpop.permute.xlu1 %1458 }
 0x24b   : > { %1541 = vst.msk [vmem:[#allocation4 + $0x38] sm:$0xf] %vm1526_vm8, %v1459_v52  ;;  %v1467_v53 = vpop.permute.xlu2 %1466 }
 0x24c   : > { %1708 = vrot.lane.b32.xlu0 %v1618_v1, %s5169_s29  ;;  %1545 = vst.msk [vmem:[#allocation4 + $0x48] sm:$0xf] %vm1526_vm8, %v1467_v53  ;;  %v1793_v1 = vld [vmem:[#allocation2 + $0x91] sm:$0xff] }
 0x24d   : > { %v1825_v52 = vpack.c.bf16 %v1793_v1, %v1793_v1  ;;  %v1801_v53 = vld [vmem:[#allocation2 + $0xf1] sm:$0xff] }
 0x24e   : > { %v1463_v26 = vpop.permute.xlu0 %1462  ;;  %v2010_v1 = vld [vmem:[#allocation2 + $0x32] sm:$0xff] }
 0x24f   : > { %1543 = vst.msk [vmem:[#allocation4 + $0x40] sm:$0xf] %vm1526_vm8, %v1463_v26 }
 0x250   : > { %1710 = vrot.lane.b32.xlu1 %v1619_v38, %s5169_s29 }
 0x251   : > { %1700 = vrot.lane.b32.xlu2 %v1614_v57, %s5169_s29  ;;  %v1796_v57 = vld [vmem:[#allocation2 + $0xb1] sm:$0xff] }
 0x252   : > { %v1465_v0 = vpop.permute.xlu1 %1464  ;;  %v1828_v23 = vpack.c.bf16 %v1796_v57, %v1796_v57 }
 0x253   : > { %1544 = vst.msk [vmem:[#allocation4 + $0x44] sm:$0xf] %vm1526_vm8, %v1465_v0  ;;  %v1473_v25 = vpop.permute.xlu2 %1472 }
 0x254   : > { %1714 = vrot.lane.b32.xlu0 %v5812_v15, %s5169_s29  ;;  %1548 = vst.msk [vmem:[#allocation4 + $0x54] sm:$0xf] %vm1526_vm8, %v1473_v25  ;;  %v1818_v15 = vpack.c.bf16 %v1786_v45, %v1786_v45 }
 0x256   : > { %v1469_v34 = vpop.permute.xlu0 %1468 }
 0x257   : > { %1546 = vst.msk [vmem:[#allocation4 + $0x4c] sm:$0xf] %vm1526_vm8, %v1469_v34 }
 0x258   : > { %1716 = vrot.lane.b32.xlu1 %v1622_v60, %s5169_s29  ;;  %v1799_v60 = vld [vmem:[#allocation2 + $0xd9] sm:$0xff] }
 0x259   : > { %1706 = vrot.lane.b32.xlu2 %v1617_v32, %s5169_s29  ;;  %v1831_v34 = vpack.c.bf16 %v1799_v60, %v1799_v60 }
 0x25a   : > { %v1471_v41 = vpop.permute.xlu1 %1470 }
 0x25b   : > { %1547 = vst.msk [vmem:[#allocation4 + $0x50] sm:$0xf] %vm1526_vm8, %v1471_v41  ;;  %v1479_v58 = vpop.permute.xlu2 %1478  ;;  %v1807_v41 = vld [vmem:[#allocation2 + $0x139] sm:$0xff] }
 0x25c   : > { %1881 = vrot.lane.b32.xlu0 %v5822_v42, %s5170_s30  ;;  %1551 = vst.msk [vmem:[#allocation4 + $0x60] sm:$0xf] %vm1526_vm8, %v1479_v58  ;;  %v1821_v42 = vpack.c.bf16 %v1789_v54, %v1789_v54  ;;  %v1802_v58 = vld [vmem:[#allocation2 + $0xf9] sm:$0xff] }
 0x25e   : > { %v1475_v5 = vpop.permute.xlu0 %1474 }
 0x25f   : > { %1549 = vst.msk [vmem:[#allocation4 + $0x58] sm:$0xf] %vm1526_vm8, %v1475_v5 }
 0x260   : > { %1883 = vrot.lane.b32.xlu1 %v1818_v15, %s5170_s30 }
 0x261   : > { %1712 = vrot.lane.b32.xlu2 %v1620_v50, %s5169_s29  ;;  %v1834_v50 = vpack.c.bf16 %v1802_v58, %v1802_v58 }
 0x262   : > { %v1477_v39 = vpop.permute.xlu1 %1476 }
 0x263   : > { %1550 = vst.msk [vmem:[#allocation4 + $0x5c] sm:$0xf] %vm1526_vm8, %v1477_v39  ;;  %v1485_v4 = vpop.permute.xlu2 %1484  ;;  %v1805_v39 = vld [vmem:[#allocation2 + $0x121] sm:$0xff] }
 0x264   : > { %1887 = vrot.lane.b32.xlu0 %v5832_v24, %s5170_s30  ;;  %1554 = vst.msk [vmem:[#allocation4 + $0x6c] sm:$0xf] %vm1526_vm8, %v1485_v4  ;;  %v1824_v24 = vpack.c.bf16 %v1792_v62, %v1792_v62 }
 0x266   : > { %v1481_v61 = vpop.permute.xlu0 %1480 }
 0x267   : > { %1552 = vst.msk [vmem:[#allocation4 + $0x64] sm:$0xf] %vm1526_vm8, %v1481_v61 }
 0x268   : > { %1889 = vrot.lane.b32.xlu1 %v1821_v42, %s5170_s30 }
 0x269   : > { %1718 = vrot.lane.b32.xlu2 %v1623_v59, %s5169_s29  ;;  %v1808_v59 = vld [vmem:[#allocation2 + $0x141] sm:$0xff] }
 0x26a   : > { %v1483_v19 = vpop.permute.xlu1 %1482  ;;  %v1840_v62 = vpack.c.bf16 %v1808_v59, %v1808_v59 }
 0x26b   : > { %1553 = vst.msk [vmem:[#allocation4 + $0x68] sm:$0xf] %vm1526_vm8, %v1483_v19  ;;  %v1491_v3 = vpop.permute.xlu2 %1490 }
 0x26c   : > { %1893 = vrot.lane.b32.xlu0 %v5842_v40, %s5170_s30  ;;  %1557 = vst.msk [vmem:[#allocation4 + $0x78] sm:$0xf] %vm1526_vm8, %v1491_v3  ;;  %v1827_v40 = vpack.c.bf16 %v1795_v56, %v1795_v56 }
 0x26e   : > { %v1487_v47 = vpop.permute.xlu0 %1486 }
 0x26f   : > { %1555 = vst.msk [vmem:[#allocation4 + $0x70] sm:$0xf] %vm1526_vm8, %v1487_v47 }
 0x270   : > { %1895 = vrot.lane.b32.xlu1 %v1824_v24, %s5170_s30  ;;  %v1811_v24 = vld [vmem:[#allocation2 + $0x169] sm:$0xff] }
 0x271   : > { %1885 = vrot.lane.b32.xlu2 %v1819_v46, %s5170_s30  ;;  %v1843_v47 = vpack.c.bf16 %v1811_v24, %v1811_v24 }
 0x272   : > { %v1489_v31 = vpop.permute.xlu1 %1488 }
 0x273   : > { %1556 = vst.msk [vmem:[#allocation4 + $0x74] sm:$0xf] %vm1526_vm8, %v1489_v31  ;;  %v1659_v10 = vpop.permute.xlu2 %1658 }
 0x274   : > { %1899 = vrot.lane.b32.xlu0 %v5852_v21, %s5170_s30  ;;  %1754 = vst.msk [vmem:[#allocation4 + $0x4] sm:$0xf] %vm1752_vm9, %v1659_v10  ;;  %v1830_v21 = vpack.c.bf16 %v1798_v36, %v1798_v36  ;;  %v2015_v36 = vld [vmem:[#allocation2 + $0x6a] sm:$0xff] }
 0x276   : > { %v1493_v33 = vpop.permute.xlu0 %1492 }
 0x277   : > { %1558 = vst.msk [vmem:[#allocation4 + $0x7c] sm:$0xf] %vm1526_vm8, %v1493_v33 }
 0x278   : > { %1901 = vrot.lane.b32.xlu1 %v1827_v40, %s5170_s30 }
 0x279   : > { %1891 = vrot.lane.b32.xlu2 %v1822_v14, %s5170_s30  ;;  %v1846_v14 = vpack.c.bf16 %v1814_v43, %v1814_v43 }
 0x27a   : > { %v1657_v48 = vpop.permute.xlu1 %1656 }
 0x27b   : > { %1753 = vst.msk [vmem:[#allocation4] sm:$0xf] %vm1752_vm9, %v1657_v48  ;;  %v1665_v22 = vpop.permute.xlu2 %1664 }
 0x27c   : > { %1905 = vrot.lane.b32.xlu0 %v5862_v12, %s5170_s30  ;;  %1757 = vst.msk [vmem:[#allocation4 + $0x10] sm:$0xf] %vm1752_vm9, %v1665_v22  ;;  %v1833_v12 = vpack.c.bf16 %v1801_v53, %v1801_v53 }
 0x27e   : > { %v1661_v37 = vpop.permute.xlu0 %1660 }
 0x27f   : > { %1755 = vst.msk [vmem:[#allocation4 + $0x8] sm:$0xf] %vm1752_vm9, %v1661_v37  ;;  %v2018_v37 = vld [vmem:[#allocation2 + $0x92] sm:$0xff] }
 0x280   : > { %1907 = vrot.lane.b32.xlu1 %v1830_v21, %s5170_s30  ;;  %v2042_v21 = vpack.c.bf16 %v2010_v1, %v2010_v1 }
 0x281   : > { %1897 = vrot.lane.b32.xlu2 %v1825_v52, %s5170_s30 }
 0x282   : > { %v1663_v38 = vpop.permute.xlu1 %1662 }
 0x283   : > { %1756 = vst.msk [vmem:[#allocation4 + $0xc] sm:$0xf] %vm1752_vm9, %v1663_v38  ;;  %v1671_v26 = vpop.permute.xlu2 %1670  ;;  %v2013_v38 = vld [vmem:[#allocation2 + $0x52] sm:$0xff] }
 0x284   : > { %1911 = vrot.lane.b32.xlu0 %v5872_v49, %s5170_s30  ;;  %1760 = vst.msk [vmem:[#allocation4 + $0x1c] sm:$0xf] %vm1752_vm9, %v1671_v26  ;;  %v1836_v49 = vpack.c.bf16 %v1804_v13, %v1804_v13  ;;  %v2045_v26 = vpack.c.bf16 %v2013_v38, %v2013_v38  ;;  %v2016_v13 = vld [vmem:[#allocation2 + $0x7a] sm:$0xff]  ;;  %v2034_v38 = vld [vmem:[#allocation2 + $0x152] sm:$0xff] }
 0x285   : > { %v2048_v60 = vpack.c.bf16 %v2016_v13, %v2016_v13 }
 0x286   : > { %v1667_v0 = vpop.permute.xlu0 %1666 }
 0x287   : > { %1758 = vst.msk [vmem:[#allocation4 + $0x14] sm:$0xf] %vm1752_vm9, %v1667_v0 }
 0x288   : > { %1913 = vrot.lane.b32.xlu1 %v1833_v12, %s5170_s30 }
 0x289   : > { %1903 = vrot.lane.b32.xlu2 %v1828_v23, %s5170_s30  ;;  %v2021_v23 = vld [vmem:[#allocation2 + $0xb2] sm:$0xff] }
 0x28a   : > { %v1669_v25 = vpop.permute.xlu1 %1668 }
 0x28b   : > { %1759 = vst.msk [vmem:[#allocation4 + $0x18] sm:$0xf] %vm1752_vm9, %v1669_v25  ;;  %v1677_v32 = vpop.permute.xlu2 %1676 }
 0x28c   : > { %1917 = vrot.lane.b32.xlu0 %v5882_v6, %s5170_s30  ;;  %1763 = vst.msk [vmem:[#allocation4 + $0x28] sm:$0xf] %vm1752_vm9, %v1677_v32  ;;  %v1839_v6 = vpack.c.bf16 %v1807_v41, %v1807_v41 }
 0x28e   : > { %v1673_v45 = vpop.permute.xlu0 %1672 }
 0x28f   : > { %1761 = vst.msk [vmem:[#allocation4 + $0x20] sm:$0xf] %vm1752_vm9, %v1673_v45  ;;  %v2019_v45 = vld [vmem:[#allocation2 + $0x9a] sm:$0xff] }
 0x290   : > { %1919 = vrot.lane.b32.xlu1 %v1836_v49, %s5170_s30  ;;  %v2024_v49 = vld [vmem:[#allocation2 + $0xda] sm:$0xff] }
 0x291   : > { %1909 = vrot.lane.b32.xlu2 %v1831_v34, %s5170_s30 }
 0x292   : > { %v1675_v29 = vpop.permute.xlu1 %1674 }
 0x293   : > { %1762 = vst.msk [vmem:[#allocation4 + $0x24] sm:$0xf] %vm1752_vm9, %v1675_v29  ;;  %v1683_v15 = vpop.permute.xlu2 %1682  ;;  %v2051_v29 = vpack.c.bf16 %v2019_v45, %v2019_v45 }
 0x294   : > { %1923 = vrot.lane.b32.xlu0 %v5894_v28, %s5170_s30  ;;  %1766 = vst.msk [vmem:[#allocation4 + $0x34] sm:$0xf] %vm1752_vm9, %v1683_v15  ;;  %v1837_v28 = vpack.c.bf16 %v1805_v39, %v1805_v39  ;;  %v2027_v15 = vld [vmem:[#allocation2 + $0xfa] sm:$0xff] }
 0x296   : > { %v1679_v5 = vpop.permute.xlu0 %1678 }
 0x297   : > { %1764 = vst.msk [vmem:[#allocation4 + $0x2c] sm:$0xf] %vm1752_vm9, %v1679_v5 }
 0x298   : > { %1925 = vrot.lane.b32.xlu1 %v1839_v6, %s5170_s30 }
 0x299   : > { %1915 = vrot.lane.b32.xlu2 %v1834_v50, %s5170_s30  ;;  %v2022_v50 = vld [vmem:[#allocation2 + $0xc2] sm:$0xff] }
 0x29a   : > { %v1681_v54 = vpop.permute.xlu1 %1680 }
 0x29b   : > { %1765 = vst.msk [vmem:[#allocation4 + $0x30] sm:$0xf] %vm1752_vm9, %v1681_v54  ;;  %v1689_v44 = vpop.permute.xlu2 %1688  ;;  %v2054_v54 = vpack.c.bf16 %v2022_v50, %v2022_v50 }
 0x29c   : > { %1929 = vrot.lane.b32.xlu0 %v5906_v20, %s5170_s30  ;;  %1769 = vst.msk [vmem:[#allocation4 + $0x40] sm:$0xf] %vm1752_vm9, %v1689_v44  ;;  %v1815_v20 = vld [vmem:[#allocation2 + $0x199] sm:$0xff]  ;;  %v2030_v44 = vld [vmem:[#allocation2 + $0x122] sm:$0xff] }
 0x29e   : > { %v1685_v4 = vpop.permute.xlu0 %1684 }
 0x29f   : > { %1767 = vst.msk [vmem:[#allocation4 + $0x38] sm:$0xf] %vm1752_vm9, %v1685_v4  ;;  %v2025_v4 = vld [vmem:[#allocation2 + $0xe2] sm:$0xff] }
 0x2a0   : > { %1931 = vrot.lane.b32.xlu1 %v5886_v7, %s5170_s30  ;;  %v1847_v7 = vpack.c.bf16 %v1815_v20, %v1815_v20  ;;  %v2057_v59 = vpack.c.bf16 %v2025_v4, %v2025_v4 }
 0x2a1   : > { %1921 = vrot.lane.b32.xlu2 %v1837_v28, %s5170_s30 }
 0x2a2   : > { %v1687_v42 = vpop.permute.xlu1 %1686 }
 0x2a3   : > { %1768 = vst.msk [vmem:[#allocation4 + $0x3c] sm:$0xf] %vm1752_vm9, %v1687_v42  ;;  %v1695_v61 = vpop.permute.xlu2 %1694 }
 0x2a4   : > { %1935 = vrot.lane.b32.xlu0 %v5915_v18, %s5170_s30  ;;  %1772 = vst.msk [vmem:[#allocation4 + $0x4c] sm:$0xf] %vm1752_vm9, %v1695_v61  ;;  %v1848_v18 = vpack.c.bf16 %v1816_v9, %v1816_v9  ;;  %v2033_v9 = vld [vmem:[#allocation2 + $0x142] sm:$0xff] }
 0x2a6   : > { %v1691_v19 = vpop.permute.xlu0 %1690 }
 0x2a7   : > { %1770 = vst.msk [vmem:[#allocation4 + $0x44] sm:$0xf] %vm1752_vm9, %v1691_v19 }
 0x2a8   : > { %1937 = vrot.lane.b32.xlu1 %v5898_v55, %s5170_s30  ;;  %v2012_v55 = vld [vmem:[#allocation2 + $0x4a] sm:$0xff] }
 0x2a9   : > { %1927 = vrot.lane.b32.xlu2 %v1840_v62, %s5170_s30  ;;  %v2044_v40 = vpack.c.bf16 %v2012_v55, %v2012_v55  ;;  %v2028_v62 = vld [vmem:[#allocation2 + $0x10a] sm:$0xff] }
 0x2aa   : > { %v1693_v3 = vpop.permute.xlu1 %1692 }
 0x2ab   : > { %1771 = vst.msk [vmem:[#allocation4 + $0x48] sm:$0xf] %vm1752_vm9, %v1693_v3  ;;  %v1701_v46 = vpop.permute.xlu2 %1700  ;;  %v2065_v3 = vpack.c.bf16 %v2033_v9, %v2033_v9 }
 0x2ac   : > { %1941 = vrot.lane.b32.xlu0 %v1847_v7, %s5170_s30  ;;  %1775 = vst.msk [vmem:[#allocation4 + $0x58] sm:$0xf] %vm1752_vm9, %v1701_v46 }
 0x2ae   : > { %v1697_v56 = vpop.permute.xlu0 %1696 }
 0x2af   : > { %1773 = vst.msk [vmem:[#allocation4 + $0x50] sm:$0xf] %vm1752_vm9, %v1697_v56 }
 0x2b0   : > { %1943 = vrot.lane.b32.xlu1 %v1848_v18, %s5170_s30  ;;  %v2031_v18 = vld [vmem:[#allocation2 + $0x12a] sm:$0xff] }
 0x2b1   : > { %1933 = vrot.lane.b32.xlu2 %v1843_v47, %s5170_s30  ;;  %v2063_v47 = vpack.c.bf16 %v2031_v18, %v2031_v18 }
 0x2b2   : > { %v1699_v31 = vpop.permute.xlu1 %1698 }
 0x2b3   : > { %1774 = vst.msk [vmem:[#allocation4 + $0x54] sm:$0xf] %vm1752_vm9, %v1699_v31  ;;  %v1707_v10 = vpop.permute.xlu2 %1706 }
 0x2b4   : > { %2108 = vrot.lane.b32.xlu0 %v5932_v51, %s5171_s6  ;;  %1778 = vst.msk [vmem:[#allocation4 + $0x64] sm:$0xf] %vm1752_vm9, %v1707_v10  ;;  %v2047_v51 = vpack.c.bf16 %v2015_v36, %v2015_v36  ;;  %v5111_v36 = vld [vmem:[%s7342_s1 + $0x8] sm:$0xff] }
 0x2b6   : > { %v1703_v33 = vpop.permute.xlu0 %1702 }
 0x2b7   : > { %1776 = vst.msk [vmem:[#allocation4 + $0x5c] sm:$0xf] %vm1752_vm9, %v1703_v33 }
 0x2b8   : > { %2110 = vrot.lane.b32.xlu1 %v2044_v40, %s5171_s6 }
 0x2b9   : > { %1939 = vrot.lane.b32.xlu2 %v1846_v14, %s5170_s30 }
 0x2ba   : > { %v1705_v48 = vpop.permute.xlu1 %1704 }
 0x2bb   : > { %1777 = vst.msk [vmem:[#allocation4 + $0x60] sm:$0xf] %vm1752_vm9, %v1705_v48  ;;  %v1713_v22 = vpop.permute.xlu2 %1712 }
 0x2bc   : > { %2114 = vrot.lane.b32.xlu0 %v5942_v63, %s5171_s6  ;;  %1781 = vst.msk [vmem:[#allocation4 + $0x70] sm:$0xf] %vm1752_vm9, %v1713_v22  ;;  %v2050_v63 = vpack.c.bf16 %v2018_v37, %v2018_v37  ;;  %v5110_v22 = vld [vmem:[%s7342_s1] sm:$0xff] }
 0x2be   : > { %v1709_v52 = vpop.permute.xlu0 %1708 }
 0x2bf   : > { %1779 = vst.msk [vmem:[#allocation4 + $0x68] sm:$0xf] %vm1752_vm9, %v1709_v52 }
 0x2c0   : > { %2116 = vrot.lane.b32.xlu1 %v2047_v51, %s5171_s6 }
 0x2c1   : > { %2106 = vrot.lane.b32.xlu2 %v2042_v21, %s5171_s6  ;;  %v2036_v21 = vld [vmem:[#allocation2 + $0x16a] sm:$0xff] }
 0x2c2   : > { %v1711_v53 = vpop.permute.xlu1 %1710  ;;  %v2068_v52 = vpack.c.bf16 %v2036_v21, %v2036_v21 }
 0x2c3   : > { %1780 = vst.msk [vmem:[#allocation4 + $0x6c] sm:$0xf] %vm1752_vm9, %v1711_v53  ;;  %v1719_v57 = vpop.permute.xlu2 %1718 }
 0x2c4   : > { %2120 = vrot.lane.b32.xlu0 %v5952_v27, %s5171_s6  ;;  %1784 = vst.msk [vmem:[#allocation4 + $0x7c] sm:$0xf] %vm1752_vm9, %v1719_v57  ;;  %v2053_v27 = vpack.c.bf16 %v2021_v23, %v2021_v23  ;;  %v2066_v57 = vpack.c.bf16 %v2034_v38, %v2034_v38 }
 0x2c6   : > { %v1715_v12 = vpop.permute.xlu0 %1714 }
 0x2c7   : > { %1782 = vst.msk [vmem:[#allocation4 + $0x74] sm:$0xf] %vm1752_vm9, %v1715_v12 }
 0x2c8   : > { %2122 = vrot.lane.b32.xlu1 %v2050_v63, %s5171_s6 }
 0x2c9   : > { %2112 = vrot.lane.b32.xlu2 %v2045_v26, %s5171_s6 }
 0x2ca   : > { %v1717_v0 = vpop.permute.xlu1 %1716 }
 0x2cb   : > { %1783 = vst.msk [vmem:[#allocation4 + $0x78] sm:$0xf] %vm1752_vm9, %v1717_v0  ;;  %v1886_v25 = vpop.permute.xlu2 %1885  ;;  %v2039_v0 = vld [vmem:[#allocation2 + $0x18a] sm:$0xff] }
 0x2cc   : > { %2126 = vrot.lane.b32.xlu0 %v5962_v8, %s5171_s6  ;;  %1980 = vst.msk [vmem:[#allocation4 + $0x8] sm:$0xf] %vm1977_vm10, %v1886_v25  ;;  %v2056_v8 = vpack.c.bf16 %v2024_v49, %v2024_v49  ;;  %v2071_v13 = vpack.c.bf16 %v2039_v0, %v2039_v0 }
 0x2ce   : > { %v1882_v32 = vpop.permute.xlu0 %1881 }
 0x2cf   : > { %1978 = vst.msk [vmem:[#allocation4] sm:$0xf] %vm1977_vm10, %v1882_v32 }
 0x2d0   : > { %2128 = vrot.lane.b32.xlu1 %v2053_v27, %s5171_s6 }
 0x2d1   : > { %2118 = vrot.lane.b32.xlu2 %v2048_v60, %s5171_s6  ;;  %v2037_v60 = vld [vmem:[#allocation2 + $0x172] sm:$0xff] }
 0x2d2   : > { %v1884_v34 = vpop.permute.xlu1 %1883  ;;  %v2069_v32 = vpack.c.bf16 %v2037_v60, %v2037_v60 }
 0x2d3   : > { %1979 = vst.msk [vmem:[#allocation4 + $0x4] sm:$0xf] %vm1977_vm10, %v1884_v34  ;;  %v1892_v41 = vpop.permute.xlu2 %1891 }
 0x2d4   : > { %2132 = vrot.lane.b32.xlu0 %v5972_v30, %s5171_s6  ;;  %1983 = vst.msk [vmem:[#allocation4 + $0x14] sm:$0xf] %vm1977_vm10, %v1892_v41  ;;  %v2059_v30 = vpack.c.bf16 %v2027_v15, %v2027_v15 }
 0x2d6   : > { %v1888_v58 = vpop.permute.xlu0 %1887 }
 0x2d7   : > { %1981 = vst.msk [vmem:[#allocation4 + $0xc] sm:$0xf] %vm1977_vm10, %v1888_v58 }
 0x2d8   : > { %2134 = vrot.lane.b32.xlu1 %v2056_v8, %s5171_s6 }
 0x2d9   : > { %2124 = vrot.lane.b32.xlu2 %v2051_v29, %s5171_s6 }
 0x2da   : > { %v1890_v6 = vpop.permute.xlu1 %1889 }
 0x2db   : > { %1982 = vst.msk [vmem:[#allocation4 + $0x10] sm:$0xf] %vm1977_vm10, %v1890_v6  ;;  %v1898_v5 = vpop.permute.xlu2 %1897 }
 0x2dc   : > { %2138 = vrot.lane.b32.xlu0 %v5982_v35, %s5171_s6  ;;  %1986 = vst.msk [vmem:[#allocation4 + $0x20] sm:$0xf] %vm1977_vm10, %v1898_v5  ;;  %v2062_v35 = vpack.c.bf16 %v2030_v44, %v2030_v44 }
 0x2de   : > { %v1894_v39 = vpop.permute.xlu0 %1893 }
 0x2df   : > { %1984 = vst.msk [vmem:[#allocation4 + $0x18] sm:$0xf] %vm1977_vm10, %v1894_v39 }
 0x2e0   : > { %2140 = vrot.lane.b32.xlu1 %v2059_v30, %s5171_s6 }
 0x2e1   : > { %2130 = vrot.lane.b32.xlu2 %v2054_v54, %s5171_s6 }
 0x2e2   : > { %v1896_v28 = vpop.permute.xlu1 %1895 }
 0x2e3   : > { %1985 = vst.msk [vmem:[#allocation4 + $0x1c] sm:$0xf] %vm1977_vm10, %v1896_v28  ;;  %v1904_v42 = vpop.permute.xlu2 %1903 }
 0x2e4   : > { %1989 = vst.msk [vmem:[#allocation4 + $0x2c] sm:$0xf] %vm1977_vm10, %v1904_v42  ;;  %2144 = vrot.lane.b32.xlu0 %v5992_v11, %s5171_s6  ;;  %v2060_v11 = vpack.c.bf16 %v2028_v62, %v2028_v62 }
 0x2e6   : > { %v1900_v61 = vpop.permute.xlu0 %1899 }
 0x2e7   : > { %1987 = vst.msk [vmem:[#allocation4 + $0x24] sm:$0xf] %vm1977_vm10, %v1900_v61 }
 0x2e8   : > { %2146 = vrot.lane.b32.xlu1 %v2062_v35, %s5171_s6 }
 0x2e9   : > { %2136 = vrot.lane.b32.xlu2 %v2057_v59, %s5171_s6 }
 0x2ea   : > { %v1902_v20 = vpop.permute.xlu1 %1901 }
 0x2eb   : > { %1988 = vst.msk [vmem:[#allocation4 + $0x28] sm:$0xf] %vm1977_vm10, %v1902_v20  ;;  %v1910_v19 = vpop.permute.xlu2 %1909 }
 0x2ec   : > { %1992 = vst.msk [vmem:[#allocation4 + $0x38] sm:$0xf] %vm1977_vm10, %v1910_v19  ;;  %2150 = vrot.lane.b32.xlu0 %v6002_v17, %s5171_s6 }
 0x2ee   : > { %v1906_v7 = vpop.permute.xlu0 %1905 }
 0x2ef   : > { %1990 = vst.msk [vmem:[#allocation4 + $0x30] sm:$0xf] %vm1977_vm10, %v1906_v7 }
 0x2f0   : > { %2152 = vrot.lane.b32.xlu1 %v2065_v3, %s5171_s6 }
 0x2f1   : > { %2142 = vrot.lane.b32.xlu2 %v2060_v11, %s5171_s6 }
 0x2f2   : > { %v1908_v24 = vpop.permute.xlu1 %1907 }
 0x2f3   : > { %1991 = vst.msk [vmem:[#allocation4 + $0x34] sm:$0xf] %vm1977_vm10, %v1908_v24  ;;  %v1916_v46 = vpop.permute.xlu2 %1915 }
 0x2f4   : > { %1995 = vst.msk [vmem:[#allocation4 + $0x44] sm:$0xf] %vm1977_vm10, %v1916_v46  ;;  %2156 = vrot.lane.b32.xlu0 %v6011_v2, %s5171_s6  ;;  %v2271_v2 = vld [vmem:[%s7342_s1 + $0x10] sm:$0x3] }
 0x2f5   : > { %v2365_v43 = vunpack.c.l.b16 %v2271_v2 }
 0x2f6   : > { %v1912_v17 = vpop.permute.xlu0 %1911 }
 0x2f7   : > { %1993 = vst.msk [vmem:[#allocation4 + $0x3c] sm:$0xf] %vm1977_vm10, %v1912_v17  ;;  %v2368_v40 = vpack.c.b16 %v2365_v43, %v2365_v43  ;;  %v2041_v43 = vld [vmem:[#allocation2 + $0x1a2] sm:$0xff] }
 0x2f8   : > { %2158 = vrot.lane.b32.xlu1 %v2068_v52, %s5171_s6 }
 0x2f9   : > { %2148 = vrot.lane.b32.xlu2 %v2063_v47, %s5171_s6  ;;  %v2422_v33 = vsel %vm2420_vm11, %v2368_v40, 0  ;;  %v2073_v40 = vpack.c.bf16 %v2041_v43, %v2041_v43 }
 0x2fa   : > { %v1914_v56 = vpop.permute.xlu1 %1913  ;;  %2429 = vmatpush.bf16.msra.mxu0 %v2422_v33  ;;  %5130 = vmatpush.bf16.msra.mxu2 %v2422_v33 }
 0x2fb   : > { %1994 = vst.msk [vmem:[#allocation4 + $0x40] sm:$0xf] %vm1977_vm10, %v1914_v56  ;;  %v1922_v55 = vpop.permute.xlu2 %1921 }
 0x2fc   : > { %1998 = vst.msk [vmem:[#allocation4 + $0x50] sm:$0xf] %vm1977_vm10, %v1922_v55  ;;  %2162 = vrot.lane.b32.xlu0 %v6020_v16, %s5171_s6 }
 0x2fe   : > { %v1918_v31 = vpop.permute.xlu0 %1917  ;;  %2430 = vmatpush.bf16.msra.mxu0 %v5111_v36  ;;  %5131 = vmatpush.bf16.msra.mxu2 %v5111_v36  ;;  %v2717_v36 = vld [vmem:[#allocation3 + $0x1] sm:$0xff] }
 0x2ff   : > { %1996 = vst.msk [vmem:[#allocation4 + $0x48] sm:$0xf] %vm1977_vm10, %v1918_v31 }
 0x300   : > { %2164 = vrot.lane.b32.xlu1 %v2071_v13, %s5171_s6 }
 0x301   : > { %2154 = vrot.lane.b32.xlu2 %v2066_v57, %s5171_s6 }
 0x302   : > { %v1920_v10 = vpop.permute.xlu1 %1919  ;;  %2431 = vmatpush.bf16.msra.mxu0 %v5110_v22  ;;  %5132 = vmatpush.bf16.msra.mxu2 %v5110_v22 }
 0x303   : > { %1997 = vst.msk [vmem:[#allocation4 + $0x4c] sm:$0xf] %vm1977_vm10, %v1920_v10  ;;  %v1928_v14 = vpop.permute.xlu2 %1927 }
 0x304   : > { %2001 = vst.msk [vmem:[#allocation4 + $0x5c] sm:$0xf] %vm1977_vm10, %v1928_v14  ;;  %2168 = vrot.lane.b32.xlu0 %v2073_v40, %s5171_s6 }
 0x306   : > { %v1924_v16 = vpop.permute.xlu0 %1923 }
 0x307   : > { %1999 = vst.msk [vmem:[#allocation4 + $0x54] sm:$0xf] %vm1977_vm10, %v1924_v16  ;;  %v2040_v16 = vld [vmem:[#allocation2 + $0x19a] sm:$0xff] }
 0x309   : > { %2160 = vrot.lane.b32.xlu2 %v2069_v32, %s5171_s6 }
 0x30a   : > { %v1926_v48 = vpop.permute.xlu1 %1925 }
 0x30b   : > { %2000 = vst.msk [vmem:[#allocation4 + $0x58] sm:$0xf] %vm1977_vm10, %v1926_v48  ;;  %v1934_v1 = vpop.permute.xlu2 %1933  ;;  %v2072_v48 = vpack.c.bf16 %v2040_v16, %v2040_v16 }
 0x30c   : > { %2004 = vst.msk [vmem:[#allocation4 + $0x68] sm:$0xf] %vm1977_vm10, %v1934_v1  ;;  %v2749_v1 = vpack.c.bf16 %v2717_v36, %v2717_v36 }
 0x30e   : > { %v1930_v51 = vpop.permute.xlu0 %1929  ;;  %2813 = vrot.lane.b32.xlu1 %v2749_v1, %s5164_s20 }
 0x30f   : > { %2002 = vst.msk [vmem:[#allocation4 + $0x60] sm:$0xf] %vm1977_vm10, %v1930_v51  ;;  %v2718_v51 = vld [vmem:[#allocation3 + $0x9] sm:$0xff] }
 0x310   : > { %v2750_v21 = vpack.c.bf16 %v2718_v51, %v2718_v51 }
 0x311   : > { %2166 = vrot.lane.b32.xlu2 %v2072_v48, %s5171_s6 }
 0x312   : > { %v1932_v37 = vpop.permute.xlu1 %1931 }
 0x313   : > { %2003 = vst.msk [vmem:[#allocation4 + $0x64] sm:$0xf] %vm1977_vm10, %v1932_v37  ;;  %v1940_v53 = vpop.permute.xlu2 %1939  ;;  %v6302_v37 = vld [vmem:[%s7343_s2] ss:$0 sm:$0xff] }
 0x314   : > { %2007 = vst.msk [vmem:[#allocation4 + $0x74] sm:$0xf] %vm1977_vm10, %v1940_v53 }
 0x316   : > { %v1936_v63 = vpop.permute.xlu0 %1935 }
 0x317   : > { %2005 = vst.msk [vmem:[#allocation4 + $0x6c] sm:$0xf] %vm1977_vm10, %v1936_v63 }
 0x319   : > { %2815 = vrot.lane.b32.xlu2 %v2750_v21, %s5164_s20 }
 0x31a   : > { %v1938_v26 = vpop.permute.xlu1 %1937 }
 0x31b   : > { %2006 = vst.msk [vmem:[#allocation4 + $0x70] sm:$0xf] %vm1977_vm10, %v1938_v26  ;;  %v2107_v12 = vpop.permute.xlu2 %2106 }
 0x31c   : > { %2203 = vst.msk [vmem:[#allocation4] sm:$0xf] %vm2202_vm12, %v2107_v12 }
 0x31e   : > { %v1942_v23 = vpop.permute.xlu0 %1941 }
 0x31f   : > { %2008 = vst.msk [vmem:[#allocation4 + $0x78] sm:$0xf] %vm1977_vm10, %v1942_v23 }
 0x322   : > { %v1944_v25 = vpop.permute.xlu1 %1943 }
 0x323   : > { %2009 = vst.msk [vmem:[#allocation4 + $0x7c] sm:$0xf] %vm1977_vm10, %v1944_v25  ;;  %v2113_v27 = vpop.permute.xlu2 %2112 }
 0x324   : > { %2206 = vst.msk [vmem:[#allocation4 + $0xc] sm:$0xf] %vm2202_vm12, %v2113_v27 }
 0x326   : > { %v2109_v49 = vpop.permute.xlu0 %2108 }
 0x327   : > { %2204 = vst.msk [vmem:[#allocation4 + $0x4] sm:$0xf] %vm2202_vm12, %v2109_v49 }
 0x32a   : > { %v2111_v34 = vpop.permute.xlu1 %2110 }
 0x32b   : > { %2205 = vst.msk [vmem:[#allocation4 + $0x8] sm:$0xf] %vm2202_vm12, %v2111_v34  ;;  %v2119_v45 = vpop.permute.xlu2 %2118 }
 0x32c   : > { %2209 = vst.msk [vmem:[#allocation4 + $0x18] sm:$0xf] %vm2202_vm12, %v2119_v45 }
 0x32e   : > { %v5094_v41 = vld [vmem:[#allocation4] sm:$0xff]  ;;  %v2115_v8 = vpop.permute.xlu0 %2114 }
 0x32f   : > { %2207 = vst.msk [vmem:[#allocation4 + $0x10] sm:$0xf] %vm2202_vm12, %v2115_v8  ;;  %4986 = vmatmul.msk.bf16.vlgmr.msra.gmra.mxu0 %vm2371_vm13, %v5094_v41 }
 0x332   : > { %v2117_v29 = vpop.permute.xlu1 %2116  ;;  %v5095_v5 = vld [vmem:[#allocation4 + $0x8] sm:$0xff] }
 0x333   : > { %2208 = vst.msk [vmem:[#allocation4 + $0x14] sm:$0xf] %vm2202_vm12, %v2117_v29  ;;  %v2125_v58 = vpop.permute.xlu2 %2124 }
 0x334   : > { %2212 = vst.msk [vmem:[#allocation4 + $0x24] sm:$0xf] %vm2202_vm12, %v2125_v58 }
 0x336   : > { %v2121_v15 = vpop.permute.xlu0 %2120 }
 0x337   : > { %2210 = vst.msk [vmem:[#allocation4 + $0x1c] sm:$0xf] %vm2202_vm12, %v2121_v15 }
 0x33a   : > { %v2123_v6 = vpop.permute.xlu1 %2122  ;;  %v5096_v42 = vld [vmem:[#allocation4 + $0x10] sm:$0xff] }
 0x33b   : > { %2211 = vst.msk [vmem:[#allocation4 + $0x20] sm:$0xf] %vm2202_vm12, %v2123_v6  ;;  %v2131_v50 = vpop.permute.xlu2 %2130 }
 0x33c   : > { %2215 = vst.msk [vmem:[#allocation4 + $0x30] sm:$0xf] %vm2202_vm12, %v2131_v50 }
 0x33e   : > { %v2127_v30 = vpop.permute.xlu0 %2126  ;;  %v5097_v11 = vld [vmem:[#allocation4 + $0x18] sm:$0xff] }
 0x33f   : > { %2213 = vst.msk [vmem:[#allocation4 + $0x28] sm:$0xf] %vm2202_vm12, %v2127_v30  ;;  %4987 = vmatmul.msk.bf16.gmra.mxu0 %vm2371_vm13, %v5095_v5 }
 0x342   : > { %v2129_v54 = vpop.permute.xlu1 %2128  ;;  %v5098_v24 = vld [vmem:[#allocation4 + $0x20] sm:$0xff] }
 0x343   : > { %2214 = vst.msk [vmem:[#allocation4 + $0x2c] sm:$0xf] %vm2202_vm12, %v2129_v54  ;;  %v2137_v39 = vpop.permute.xlu2 %2136 }
 0x344   : > { %2218 = vst.msk [vmem:[#allocation4 + $0x3c] sm:$0xf] %vm2202_vm12, %v2137_v39 }
 0x346   : > { %v2133_v44 = vpop.permute.xlu0 %2132 }
 0x347   : > { %2216 = vst.msk [vmem:[#allocation4 + $0x34] sm:$0xf] %vm2202_vm12, %v2133_v44 }
 0x34a   : > { %v2135_v28 = vpop.permute.xlu1 %2134  ;;  %v5099_v47 = vld [vmem:[#allocation4 + $0x28] sm:$0xff] }
 0x34b   : > { %2217 = vst.msk [vmem:[#allocation4 + $0x38] sm:$0xf] %vm2202_vm12, %v2135_v28  ;;  %v2143_v4 = vpop.permute.xlu2 %2142 }
 0x34c   : > { %2221 = vst.msk [vmem:[#allocation4 + $0x48] sm:$0xf] %vm2202_vm12, %v2143_v4 }
 0x34e   : > { %v2139_v35 = vpop.permute.xlu0 %2138  ;;  %v5100_v2 = vld [vmem:[#allocation4 + $0x30] sm:$0xff] }
 0x34f   : > { %2219 = vst.msk [vmem:[#allocation4 + $0x40] sm:$0xf] %vm2202_vm12, %v2139_v35  ;;  %4988 = vmatmul.msk.bf16.gmra.mxu0 %vm2371_vm13, %v5096_v42 }
 0x352   : > { %v2141_v59 = vpop.permute.xlu1 %2140  ;;  %v5101_v22 = vld [vmem:[#allocation4 + $0x38] sm:$0xff] }
 0x353   : > { %2220 = vst.msk [vmem:[#allocation4 + $0x44] sm:$0xf] %vm2202_vm12, %v2141_v59  ;;  %v2149_v61 = vpop.permute.xlu2 %2148 }
 0x354   : > { %2224 = vst.msk [vmem:[#allocation4 + $0x54] sm:$0xf] %vm2202_vm12, %v2149_v61 }
 0x356   : > { %v2145_v20 = vpop.permute.xlu0 %2144 }
 0x357   : > { %2222 = vst.msk [vmem:[#allocation4 + $0x4c] sm:$0xf] %vm2202_vm12, %v2145_v20 }
 0x35a   : > { %v5102_v62 = vld [vmem:[#allocation4 + $0x40] sm:$0xff]  ;;  %v2147_v19 = vpop.permute.xlu1 %2146 }
 0x35b   : > { %2223 = vst.msk [vmem:[#allocation4 + $0x50] sm:$0xf] %vm2202_vm12, %v2147_v19  ;;  %4994 = vmatmul.msk.bf16.vlgmr.msra.gmra.mxu2 %vm2371_vm13, %v5102_v62  ;;  %v2155_v17 = vpop.permute.xlu2 %2154 }
 0x35c   : > { %2227 = vst.msk [vmem:[#allocation4 + $0x60] sm:$0xf] %vm2202_vm12, %v2155_v17 }
 0x35e   : > { %v2151_v7 = vpop.permute.xlu0 %2150  ;;  %v5103_v3 = vld [vmem:[#allocation4 + $0x48] sm:$0xff] }
 0x35f   : > { %4989 = vmatmul.msk.bf16.gmra.mxu0 %vm2371_vm13, %v5097_v11  ;;  %2225 = vst.msk [vmem:[#allocation4 + $0x58] sm:$0xf] %vm2202_vm12, %v2151_v7 }
 0x362   : > { %v2153_v9 = vpop.permute.xlu1 %2152  ;;  %v5104_v18 = vld [vmem:[#allocation4 + $0x50] sm:$0xff] }
 0x363   : > { %2226 = vst.msk [vmem:[#allocation4 + $0x5c] sm:$0xf] %vm2202_vm12, %v2153_v9  ;;  %v2161_v56 = vpop.permute.xlu2 %2160 }
 0x364   : > { %2230 = vst.msk [vmem:[#allocation4 + $0x6c] sm:$0xf] %vm2202_vm12, %v2161_v56 }
 0x366   : > { %v2157_v46 = vpop.permute.xlu0 %2156 }
 0x367   : > { %2228 = vst.msk [vmem:[#allocation4 + $0x64] sm:$0xf] %vm2202_vm12, %v2157_v46 }
 0x36a   : > { %v2159_v55 = vpop.permute.xlu1 %2158  ;;  %v5105_v31 = vld [vmem:[#allocation4 + $0x58] sm:$0xff] }
 0x36b   : > { %4995 = vmatmul.msk.bf16.gmra.mxu2 %vm2371_vm13, %v5103_v3  ;;  %2229 = vst.msk [vmem:[#allocation4 + $0x68] sm:$0xf] %vm2202_vm12, %v2159_v55 }
 0x36e   : > { %v2163_v10 = vpop.permute.xlu0 %2162  ;;  %v5106_v33 = vld [vmem:[#allocation4 + $0x60] sm:$0xff] }
 0x36f   : > { %4990 = vmatmul.msk.bf16.gmra.mxu0 %vm2371_vm13, %v5098_v24  ;;  %2231 = vst.msk [vmem:[#allocation4 + $0x70] sm:$0xf] %vm2202_vm12, %v2163_v10 }
 0x372   : > { %v2165_v14 = vpop.permute.xlu1 %2164  ;;  %v5107_v52 = vld [vmem:[#allocation4 + $0x68] sm:$0xff] }
 0x373   : > { %2232 = vst.msk [vmem:[#allocation4 + $0x74] sm:$0xf] %vm2202_vm12, %v2165_v14 }
 0x37a   : > { %v5108_v23 = vld [vmem:[#allocation4 + $0x70] sm:$0xff] }
 0x37b   : > { %4996 = vmatmul.msk.bf16.gmra.mxu2 %vm2371_vm13, %v5104_v18 }
 0x37f   : > { %4991 = vmatmul.msk.bf16.gmra.mxu0 %vm2371_vm13, %v5099_v47 }
 0x38b   : > { %4997 = vmatmul.msk.bf16.gmra.mxu2 %vm2371_vm13, %v5105_v31 }
 0x38f   : > { %4992 = vmatmul.msk.bf16.gmra.mxu0 %vm2371_vm13, %v5100_v2 }
 0x39b   : > { %4998 = vmatmul.msk.bf16.gmra.mxu2 %vm2371_vm13, %v5106_v33 }
 0x39f   : > { %4993 = vmatmul.msk.bf16.gmra.mxu0 %vm2371_vm13, %v5101_v22 }
 0x3ab   : > { %4999 = vmatmul.msk.bf16.gmra.mxu2 %vm2371_vm13, %v5107_v52 }
 0x3ac   : > { %v2433_v53 = vpop.f32.mrf.mxu0 }
 0x3ad   : > { %v2434_v38 = vadd.f32 %v6302_v37, %v2433_v53 }
 0x3af   : > { %v2513_v57 = vmax.f32 %v2434_v38, 0.0 }
 0x3b1   : > { %2589 = vst.msk [vmem:[#allocation3 + $0x19] sm:$0xff] %vm226_vm0, %v2513_v57 }
 0x3b4   : > { %v2435_v63 = vpop.f32.mrf.mxu0 }
 0x3b5   : > { %v2436_v26 = vadd.f32 %v6302_v37, %v2435_v63 }
 0x3b7   : > { %v2514_v12 = vmax.f32 %v2436_v26, 0.0 }
 0x3b8   : > { %v2719_v0 = vld [vmem:[#allocation3 + $0x19] sm:$0xff] }
 0x3b9   : > { %v2623_v13 = vld [vmem:[#allocation3 + $0x18] sm:$0xff]  ;;  %2590 = vst.msk [vmem:[#allocation3 + $0x21] sm:$0xff] %vm226_vm0, %v2514_v12  ;;  %v2751_v25 = vpack.c.bf16 %v2719_v0, %v2719_v0 }
 0x3ba   : > { %v6309_v27 = vpack.c.bf16 %v2623_v13, %v2623_v13 }
 0x3bb   : > { %2817 = vrot.lane.b32.xlu0 %v2751_v25, %s5164_s20  ;;  %5000 = vmatmul.msk.bf16.gmra.mxu2 %vm2371_vm13, %v5108_v23 }
 0x3bc   : > { %2687 = vst.msk [vmem:[#allocation5 + $0x8] sm:$0xf] %vm401_vm3, %v6309_v27  ;;  %v2438_v60 = vpop.f32.mrf.mxu0 }
 0x3bd   : > { %v2439_v32 = vadd.f32 %v6302_v37, %v2438_v60 }
 0x3bf   : > { %v2515_v49 = vmax.f32 %v2439_v32, 0.0 }
 0x3c0   : > { %v2720_v34 = vld [vmem:[#allocation3 + $0x21] sm:$0xff] }
 0x3c1   : > { %v2624_v45 = vld [vmem:[#allocation3 + $0x20] sm:$0xff]  ;;  %2591 = vst.msk [vmem:[#allocation3 + $0x31] sm:$0xff] %vm226_vm0, %v2515_v49  ;;  %v2752_v41 = vpack.c.bf16 %v2720_v34, %v2720_v34  ;;  %v2167_v49 = vpop.permute.xlu2 %2166 }
 0x3c2   : > { %v6317_v8 = vpack.c.bf16 %v2624_v45, %v2624_v45  ;;  %2233 = vst.msk [vmem:[#allocation4 + $0x78] sm:$0xf] %vm2202_vm12, %v2167_v49 }
 0x3c3   : > { %2819 = vrot.lane.b32.xlu1 %v2752_v41, %s5164_s20 }
 0x3c4   : > { %2688 = vst.msk [vmem:[#allocation5 + $0xc] sm:$0xf] %vm401_vm3, %v6317_v8  ;;  %v2440_v29 = vpop.f32.mrf.mxu0 }
 0x3c5   : > { %v2441_v58 = vadd.f32 %v6302_v37, %v2440_v29 }
 0x3c7   : > { %v2516_v15 = vmax.f32 %v2441_v58, 0.0 }
 0x3c8   : > { %v2721_v6 = vld [vmem:[#allocation3 + $0x31] sm:$0xff] }
 0x3c9   : > { %v2625_v50 = vld [vmem:[#allocation3 + $0x30] sm:$0xff]  ;;  %2592 = vst.msk [vmem:[#allocation3 + $0x39] sm:$0xff] %vm226_vm0, %v2516_v15  ;;  %v2753_v5 = vpack.c.bf16 %v2721_v6, %v2721_v6 }
 0x3ca   : > { %v6324_v30 = vpack.c.bf16 %v2625_v50, %v2625_v50 }
 0x3cb   : > { %2821 = vrot.lane.b32.xlu2 %v2753_v5, %s5164_s20 }
 0x3cc   : > { %2689 = vst.msk [vmem:[#allocation5 + $0x10] sm:$0xf] %vm401_vm3, %v6324_v30  ;;  %v2443_v54 = vpop.f32.mrf.mxu0 }
 0x3cd   : > { %v2444_v39 = vadd.f32 %v6302_v37, %v2443_v54 }
 0x3cf   : > { %v2517_v44 = vmax.f32 %v2444_v39, 0.0 }
 0x3d0   : > { %v2722_v28 = vld [vmem:[#allocation3 + $0x39] sm:$0xff] }
 0x3d1   : > { %v2626_v4 = vld [vmem:[#allocation3 + $0x38] sm:$0xff]  ;;  %2593 = vst.msk [vmem:[#allocation3 + $0x49] sm:$0xff] %vm226_vm0, %v2517_v44  ;;  %v2754_v42 = vpack.c.bf16 %v2722_v28, %v2722_v28 }
 0x3d2   : > { %v6331_v35 = vpack.c.bf16 %v2626_v4, %v2626_v4 }
 0x3d3   : > { %2823 = vrot.lane.b32.xlu0 %v2754_v42, %s5164_s20 }
 0x3d4   : > { %2690 = vst.msk [vmem:[#allocation5 + $0x14] sm:$0xf] %vm401_vm3, %v6331_v35  ;;  %v2445_v59 = vpop.f32.mrf.mxu0 }
 0x3d5   : > { %v2446_v61 = vadd.f32 %v6302_v37, %v2445_v59 }
 0x3d7   : > { %v2518_v20 = vmax.f32 %v2446_v61, 0.0 }
 0x3d8   : > { %v2723_v62 = vld [vmem:[#allocation3 + $0x49] sm:$0xff] }
 0x3d9   : > { %v2627_v19 = vld [vmem:[#allocation3 + $0x48] sm:$0xff]  ;;  %2594 = vst.msk [vmem:[#allocation3 + $0x51] sm:$0xff] %vm226_vm0, %v2518_v20  ;;  %v2755_v11 = vpack.c.bf16 %v2723_v62, %v2723_v62 }
 0x3da   : > { %v6338_v7 = vpack.c.bf16 %v2627_v19, %v2627_v19  ;;  %v2622_v19 = vld [vmem:[#allocation3 + $0x8] sm:$0xff] }
 0x3db   : > { %2825 = vrot.lane.b32.xlu1 %v2755_v11, %s5164_s20  ;;  %v2654_v11 = vpack.c.bf16 %v2622_v19, %v2622_v19 }
 0x3dc   : > { %2691 = vst.msk [vmem:[#allocation5 + $0x18] sm:$0xf] %vm401_vm3, %v6338_v7  ;;  %v2448_v9 = vpop.f32.mrf.mxu0 }
 0x3dd   : > { %v2449_v3 = vadd.f32 %v6302_v37, %v2448_v9  ;;  %2686 = vst.msk [vmem:[#allocation5 + $0x4] sm:$0xf] %vm401_vm3, %v2654_v11 }
 0x3de   : > { %v2473_v24 = vpop.f32.mrf.mxu2 }
 0x3df   : > { %v2519_v46 = vmax.f32 %v2449_v3, 0.0  ;;  %v2474_v17 = vadd.f32 %v6302_v37, %v2473_v24 }
 0x3e0   : > { %v2724_v18 = vld [vmem:[#allocation3 + $0x51] sm:$0xff] }
 0x3e1   : > { %v2628_v47 = vld [vmem:[#allocation3 + $0x50] sm:$0xff]  ;;  %2595 = vst.msk [vmem:[#allocation3 + $0x61] sm:$0xff] %vm226_vm0, %v2519_v46  ;;  %v2529_v56 = vmax.f32 %v2474_v17, 0.0  ;;  %v2756_v55 = vpack.c.bf16 %v2724_v18, %v2724_v18  ;;  %v2816_v46 = vpop.permute.xlu2 %2815 }
 0x3e2   : > { %v6346_v31 = vpack.c.bf16 %v2628_v47, %v2628_v47  ;;  %2910 = vst.msk [vmem:[#allocation5 + $0x4] sm:$0xf] %vm626_vm4, %v2816_v46  ;;  %v2169_v47 = vpop.permute.xlu0 %2168 }
 0x3e3   : > { %2605 = vst.msk [vmem:[#allocation3 + $0xd9] sm:$0xff] %vm226_vm0, %v2529_v56  ;;  %2827 = vrot.lane.b32.xlu2 %v2756_v55, %s5164_s20 }
 0x3e4   : > { %v2450_v2 = vpop.f32.mrf.mxu0  ;;  %2692 = vst.msk [vmem:[#allocation5 + $0x1c] sm:$0xf] %vm401_vm3, %v6346_v31 }
 0x3e5   : > { %v2451_v43 = vadd.f32 %v6302_v37, %v2450_v2  ;;  %2234 = vst.msk [vmem:[#allocation4 + $0x7c] sm:$0xf] %vm2202_vm12, %v2169_v47 }
 0x3e6   : > { %v2475_v10 = vpop.f32.mrf.mxu2 }
 0x3e7   : > { %v2520_v40 = vmax.f32 %v2451_v43, 0.0  ;;  %v2476_v14 = vadd.f32 %v6302_v37, %v2475_v10 }
 0x3e8   : > { %v2725_v33 = vld [vmem:[#allocation3 + $0x61] sm:$0xff] }
 0x3e9   : > { %v2629_v16 = vld [vmem:[#allocation3 + $0x60] sm:$0xff]  ;;  %2596 = vst.msk [vmem:[#allocation3 + $0x69] sm:$0xff] %vm226_vm0, %v2520_v40  ;;  %v2530_v36 = vmax.f32 %v2476_v14, 0.0  ;;  %v2757_v48 = vpack.c.bf16 %v2725_v33, %v2725_v33 }
 0x3ea   : > { %v6355_v1 = vpack.c.bf16 %v2629_v16, %v2629_v16  ;;  %v2639_v22 = vld [vmem:[#allocation3 + $0xd8] sm:$0xff] }
 0x3eb   : > { %2606 = vst.msk [vmem:[#allocation3 + $0xe1] sm:$0xff] %vm226_vm0, %v2530_v36  ;;  %2829 = vrot.lane.b32.xlu0 %v2757_v48, %s5164_s20  ;;  %v6359_v51 = vpack.c.bf16 %v2639_v22, %v2639_v22 }
 0x3ec   : > { %v2453_v21 = vpop.f32.mrf.mxu0  ;;  %2693 = vst.msk [vmem:[#allocation5 + $0x20] sm:$0xf] %vm401_vm3, %v6355_v1 }
 0x3ed   : > { %v2454_v52 = vadd.f32 %v6302_v37, %v2453_v21  ;;  %2703 = vst.msk [vmem:[#allocation5 + $0x48] sm:$0xf] %vm401_vm3, %v6359_v51 }
 0x3ee   : > { %v2478_v53 = vpop.f32.mrf.mxu2 }
 0x3ef   : > { %v2521_v38 = vmax.f32 %v2454_v52, 0.0  ;;  %v2479_v57 = vadd.f32 %v6302_v37, %v2478_v53  ;;  %v2621_v52 = vld [vmem:[#allocation3] sm:$0xff] }
 0x3f0   : > { %v2726_v63 = vld [vmem:[#allocation3 + $0x69] sm:$0xff] }
 0x3f1   : > { %v2630_v26 = vld [vmem:[#allocation3 + $0x68] sm:$0xff]  ;;  %2597 = vst.msk [vmem:[#allocation3 + $0x79] sm:$0xff] %vm226_vm0, %v2521_v38  ;;  %v2531_v12 = vmax.f32 %v2479_v57, 0.0  ;;  %v2758_v23 = vpack.c.bf16 %v2726_v63, %v2726_v63  ;;  %v2653_v57 = vpack.c.bf16 %v2621_v52, %v2621_v52 }
 0x3f2   : > { %v6368_v0 = vpack.c.bf16 %v2630_v26, %v2630_v26  ;;  %v2640_v13 = vld [vmem:[#allocation3 + $0xe0] sm:$0xff] }
 0x3f3   : > { %2607 = vst.msk [vmem:[#allocation3 + $0xf1] sm:$0xff] %vm226_vm0, %v2531_v12  ;;  %2831 = vrot.lane.b32.xlu1 %v2758_v23, %s5164_s20  ;;  %v6374_v60 = vpack.c.bf16 %v2640_v13, %v2640_v13 }
 0x3f4   : > { %v2455_v25 = vpop.f32.mrf.mxu0  ;;  %2694 = vst.msk [vmem:[#allocation5 + $0x24] sm:$0xf] %vm401_vm3, %v6368_v0 }
 0x3f5   : > { %v2456_v32 = vadd.f32 %v6302_v37, %v2455_v25  ;;  %2704 = vst.msk [vmem:[#allocation5 + $0x4c] sm:$0xf] %vm401_vm3, %v6374_v60  ;;  %v2814_v25 = vpop.permute.xlu1 %2813 }
 0x3f6   : > { %v2480_v34 = vpop.f32.mrf.mxu2  ;;  %2685 = vst.msk [vmem:[#allocation5] sm:$0xf] %vm401_vm3, %v2653_v57 }
 0x3f7   : > { %v2522_v45 = vmax.f32 %v2456_v32, 0.0  ;;  %v2481_v41 = vadd.f32 %v6302_v37, %v2480_v34  ;;  %2909 = vst.msk [vmem:[#allocation5] sm:$0xf] %vm626_vm4, %v2814_v25  ;;  %v2736_v25 = vld [vmem:[#allocation3 + $0xe1] sm:$0xff] }
 0x3f8   : > { %v2727_v29 = vld [vmem:[#allocation3 + $0x79] sm:$0xff] }
 0x3f9   : > { %v2631_v58 = vld [vmem:[#allocation3 + $0x78] sm:$0xff]  ;;  %2598 = vst.msk [vmem:[#allocation3 + $0x81] sm:$0xff] %vm226_vm0, %v2522_v45  ;;  %v2532_v15 = vmax.f32 %v2481_v41, 0.0  ;;  %v2759_v6 = vpack.c.bf16 %v2727_v29, %v2727_v29 }
 0x3fa   : > { %v6382_v50 = vpack.c.bf16 %v2631_v58, %v2631_v58  ;;  %v2641_v5 = vld [vmem:[#allocation3 + $0xf0] sm:$0xff] }
 0x3fb   : > { %2608 = vst.msk [vmem:[#allocation3 + $0xf9] sm:$0xff] %vm226_vm0, %v2532_v15  ;;  %2833 = vrot.lane.b32.xlu2 %v2759_v6, %s5164_s20  ;;  %v6386_v54 = vpack.c.bf16 %v2641_v5, %v2641_v5 }
 0x3fc   : > { %v2458_v39 = vpop.f32.mrf.mxu0  ;;  %2695 = vst.msk [vmem:[#allocation5 + $0x28] sm:$0xf] %vm401_vm3, %v6382_v50 }
 0x3fd   : > { %v2459_v44 = vadd.f32 %v6302_v37, %v2458_v39  ;;  %2705 = vst.msk [vmem:[#allocation5 + $0x50] sm:$0xf] %vm401_vm3, %v6386_v54 }
 0x3fe   : > { %v2483_v28 = vpop.f32.mrf.mxu2 }
 0x3ff   : > { %v2523_v4 = vmax.f32 %v2459_v44, 0.0  ;;  %v2484_v42 = vadd.f32 %v6302_v37, %v2483_v28 }
 0x400   : > { %v2728_v59 = vld [vmem:[#allocation3 + $0x81] sm:$0xff] }
 0x401   : > { %v2632_v61 = vld [vmem:[#allocation3 + $0x80] sm:$0xff]  ;;  %2599 = vst.msk [vmem:[#allocation3 + $0x91] sm:$0xff] %vm226_vm0, %v2523_v4  ;;  %v2533_v20 = vmax.f32 %v2484_v42, 0.0  ;;  %v2760_v62 = vpack.c.bf16 %v2728_v59, %v2728_v59 }
 0x402   : > { %v6397_v9 = vpack.c.bf16 %v2632_v61, %v2632_v61  ;;  %v2642_v3 = vld [vmem:[#allocation3 + $0xf8] sm:$0xff] }
 0x403   : > { %2609 = vst.msk [vmem:[#allocation3 + $0x109] sm:$0xff] %vm226_vm0, %v2533_v20  ;;  %2835 = vrot.lane.b32.xlu0 %v2760_v62, %s5164_s20  ;;  %v6400_v17 = vpack.c.bf16 %v2642_v3, %v2642_v3 }
 0x404   : > { %v2460_v24 = vpop.f32.mrf.mxu0  ;;  %2696 = vst.msk [vmem:[#allocation5 + $0x2c] sm:$0xf] %vm401_vm3, %v6397_v9 }
 0x405   : > { %v2461_v18 = vadd.f32 %v6302_v37, %v2460_v24  ;;  %2706 = vst.msk [vmem:[#allocation5 + $0x54] sm:$0xf] %vm401_vm3, %v6400_v17 }
 0x406   : > { %v2485_v56 = vpop.f32.mrf.mxu2 }
 0x407   : > { %v2524_v55 = vmax.f32 %v2461_v18, 0.0  ;;  %v2486_v2 = vadd.f32 %v6302_v37, %v2485_v56 }
 0x408   : > { %v2729_v43 = vld [vmem:[#allocation3 + $0x91] sm:$0xff] }
 0x409   : > { %v2633_v10 = vld [vmem:[#allocation3 + $0x90] sm:$0xff]  ;;  %2600 = vst.msk [vmem:[#allocation3 + $0x99] sm:$0xff] %vm226_vm0, %v2524_v55  ;;  %v2534_v40 = vmax.f32 %v2486_v2, 0.0  ;;  %v2761_v14 = vpack.c.bf16 %v2729_v43, %v2729_v43 }
 0x40a   : > { %v6411_v33 = vpack.c.bf16 %v2633_v10, %v2633_v10  ;;  %v2643_v16 = vld [vmem:[#allocation3 + $0x108] sm:$0xff]  ;;  %v2735_v10 = vld [vmem:[#allocation3 + $0xd9] sm:$0xff] }
 0x40b   : > { %2610 = vst.msk [vmem:[#allocation3 + $0x111] sm:$0xff] %vm226_vm0, %v2534_v40  ;;  %2837 = vrot.lane.b32.xlu1 %v2761_v14, %s5164_s20  ;;  %v6415_v36 = vpack.c.bf16 %v2643_v16, %v2643_v16 }
 0x40c   : > { %v2463_v48 = vpop.f32.mrf.mxu0  ;;  %2697 = vst.msk [vmem:[#allocation5 + $0x30] sm:$0xf] %vm401_vm3, %v6411_v33 }
 0x40d   : > { %v2464_v22 = vadd.f32 %v6302_v37, %v2463_v48  ;;  %2707 = vst.msk [vmem:[#allocation5 + $0x58] sm:$0xf] %vm401_vm3, %v6415_v36 }
 0x40e   : > { %v2488_v21 = vpop.f32.mrf.mxu2 }
 0x40f   : > { %v2525_v53 = vmax.f32 %v2464_v22, 0.0  ;;  %v2489_v38 = vadd.f32 %v6302_v37, %v2488_v21  ;;  %v2767_v21 = vpack.c.bf16 %v2735_v10, %v2735_v10  ;;  %v5109_v10 = vld [vmem:[#allocation4 + $0x78] sm:$0xff] }
 0x410   : > { %v2730_v63 = vld [vmem:[#allocation3 + $0x99] sm:$0xff]  ;;  %5001 = vmatmul.msk.bf16.gmra.mxu2 %vm2371_vm13, %v5109_v10 }
 0x411   : > { %v2634_v26 = vld [vmem:[#allocation3 + $0x98] sm:$0xff]  ;;  %2601 = vst.msk [vmem:[#allocation3 + $0xa9] sm:$0xff] %vm226_vm0, %v2525_v53  ;;  %v2535_v12 = vmax.f32 %v2489_v38, 0.0  ;;  %v2762_v23 = vpack.c.bf16 %v2730_v63, %v2730_v63 }
 0x412   : > { %v6424_v13 = vpack.c.bf16 %v2634_v26, %v2634_v26  ;;  %v2644_v32 = vld [vmem:[#allocation3 + $0x110] sm:$0xff]  ;;  %v2943_v10 = vld [vmem:[#allocation3 + $0x1a] sm:$0xff] }
 0x413   : > { %2611 = vst.msk [vmem:[#allocation3 + $0x121] sm:$0xff] %vm226_vm0, %v2535_v12  ;;  %2839 = vrot.lane.b32.xlu2 %v2762_v23, %s5164_s20  ;;  %v6430_v34 = vpack.c.bf16 %v2644_v32, %v2644_v32  ;;  %v2738_v12 = vld [vmem:[#allocation3 + $0xf9] sm:$0xff] }
 0x414   : > { %v2465_v49 = vpop.f32.mrf.mxu0  ;;  %2698 = vst.msk [vmem:[#allocation5 + $0x34] sm:$0xf] %vm401_vm3, %v6424_v13 }
 0x415   : > { %v2466_v45 = vadd.f32 %v6302_v37, %v2465_v49  ;;  %2708 = vst.msk [vmem:[#allocation5 + $0x5c] sm:$0xf] %vm401_vm3, %v6430_v34 }
 0x416   : > { %v2490_v41 = vpop.f32.mrf.mxu2 }
 0x417   : > { %v2526_v29 = vmax.f32 %v2466_v45, 0.0  ;;  %v2491_v58 = vadd.f32 %v6302_v37, %v2490_v41  ;;  %v2770_v45 = vpack.c.bf16 %v2738_v12, %v2738_v12 }
 0x418   : > { %v2731_v15 = vld [vmem:[#allocation3 + $0xa9] sm:$0xff] }
 0x419   : > { %v2635_v6 = vld [vmem:[#allocation3 + $0xa8] sm:$0xff]  ;;  %2602 = vst.msk [vmem:[#allocation3 + $0xb1] sm:$0xff] %vm226_vm0, %v2526_v29  ;;  %v2536_v5 = vmax.f32 %v2491_v58, 0.0  ;;  %v2763_v39 = vpack.c.bf16 %v2731_v15, %v2731_v15  ;;  %v2768_v58 = vpack.c.bf16 %v2736_v25, %v2736_v25 }
 0x41a   : > { %v6439_v44 = vpack.c.bf16 %v2635_v6, %v2635_v6  ;;  %v2645_v28 = vld [vmem:[#allocation3 + $0x120] sm:$0xff] }
 0x41b   : > { %2612 = vst.msk [vmem:[#allocation3 + $0x129] sm:$0xff] %vm226_vm0, %v2536_v5  ;;  %2841 = vrot.lane.b32.xlu0 %v2763_v39, %s5164_s20  ;;  %v6443_v4 = vpack.c.bf16 %v2645_v28, %v2645_v28 }
 0x41c   : > { %v2468_v42 = vpop.f32.mrf.mxu0  ;;  %2699 = vst.msk [vmem:[#allocation5 + $0x38] sm:$0xf] %vm401_vm3, %v6439_v44 }
 0x41d   : > { %v2469_v59 = vadd.f32 %v6302_v37, %v2468_v42  ;;  %2709 = vst.msk [vmem:[#allocation5 + $0x60] sm:$0xf] %vm401_vm3, %v6443_v4  ;;  %v2741_v42 = vld [vmem:[#allocation3 + $0x121] sm:$0xff] }
 0x41e   : > { %v2493_v61 = vpop.f32.mrf.mxu2 }
 0x41f   : > { %v2527_v20 = vmax.f32 %v2469_v59, 0.0  ;;  %v2494_v62 = vadd.f32 %v6302_v37, %v2493_v61  ;;  %v2737_v59 = vld [vmem:[#allocation3 + $0xf1] sm:$0xff] }
 0x420   : > { %v2732_v19 = vld [vmem:[#allocation3 + $0xb1] sm:$0xff] }
 0x421   : > { %2603 = vst.msk [vmem:[#allocation3 + $0xc1] sm:$0xff] %vm226_vm0, %v2527_v20  ;;  %v2537_v11 = vmax.f32 %v2494_v62, 0.0  ;;  %v2764_v3 = vpack.c.bf16 %v2732_v19, %v2732_v19  ;;  %v2636_v24 = vld [vmem:[#allocation3 + $0xb0] sm:$0xff]  ;;  %v2773_v19 = vpack.c.bf16 %v2741_v42, %v2741_v42 }
 0x422   : > { %v6452_v46 = vpack.c.bf16 %v2636_v24, %v2636_v24  ;;  %v2646_v18 = vld [vmem:[#allocation3 + $0x128] sm:$0xff] }
 0x423   : > { %2613 = vst.msk [vmem:[#allocation3 + $0x139] sm:$0xff] %vm226_vm0, %v2537_v11  ;;  %2843 = vrot.lane.b32.xlu1 %v2764_v3, %s5164_s20  ;;  %v6458_v56 = vpack.c.bf16 %v2646_v18, %v2646_v18  ;;  %v2739_v20 = vld [vmem:[#allocation3 + $0x109] sm:$0xff]  ;;  %v6496_v11 = vpack.c.bf16 %v2737_v59, %v2737_v59 }
 0x424   : > { %v2470_v47 = vpop.f32.mrf.mxu0  ;;  %2700 = vst.msk [vmem:[#allocation5 + $0x3c] sm:$0xf] %vm401_vm3, %v6452_v46  ;;  %v2771_v3 = vpack.c.bf16 %v2739_v20, %v2739_v20  ;;  %v2942_v59 = vld [vmem:[#allocation3 + $0xa] sm:$0xff] }
 0x425   : > { %v2471_v55 = vadd.f32 %v6302_v37, %v2470_v47  ;;  %v2822_v2 = vpop.permute.xlu2 %2821  ;;  %2710 = vst.msk [vmem:[#allocation5 + $0x64] sm:$0xf] %vm401_vm3, %v6458_v56  ;;  %v2974_v20 = vpack.c.bf16 %v2942_v59, %v2942_v59  ;;  %v2954_v59 = vld [vmem:[#allocation3 + $0x9a] sm:$0xff] }
 0x426   : > { %2913 = vst.msk [vmem:[#allocation5 + $0x10] sm:$0xf] %vm626_vm4, %v2822_v2  ;;  %v2495_v43 = vpop.f32.mrf.mxu2 }
 0x427   : > { %v2528_v40 = vmax.f32 %v2471_v55, 0.0  ;;  %v2496_v14 = vadd.f32 %v6302_v37, %v2495_v43  ;;  %v2740_v43 = vld [vmem:[#allocation3 + $0x111] sm:$0xff] }
 0x428   : > { %v2733_v16 = vld [vmem:[#allocation3 + $0xc1] sm:$0xff] }
 0x429   : > { %v2637_v48 = vld [vmem:[#allocation3 + $0xc0] sm:$0xff]  ;;  %2604 = vst.msk [vmem:[#allocation3 + $0xc9] sm:$0xff] %vm226_vm0, %v2528_v40  ;;  %v2538_v22 = vmax.f32 %v2496_v14, 0.0  ;;  %v2765_v52 = vpack.c.bf16 %v2733_v16, %v2733_v16  ;;  %v2742_v14 = vld [vmem:[#allocation3 + $0x129] sm:$0xff] }
 0x42a   : > { %v6466_v53 = vpack.c.bf16 %v2637_v48, %v2637_v48  ;;  %v2647_v38 = vld [vmem:[#allocation3 + $0x138] sm:$0xff] }
 0x42b   : > { %2614 = vst.msk [vmem:[#allocation3 + $0x141] sm:$0xff] %vm226_vm0, %v2538_v22  ;;  %2849 = vrot.lane.b32.xlu1 %v2767_v21, %s5164_s20  ;;  %2845 = vrot.lane.b32.xlu2 %v2765_v52, %s5164_s20  ;;  %v6471_v57 = vpack.c.bf16 %v2647_v38, %v2647_v38  ;;  %v6510_v22 = vpack.c.bf16 %v2740_v43, %v2740_v43  ;;  %v2743_v12 = vld [vmem:[#allocation3 + $0x139] sm:$0xff] }
 0x42c   : > { %2701 = vst.msk [vmem:[#allocation5 + $0x40] sm:$0xf] %vm401_vm3, %v6466_v53  ;;  %v2774_v21 = vpack.c.bf16 %v2742_v14, %v2742_v14  ;;  %v2945_v43 = vld [vmem:[#allocation3 + $0x32] sm:$0xff]  ;;  %v2975_v14 = vpack.c.bf16 %v2943_v10, %v2943_v10 }
 0x42d   : > { %v2818_v63 = vpop.permute.xlu0 %2817  ;;  %2711 = vst.msk [vmem:[#allocation5 + $0x68] sm:$0xf] %vm401_vm3, %v6471_v57 }
 0x42e   : > { %2911 = vst.msk [vmem:[#allocation5 + $0x8] sm:$0xf] %vm626_vm4, %v2818_v63  ;;  %v2498_v26 = vpop.f32.mrf.mxu2 }
 0x42f   : > { %v2499_v23 = vadd.f32 %v6302_v37, %v2498_v26 }
 0x430   : > { %v2734_v32 = vld [vmem:[#allocation3 + $0xc9] sm:$0xff] }
 0x431   : > { %v2539_v49 = vmax.f32 %v2499_v23, 0.0  ;;  %v6479_v41 = vpack.c.bf16 %v2734_v32, %v2734_v32  ;;  %v2638_v29 = vld [vmem:[#allocation3 + $0xc8] sm:$0xff] }
 0x432   : > { %v6481_v15 = vpack.c.bf16 %v2638_v29, %v2638_v29  ;;  %v2648_v6 = vld [vmem:[#allocation3 + $0x140] sm:$0xff] }
 0x433   : > { %2615 = vst.msk [vmem:[#allocation3 + $0x151] sm:$0xff] %vm226_vm0, %v2539_v49  ;;  %2855 = vrot.lane.b32.xlu1 %v2770_v45, %s5164_s20  ;;  %2847 = vrot.lane.b32.xlu0 %v6479_v41, %s5164_s20  ;;  %v6490_v5 = vpack.c.bf16 %v2648_v6, %v2648_v6  ;;  %v2744_v2 = vld [vmem:[#allocation3 + $0x141] sm:$0xff]  ;;  %v6523_v49 = vpack.c.bf16 %v2743_v12, %v2743_v12 }
 0x434   : > { %2851 = vrot.lane.b32.xlu2 %v2768_v58, %s5164_s20  ;;  %2702 = vst.msk [vmem:[#allocation5 + $0x44] sm:$0xf] %vm401_vm3, %v6481_v15  ;;  %v2776_v48 = vpack.c.bf16 %v2744_v2, %v2744_v2 }
 0x435   : > { %v2820_v39 = vpop.permute.xlu1 %2819  ;;  %2712 = vst.msk [vmem:[#allocation5 + $0x6c] sm:$0xf] %vm401_vm3, %v6490_v5 }
 0x436   : > { %2912 = vst.msk [vmem:[#allocation5 + $0xc] sm:$0xf] %vm626_vm4, %v2820_v39  ;;  %v2500_v28 = vpop.f32.mrf.mxu2 }
 0x437   : > { %v2501_v61 = vadd.f32 %v6302_v37, %v2500_v28 }
 0x439   : > { %v2540_v62 = vmax.f32 %v2501_v61, 0.0 }
 0x43a   : > { %v2649_v24 = vld [vmem:[#allocation3 + $0x150] sm:$0xff] }
 0x43b   : > { %2616 = vst.msk [vmem:[#allocation3 + $0x159] sm:$0xff] %vm226_vm0, %v2540_v62  ;;  %2861 = vrot.lane.b32.xlu1 %v2773_v19, %s5164_s20  ;;  %2853 = vrot.lane.b32.xlu0 %v6496_v11, %s5164_s20  ;;  %v6502_v18 = vpack.c.bf16 %v2649_v24, %v2649_v24  ;;  %v2745_v25 = vld [vmem:[#allocation3 + $0x151] sm:$0xff]  ;;  %v2941_v24 = vld [vmem:[#allocation3 + $0x2] sm:$0xff] }
 0x43c   : > { %2857 = vrot.lane.b32.xlu2 %v2771_v3, %s5164_s20  ;;  %v2777_v45 = vpack.c.bf16 %v2745_v25, %v2745_v25  ;;  %v2973_v2 = vpack.c.bf16 %v2941_v24, %v2941_v24  ;;  %v2947_v25 = vld [vmem:[#allocation3 + $0x4a] sm:$0xff] }
 0x43d   : > { %v2828_v47 = vpop.permute.xlu2 %2827  ;;  %2713 = vst.msk [vmem:[#allocation5 + $0x70] sm:$0xf] %vm401_vm3, %v6502_v18 }
 0x43e   : > { %2916 = vst.msk [vmem:[#allocation5 + $0x1c] sm:$0xf] %vm626_vm4, %v2828_v47  ;;  %v2503_v55 = vpop.f32.mrf.mxu2 }
 0x43f   : > { %v2504_v40 = vadd.f32 %v6302_v37, %v2503_v55 }
 0x441   : > { %v2541_v16 = vmax.f32 %v2504_v40, 0.0  ;;  %v2977_v40 = vpack.c.bf16 %v2945_v43, %v2945_v43  ;;  %v2955_v43 = vld [vmem:[#allocation3 + $0xaa] sm:$0xff] }
 0x442   : > { %v2650_v52 = vld [vmem:[#allocation3 + $0x158] sm:$0xff] }
 0x443   : > { %2617 = vst.msk [vmem:[#allocation3 + $0x169] sm:$0xff] %vm226_vm0, %v2541_v16  ;;  %2867 = vrot.lane.b32.xlu1 %v2776_v48, %s5164_s20  ;;  %2859 = vrot.lane.b32.xlu0 %v6510_v22, %s5164_s20  ;;  %v6517_v38 = vpack.c.bf16 %v2650_v52, %v2650_v52  ;;  %v2746_v42 = vld [vmem:[#allocation3 + $0x159] sm:$0xff]  ;;  %v2944_v48 = vld [vmem:[#allocation3 + $0x22] sm:$0xff] }
 0x444   : > { %2863 = vrot.lane.b32.xlu2 %v2774_v21, %s5164_s20  ;;  %v6535_v61 = vpack.c.bf16 %v2746_v42, %v2746_v42  ;;  %v2948_v21 = vld [vmem:[#allocation3 + $0x52] sm:$0xff]  ;;  %v2946_v52 = vld [vmem:[#allocation3 + $0x3a] sm:$0xff]  ;;  %v2950_v42 = vld [vmem:[#allocation3 + $0x6a] sm:$0xff] }
 0x445   : > { %v2824_v63 = vpop.permute.xlu0 %2823  ;;  %2714 = vst.msk [vmem:[#allocation5 + $0x74] sm:$0xf] %vm401_vm3, %v6517_v38  ;;  %v2978_v12 = vpack.c.bf16 %v2946_v52, %v2946_v52  ;;  %v2958_v52 = vld [vmem:[#allocation3 + $0xca] sm:$0xff] }
 0x446   : > { %2914 = vst.msk [vmem:[#allocation5 + $0x14] sm:$0xf] %vm626_vm4, %v2824_v63  ;;  %v2505_v26 = vpop.f32.mrf.mxu2  ;;  %v6550_v63 = vpack.c.bf16 %v2944_v48, %v2944_v48  ;;  %v2956_v48 = vld [vmem:[#allocation3 + $0xb2] sm:$0xff] }
 0x447   : > { %v2506_v23 = vadd.f32 %v6302_v37, %v2505_v26  ;;  %v2980_v26 = vpack.c.bf16 %v2948_v21, %v2948_v21  ;;  %v2960_v21 = vld [vmem:[#allocation3 + $0xe2] sm:$0xff] }
 0x449   : > { %v2542_v32 = vmax.f32 %v2506_v23, 0.0 }
 0x44a   : > { %v2747_v29 = vld [vmem:[#allocation3 + $0x169] sm:$0xff] }
 0x44b   : > { %v2651_v58 = vld [vmem:[#allocation3 + $0x168] sm:$0xff]  ;;  %2618 = vst.msk [vmem:[#allocation3 + $0x171] sm:$0xff] %vm226_vm0, %v2542_v32  ;;  %2865 = vrot.lane.b32.xlu0 %v6523_v49, %s5164_s20  ;;  %v2779_v6 = vpack.c.bf16 %v2747_v29, %v2747_v29  ;;  %v2951_v32 = vld [vmem:[#allocation3 + $0x7a] sm:$0xff]  ;;  %v6557_v29 = vpack.c.bf16 %v2947_v25, %v2947_v25 }
 0x44c   : > { %v6528_v39 = vpack.c.bf16 %v2651_v58, %v2651_v58  ;;  %2869 = vrot.lane.b32.xlu2 %v2777_v45, %s5164_s20  ;;  %v2949_v45 = vld [vmem:[#allocation3 + $0x62] sm:$0xff]  ;;  %v2983_v58 = vpack.c.bf16 %v2951_v32, %v2951_v32  ;;  %v2959_v32 = vld [vmem:[#allocation3 + $0xda] sm:$0xff] }
 0x44d   : > { %v2826_v28 = vpop.permute.xlu1 %2825  ;;  %2873 = vrot.lane.b32.xlu1 %v2779_v6, %s5164_s20  ;;  %v2981_v6 = vpack.c.bf16 %v2949_v45, %v2949_v45  ;;  %v2963_v45 = vld [vmem:[#allocation3 + $0x10a] sm:$0xff] }
 0x44e   : > { %2715 = vst.msk [vmem:[#allocation5 + $0x78] sm:$0xf] %vm401_vm3, %v6528_v39 }
 0x44f   : > { %2915 = vst.msk [vmem:[#allocation5 + $0x18] sm:$0xf] %vm626_vm4, %v2826_v28 }
 0x452   : > { %v2748_v62 = vld [vmem:[#allocation3 + $0x171] sm:$0xff] }
 0x453   : > { %2871 = vrot.lane.b32.xlu0 %v6535_v61, %s5164_s20  ;;  %v2780_v19 = vpack.c.bf16 %v2748_v62, %v2748_v62  ;;  %v2652_v3 = vld [vmem:[#allocation3 + $0x170] sm:$0xff]  ;;  %v6564_v62 = vpack.c.bf16 %v2950_v42, %v2950_v42 }
 0x454   : > { %v6539_v47 = vpack.c.bf16 %v2652_v3, %v2652_v3 }
 0x455   : > { %v2834_v55 = vpop.permute.xlu2 %2833  ;;  %3039 = vrot.lane.b32.xlu1 %v2974_v20, %s5165_s25  ;;  %2875 = vrot.lane.b32.xlu2 %v2780_v19, %s5164_s20  ;;  %v2952_v20 = vld [vmem:[#allocation3 + $0x82] sm:$0xff]  ;;  %v2986_v19 = vpack.c.bf16 %v2954_v59, %v2954_v59 }
 0x456   : > { %2919 = vst.msk [vmem:[#allocation5 + $0x28] sm:$0xf] %vm626_vm4, %v2834_v55  ;;  %v2984_v3 = vpack.c.bf16 %v2952_v20, %v2952_v20  ;;  %v2953_v55 = vld [vmem:[#allocation3 + $0x92] sm:$0xff] }
 0x457   : > { %2716 = vst.msk [vmem:[#allocation5 + $0x7c] sm:$0xf] %vm401_vm3, %v6539_v47  ;;  %v6571_v10 = vpack.c.bf16 %v2953_v55, %v2953_v55 }
 0x45b   : > { %3037 = vrot.lane.b32.xlu0 %v2973_v2, %s5165_s25  ;;  %v2957_v2 = vld [vmem:[#allocation3 + $0xc2] sm:$0xff] }
 0x45d   : > { %v2830_v16 = vpop.permute.xlu0 %2829  ;;  %3045 = vrot.lane.b32.xlu1 %v2977_v40, %s5165_s25  ;;  %3041 = vrot.lane.b32.xlu2 %v2975_v14, %s5165_s25  ;;  %v2989_v40 = vpack.c.bf16 %v2957_v2, %v2957_v2  ;;  %v2987_v14 = vpack.c.bf16 %v2955_v43, %v2955_v43 }
 0x45e   : > { %2917 = vst.msk [vmem:[#allocation5 + $0x20] sm:$0xf] %vm626_vm4, %v2830_v16 }
 0x463   : > { %3043 = vrot.lane.b32.xlu0 %v6550_v63, %s5165_s25 }
 0x465   : > { %v2832_v23 = vpop.permute.xlu1 %2831  ;;  %3051 = vrot.lane.b32.xlu1 %v2980_v26, %s5165_s25  ;;  %3047 = vrot.lane.b32.xlu2 %v2978_v12, %s5165_s25  ;;  %v6578_v26 = vpack.c.bf16 %v2956_v48, %v2956_v48  ;;  %v2992_v12 = vpack.c.bf16 %v2960_v21, %v2960_v21  ;;  %v2969_v48 = vld [vmem:[#allocation3 + $0x152] sm:$0xff]  ;;  %v2967_v21 = vld [vmem:[#allocation3 + $0x13a] sm:$0xff] }
 0x466   : > { %2918 = vst.msk [vmem:[#allocation5 + $0x24] sm:$0xf] %vm626_vm4, %v2832_v23  ;;  %v2990_v23 = vpack.c.bf16 %v2958_v52, %v2958_v52 }
 0x46b   : > { %3049 = vrot.lane.b32.xlu0 %v6557_v29, %s5165_s25 }
 0x46d   : > { %v2840_v28 = vpop.permute.xlu2 %2839  ;;  %3057 = vrot.lane.b32.xlu1 %v2983_v58, %s5165_s25  ;;  %3053 = vrot.lane.b32.xlu2 %v2981_v6, %s5165_s25  ;;  %v2961_v58 = vld [vmem:[#allocation3 + $0xf2] sm:$0xff]  ;;  %v6585_v6 = vpack.c.bf16 %v2959_v32, %v2959_v32 }
 0x46e   : > { %2922 = vst.msk [vmem:[#allocation5 + $0x34] sm:$0xf] %vm626_vm4, %v2840_v28  ;;  %v2995_v28 = vpack.c.bf16 %v2963_v45, %v2963_v45  ;;  %v2993_v42 = vpack.c.bf16 %v2961_v58, %v2961_v58  ;;  %v2968_v45 = vld [vmem:[#allocation3 + $0x142] sm:$0xff]  ;;  %v2972_v58 = vld [vmem:[#allocation3 + $0x172] sm:$0xff] }
 0x473   : > { %3055 = vrot.lane.b32.xlu0 %v6564_v62, %s5165_s25 }
 0x475   : > { %v2836_v24 = vpop.permute.xlu0 %2835  ;;  %3063 = vrot.lane.b32.xlu1 %v2986_v19, %s5165_s25  ;;  %3059 = vrot.lane.b32.xlu2 %v2984_v3, %s5165_s25  ;;  %v2962_v19 = vld [vmem:[#allocation3 + $0xfa] sm:$0xff]  ;;  %v2966_v3 = vld [vmem:[#allocation3 + $0x12a] sm:$0xff] }
 0x476   : > { %2920 = vst.msk [vmem:[#allocation5 + $0x2c] sm:$0xf] %vm626_vm4, %v2836_v24  ;;  %v2964_v24 = vld [vmem:[#allocation3 + $0x112] sm:$0xff]  ;;  %v6593_v55 = vpack.c.bf16 %v2962_v19, %v2962_v19  ;;  %v2998_v2 = vpack.c.bf16 %v2966_v3, %v2966_v3 }
 0x477   : > { %v2996_v43 = vpack.c.bf16 %v2964_v24, %v2964_v24 }
 0x47b   : > { %3061 = vrot.lane.b32.xlu0 %v6571_v10, %s5165_s25 }
 0x47d   : > { %v2838_v16 = vpop.permute.xlu1 %2837  ;;  %3069 = vrot.lane.b32.xlu1 %v2989_v40, %s5165_s25  ;;  %3065 = vrot.lane.b32.xlu2 %v2987_v14, %s5165_s25 }
 0x47e   : > { %2921 = vst.msk [vmem:[#allocation5 + $0x30] sm:$0xf] %vm626_vm4, %v2838_v16  ;;  %v2965_v16 = vld [vmem:[#allocation3 + $0x122] sm:$0xff] }
 0x47f   : > { %v6601_v52 = vpack.c.bf16 %v2965_v16, %v2965_v16 }
 0x483   : > { %3067 = vrot.lane.b32.xlu0 %v6578_v26, %s5165_s25 }
 0x485   : > { %v2846_v25 = vpop.permute.xlu2 %2845  ;;  %3075 = vrot.lane.b32.xlu1 %v2992_v12, %s5165_s25  ;;  %3071 = vrot.lane.b32.xlu2 %v2990_v23, %s5165_s25  ;;  %v3001_v12 = vpack.c.bf16 %v2969_v48, %v2969_v48  ;;  %v6605_v23 = vpack.c.bf16 %v2967_v21, %v2967_v21 }
 0x486   : > { %2925 = vst.msk [vmem:[#allocation5 + $0x40] sm:$0xf] %vm626_vm4, %v2846_v25 }
 0x48b   : > { %3073 = vrot.lane.b32.xlu0 %v6585_v6, %s5165_s25 }
 0x48d   : > { %v2842_v59 = vpop.permute.xlu0 %2841  ;;  %3081 = vrot.lane.b32.xlu1 %v2995_v28, %s5165_s25  ;;  %3077 = vrot.lane.b32.xlu2 %v2993_v42, %s5165_s25  ;;  %v2970_v28 = vld [vmem:[#allocation3 + $0x15a] sm:$0xff]  ;;  %v6612_v42 = vpack.c.bf16 %v2968_v45, %v2968_v45 }
 0x48e   : > { %2923 = vst.msk [vmem:[#allocation5 + $0x38] sm:$0xf] %vm626_vm4, %v2842_v59  ;;  %v2852_v20 = vpop.permute.xlu2 %2851  ;;  %v3004_v59 = vpack.c.bf16 %v2972_v58, %v2972_v58 }
 0x48f   : > { %2928 = vst.msk [vmem:[#allocation5 + $0x4c] sm:$0xf] %vm626_vm4, %v2852_v20  ;;  %v3002_v20 = vpack.c.bf16 %v2970_v28, %v2970_v28 }
 0x493   : > { %3079 = vrot.lane.b32.xlu0 %v6593_v55, %s5165_s25 }
 0x495   : > { %v2844_v40 = vpop.permute.xlu1 %2843  ;;  %3087 = vrot.lane.b32.xlu1 %v2998_v2, %s5165_s25  ;;  %3083 = vrot.lane.b32.xlu2 %v2996_v43, %s5165_s25  ;;  %v2971_v2 = vld [vmem:[#allocation3 + $0x16a] sm:$0xff] }
 0x496   : > { %2924 = vst.msk [vmem:[#allocation5 + $0x3c] sm:$0xf] %vm626_vm4, %v2844_v40  ;;  %v2858_v14 = vpop.permute.xlu2 %2857  ;;  %v3003_v43 = vpack.c.bf16 %v2971_v2, %v2971_v2  ;;  %v3390_v2 = vld [vmem:[#allocation3 + $0x21] sm:$0xff] }
 0x497   : > { %2931 = vst.msk [vmem:[#allocation5 + $0x58] sm:$0xf] %vm626_vm4, %v2858_v14 }
 0x49b   : > { %3085 = vrot.lane.b32.xlu0 %v6601_v52, %s5165_s25 }
 0x49d   : > { %v2850_v25 = vpop.permute.xlu1 %2849  ;;  %3093 = vrot.lane.b32.xlu1 %v3001_v12, %s5165_s25  ;;  %3089 = vrot.lane.b32.xlu2 %v6605_v23, %s5165_s25 }
 0x49e   : > { %2927 = vst.msk [vmem:[#allocation5 + $0x48] sm:$0xf] %vm626_vm4, %v2850_v25  ;;  %v2864_v32 = vpop.permute.xlu2 %2863 }
 0x49f   : > { %2934 = vst.msk [vmem:[#allocation5 + $0x64] sm:$0xf] %vm626_vm4, %v2864_v32 }
 0x4a3   : > { %3091 = vrot.lane.b32.xlu0 %v6612_v42, %s5165_s25 }
 0x4a5   : > { %v2856_v19 = vpop.permute.xlu1 %2855  ;;  %v2848_v3 = vpop.permute.xlu0 %2847  ;;  %3099 = vrot.lane.b32.xlu1 %v3004_v59, %s5165_s25  ;;  %3095 = vrot.lane.b32.xlu2 %v3002_v20, %s5165_s25 }
 0x4a6   : > { %2930 = vst.msk [vmem:[#allocation5 + $0x54] sm:$0xf] %vm626_vm4, %v2856_v19  ;;  %v2870_v24 = vpop.permute.xlu2 %2869 }
 0x4a7   : > { %2926 = vst.msk [vmem:[#allocation5 + $0x44] sm:$0xf] %vm626_vm4, %v2848_v3 }
 0x4a8   : > { %2937 = vst.msk [vmem:[#allocation5 + $0x70] sm:$0xf] %vm626_vm4, %v2870_v24  ;;  %v3392_v24 = vld [vmem:[#allocation3 + $0x39] sm:$0xff] }
 0x4ab   : > { %3097 = vrot.lane.b32.xlu0 %v3003_v43, %s5165_s25 }
 0x4ad   : > { %v2862_v40 = vpop.permute.xlu1 %2861  ;;  %v2854_v14 = vpop.permute.xlu0 %2853  ;;  %3265 = vrot.lane.b32.xlu1 %v6324_v30, %s5166_s26  ;;  %3261 = vrot.lane.b32.xlu2 %v6309_v27, %s5166_s26 }
 0x4ae   : > { %2933 = vst.msk [vmem:[#allocation5 + $0x60] sm:$0xf] %vm626_vm4, %v2862_v40  ;;  %v3422_v40 = vpack.c.bf16 %v3390_v2, %v3390_v2  ;;  %v3408_v2 = vld [vmem:[#allocation3 + $0xf9] sm:$0xff] }
 0x4af   : > { %2929 = vst.msk [vmem:[#allocation5 + $0x50] sm:$0xf] %vm626_vm4, %v2854_v14  ;;  %v2876_v16 = vpop.permute.xlu2 %2875 }
 0x4b0   : > { %2940 = vst.msk [vmem:[#allocation5 + $0x7c] sm:$0xf] %vm626_vm4, %v2876_v16  ;;  %v3391_v16 = vld [vmem:[#allocation3 + $0x31] sm:$0xff] }
 0x4b3   : > { %3263 = vrot.lane.b32.xlu0 %v6317_v8, %s5166_s26 }
 0x4b5   : > { %v2868_v48 = vpop.permute.xlu1 %2867  ;;  %v2860_v21 = vpop.permute.xlu0 %2859  ;;  %3271 = vrot.lane.b32.xlu1 %v6346_v31, %s5166_s26  ;;  %3267 = vrot.lane.b32.xlu2 %v6331_v35, %s5166_s26 }
 0x4b6   : > { %2936 = vst.msk [vmem:[#allocation5 + $0x6c] sm:$0xf] %vm626_vm4, %v2868_v48  ;;  %v2508_v31 = vpop.f32.mrf.mxu2 }
 0x4b7   : > { %2932 = vst.msk [vmem:[#allocation5 + $0x5c] sm:$0xf] %vm626_vm4, %v2860_v21  ;;  %v3042_v27 = vpop.permute.xlu2 %3041 }
 0x4b8   : > { %3135 = vst.msk [vmem:[#allocation5 + $0x8] sm:$0xf] %vm851_vm5, %v3042_v27  ;;  %v3395_v27 = vld [vmem:[#allocation3 + $0x61] sm:$0xff] }
 0x4bb   : > { %3269 = vrot.lane.b32.xlu0 %v6338_v7, %s5166_s26  ;;  %v2509_v7 = vadd.f32 %v6302_v37, %v2508_v31 }
 0x4bd   : > { %v2866_v30 = vpop.permute.xlu0 %2865  ;;  %3277 = vrot.lane.b32.xlu1 %v6382_v50, %s5166_s26  ;;  %3273 = vrot.lane.b32.xlu2 %v6355_v1, %s5166_s26  ;;  %v2543_v1 = vmax.f32 %v2509_v7, 0.0 }
 0x4be   : > { %2935 = vst.msk [vmem:[#allocation5 + $0x68] sm:$0xf] %vm626_vm4, %v2866_v30  ;;  %v3393_v30 = vld [vmem:[#allocation3 + $0x49] sm:$0xff] }
 0x4bf   : > { %v2874_v8 = vpop.permute.xlu1 %2873  ;;  %v3048_v35 = vpop.permute.xlu2 %3047  ;;  %2619 = vst.msk [vmem:[#allocation3 + $0x181] sm:$0xff] %vm226_vm0, %v2543_v1  ;;  %v6736_v31 = vpack.c.bf16 %v3393_v30, %v3393_v30 }
 0x4c0   : > { %2939 = vst.msk [vmem:[#allocation5 + $0x78] sm:$0xf] %vm626_vm4, %v2874_v8  ;;  %v6730_v8 = vpack.c.bf16 %v3391_v16, %v3391_v16 }
 0x4c1   : > { %3138 = vst.msk [vmem:[#allocation5 + $0x14] sm:$0xf] %vm851_vm5, %v3048_v35  ;;  %v6734_v35 = vpack.c.bf16 %v3395_v27, %v3395_v27 }
 0x4c3   : > { %3275 = vrot.lane.b32.xlu0 %v6368_v0, %s5166_s26  ;;  %v2510_v0 = vpop.f32.mrf.mxu2 }
 0x4c5   : > { %v2872_v12 = vpop.permute.xlu0 %2871  ;;  %3283 = vrot.lane.b32.xlu1 %v6424_v13, %s5166_s26  ;;  %3279 = vrot.lane.b32.xlu2 %v6397_v9, %s5166_s26  ;;  %v2511_v13 = vadd.f32 %v6302_v37, %v2510_v0  ;;  %v3396_v0 = vld [vmem:[#allocation3 + $0x69] sm:$0xff] }
 0x4c6   : > { %2938 = vst.msk [vmem:[#allocation5 + $0x74] sm:$0xf] %vm626_vm4, %v2872_v12  ;;  %v3195_v59 = vld [vmem:[#allocation3 + $0x180] sm:$0xff]  ;;  %v3394_v12 = vld [vmem:[#allocation3 + $0x51] sm:$0xff] }
 0x4c7   : > { %v3040_v50 = vpop.permute.xlu1 %3039  ;;  %v3054_v25 = vpop.permute.xlu2 %3053  ;;  %v2544_v9 = vmax.f32 %v2511_v13, 0.0  ;;  %v3227_v20 = vpack.c.bf16 %v3195_v59, %v3195_v59  ;;  %v6745_v13 = vpack.c.bf16 %v3394_v12, %v3394_v12 }
 0x4c8   : > { %3134 = vst.msk [vmem:[#allocation5 + $0x4] sm:$0xf] %vm851_vm5, %v3040_v50 }
 0x4c9   : > { %3141 = vst.msk [vmem:[#allocation5 + $0x20] sm:$0xf] %vm851_vm5, %v3054_v25  ;;  %v3398_v25 = vld [vmem:[#allocation3 + $0x81] sm:$0xff] }
 0x4ca   : > { %2620 = vst.msk [vmem:[#allocation3 + $0x189] sm:$0xff] %vm226_vm0, %v2544_v9  ;;  %v6751_v9 = vpack.c.bf16 %v3396_v0, %v3396_v0 }
 0x4cb   : > { %3281 = vrot.lane.b32.xlu0 %v6411_v33, %s5166_s26 }
 0x4cd   : > { %v3038_v32 = vpop.permute.xlu0 %3037  ;;  %3289 = vrot.lane.b32.xlu1 %v6466_v53, %s5166_s26  ;;  %3285 = vrot.lane.b32.xlu2 %v6439_v44, %s5166_s26 }
 0x4ce   : > { %3133 = vst.msk [vmem:[#allocation5] sm:$0xf] %vm851_vm5, %v3038_v32  ;;  %v6749_v32 = vpack.c.bf16 %v3398_v25, %v3398_v25 }
 0x4cf   : > { %v3046_v45 = vpop.permute.xlu1 %3045  ;;  %v3060_v58 = vpop.permute.xlu2 %3059 }
 0x4d0   : > { %3137 = vst.msk [vmem:[#allocation5 + $0x10] sm:$0xf] %vm851_vm5, %v3046_v45 }
 0x4d1   : > { %3144 = vst.msk [vmem:[#allocation5 + $0x2c] sm:$0xf] %vm851_vm5, %v3060_v58  ;;  %v3397_v58 = vld [vmem:[#allocation3 + $0x79] sm:$0xff] }
 0x4d3   : > { %3287 = vrot.lane.b32.xlu0 %v6452_v46, %s5166_s26 }
 0x4d5   : > { %v3044_v37 = vpop.permute.xlu0 %3043  ;;  %3295 = vrot.lane.b32.xlu1 %v6374_v60, %s5166_s26  ;;  %3291 = vrot.lane.b32.xlu2 %v6481_v15, %s5166_s26 }
 0x4d6   : > { %3136 = vst.msk [vmem:[#allocation5 + $0xc] sm:$0xf] %vm851_vm5, %v3044_v37 }
 0x4d7   : > { %v3052_v33 = vpop.permute.xlu1 %3051  ;;  %v3066_v44 = vpop.permute.xlu2 %3065 }
 0x4d8   : > { %3140 = vst.msk [vmem:[#allocation5 + $0x1c] sm:$0xf] %vm851_vm5, %v3052_v33 }
 0x4d9   : > { %3147 = vst.msk [vmem:[#allocation5 + $0x38] sm:$0xf] %vm851_vm5, %v3066_v44  ;;  %v3401_v44 = vld [vmem:[#allocation3 + $0xa9] sm:$0xff] }
 0x4db   : > { %3293 = vrot.lane.b32.xlu0 %v6359_v51, %s5166_s26 }
 0x4dd   : > { %v3050_v53 = vpop.permute.xlu0 %3049  ;;  %3301 = vrot.lane.b32.xlu1 %v6415_v36, %s5166_s26  ;;  %3297 = vrot.lane.b32.xlu2 %v6386_v54, %s5166_s26 }
 0x4de   : > { %3139 = vst.msk [vmem:[#allocation5 + $0x18] sm:$0xf] %vm851_vm5, %v3050_v53  ;;  %v3399_v53 = vld [vmem:[#allocation3 + $0x91] sm:$0xff] }
 0x4df   : > { %v3058_v60 = vpop.permute.xlu1 %3057  ;;  %v3072_v46 = vpop.permute.xlu2 %3071 }
 0x4e0   : > { %3143 = vst.msk [vmem:[#allocation5 + $0x28] sm:$0xf] %vm851_vm5, %v3058_v60  ;;  %v6760_v60 = vpack.c.bf16 %v3397_v58, %v3397_v58 }
 0x4e1   : > { %3150 = vst.msk [vmem:[#allocation5 + $0x44] sm:$0xf] %vm851_vm5, %v3072_v46  ;;  %v3433_v46 = vpack.c.bf16 %v3401_v44, %v3401_v44  ;;  %v3417_v44 = vld [vmem:[#allocation3 + $0x169] sm:$0xff] }
 0x4e3   : > { %3299 = vrot.lane.b32.xlu0 %v6400_v17, %s5166_s26 }
 0x4e5   : > { %v3056_v15 = vpop.permute.xlu0 %3055  ;;  %3307 = vrot.lane.b32.xlu1 %v6458_v56, %s5166_s26  ;;  %3303 = vrot.lane.b32.xlu2 %v6430_v34, %s5166_s26 }
 0x4e6   : > { %3142 = vst.msk [vmem:[#allocation5 + $0x24] sm:$0xf] %vm851_vm5, %v3056_v15  ;;  %v3431_v15 = vpack.c.bf16 %v3399_v53, %v3399_v53 }
 0x4e7   : > { %v3064_v51 = vpop.permute.xlu1 %3063  ;;  %v3078_v36 = vpop.permute.xlu2 %3077 }
 0x4e8   : > { %3146 = vst.msk [vmem:[#allocation5 + $0x34] sm:$0xf] %vm851_vm5, %v3064_v51 }
 0x4e9   : > { %3153 = vst.msk [vmem:[#allocation5 + $0x50] sm:$0xf] %vm851_vm5, %v3078_v36  ;;  %v3400_v36 = vld [vmem:[#allocation3 + $0x99] sm:$0xff] }
 0x4eb   : > { %3305 = vrot.lane.b32.xlu0 %v6443_v4, %s5166_s26 }
 0x4ed   : > { %v3062_v28 = vpop.permute.xlu0 %3061  ;;  %3313 = vrot.lane.b32.xlu1 %v6502_v18, %s5166_s26  ;;  %3309 = vrot.lane.b32.xlu2 %v6471_v57, %s5166_s26  ;;  %v3389_v18 = vld [vmem:[#allocation3 + $0x19] sm:$0xff] }
 0x4ee   : > { %3145 = vst.msk [vmem:[#allocation5 + $0x30] sm:$0xf] %vm851_vm5, %v3062_v28 }
 0x4ef   : > { %v3070_v17 = vpop.permute.xlu1 %3069  ;;  %v3084_v34 = vpop.permute.xlu2 %3083 }
 0x4f0   : > { %3149 = vst.msk [vmem:[#allocation5 + $0x40] sm:$0xf] %vm851_vm5, %v3070_v17 }
 0x4f1   : > { %3156 = vst.msk [vmem:[#allocation5 + $0x5c] sm:$0xf] %vm851_vm5, %v3084_v34  ;;  %v3402_v34 = vld [vmem:[#allocation3 + $0xb1] sm:$0xff] }
 0x4f3   : > { %3311 = vrot.lane.b32.xlu0 %v6490_v5, %s5166_s26  ;;  %v3421_v5 = vpack.c.bf16 %v3389_v18, %v3389_v18  ;;  %v3403_v18 = vld [vmem:[#allocation3 + $0xc1] sm:$0xff] }
 0x4f5   : > { %v3068_v56 = vpop.permute.xlu0 %3067  ;;  %3319 = vrot.lane.b32.xlu1 %v6539_v47, %s5166_s26  ;;  %3315 = vrot.lane.b32.xlu2 %v6517_v38, %s5166_s26  ;;  %v3196_v38 = vld [vmem:[#allocation3 + $0x188] sm:$0xff] }
 0x4f6   : > { %3148 = vst.msk [vmem:[#allocation5 + $0x3c] sm:$0xf] %vm851_vm5, %v3068_v56  ;;  %v3228_v43 = vpack.c.bf16 %v3196_v38, %v3196_v38  ;;  %v3432_v56 = vpack.c.bf16 %v3400_v36, %v3400_v36 }
 0x4f7   : > { %v3076_v4 = vpop.permute.xlu1 %3075  ;;  %v3090_v57 = vpop.permute.xlu2 %3089 }
 0x4f8   : > { %3152 = vst.msk [vmem:[#allocation5 + $0x4c] sm:$0xf] %vm851_vm5, %v3076_v4  ;;  %v3434_v4 = vpack.c.bf16 %v3402_v34, %v3402_v34 }
 0x4f9   : > { %3159 = vst.msk [vmem:[#allocation5 + $0x68] sm:$0xf] %vm851_vm5, %v3090_v57 }
 0x4fb   : > { %3317 = vrot.lane.b32.xlu0 %v6528_v39, %s5166_s26  ;;  %v6722_v39 = vpack.c.bf16 %v3392_v24, %v3392_v24 }
 0x4fd   : > { %v3074_v19 = vpop.permute.xlu0 %3073  ;;  %3485 = vrot.lane.b32.xlu1 %v3421_v5, %s5167_s27  ;;  %3321 = vrot.lane.b32.xlu2 %v3227_v20, %s5166_s26  ;;  %v3405_v20 = vld [vmem:[#allocation3 + $0xd9] sm:$0xff] }
 0x4fe   : > { %3151 = vst.msk [vmem:[#allocation5 + $0x48] sm:$0xf] %vm851_vm5, %v3074_v19  ;;  %v3435_v19 = vpack.c.bf16 %v3403_v18, %v3403_v18  ;;  %v3437_v38 = vpack.c.bf16 %v3405_v20, %v3405_v20 }
 0x4ff   : > { %v3082_v47 = vpop.permute.xlu1 %3081  ;;  %v3096_v3 = vpop.permute.xlu2 %3095 }
 0x500   : > { %3155 = vst.msk [vmem:[#allocation5 + $0x58] sm:$0xf] %vm851_vm5, %v3082_v47 }
 0x501   : > { %3162 = vst.msk [vmem:[#allocation5 + $0x74] sm:$0xf] %vm851_vm5, %v3096_v3 }
 0x503   : > { %3323 = vrot.lane.b32.xlu0 %v3228_v43, %s5166_s26 }
 0x505   : > { %v3080_v14 = vpop.permute.xlu0 %3079  ;;  %3491 = vrot.lane.b32.xlu1 %v6722_v39, %s5167_s27  ;;  %3487 = vrot.lane.b32.xlu2 %v3422_v40, %s5167_s27  ;;  %v6784_v40 = vpack.c.bf16 %v3408_v2, %v3408_v2 }
 0x506   : > { %3154 = vst.msk [vmem:[#allocation5 + $0x54] sm:$0xf] %vm851_vm5, %v3080_v14 }
 0x507   : > { %v3088_v48 = vpop.permute.xlu1 %3087  ;;  %v3262_v21 = vpop.permute.xlu2 %3261 }
 0x508   : > { %3158 = vst.msk [vmem:[#allocation5 + $0x64] sm:$0xf] %vm851_vm5, %v3088_v48 }
 0x509   : > { %3357 = vst.msk [vmem:[#allocation5] sm:$0xf] %vm1076_vm6, %v3262_v21  ;;  %v3411_v21 = vld [vmem:[#allocation3 + $0x121] sm:$0xff] }
 0x50a   : > { %v6797_v30 = vpack.c.bf16 %v3411_v21, %v3411_v21 }
 0x50b   : > { %3489 = vrot.lane.b32.xlu0 %v6730_v8, %s5167_s27 }
 0x50d   : > { %v3086_v7 = vpop.permute.xlu0 %3085  ;;  %3497 = vrot.lane.b32.xlu1 %v6734_v35, %s5167_s27  ;;  %3493 = vrot.lane.b32.xlu2 %v6736_v31, %s5167_s27 }
 0x50e   : > { %3157 = vst.msk [vmem:[#allocation5 + $0x60] sm:$0xf] %vm851_vm5, %v3086_v7  ;;  %v3412_v7 = vld [vmem:[#allocation3 + $0x129] sm:$0xff] }
 0x50f   : > { %v3094_v1 = vpop.permute.xlu1 %3093  ;;  %v3268_v50 = vpop.permute.xlu2 %3267  ;;  %v6806_v25 = vpack.c.bf16 %v3412_v7, %v3412_v7 }
 0x510   : > { %3161 = vst.msk [vmem:[#allocation5 + $0x70] sm:$0xf] %vm851_vm5, %v3094_v1 }
 0x511   : > { %3360 = vst.msk [vmem:[#allocation5 + $0xc] sm:$0xf] %vm1076_vm6, %v3268_v50  ;;  %v3414_v50 = vld [vmem:[#allocation3 + $0x141] sm:$0xff] }
 0x512   : > { %v6810_v0 = vpack.c.bf16 %v3414_v50, %v3414_v50 }
 0x513   : > { %3495 = vrot.lane.b32.xlu0 %v6745_v13, %s5167_s27 }
 0x515   : > { %v3092_v45 = vpop.permute.xlu0 %3091  ;;  %3503 = vrot.lane.b32.xlu1 %v6749_v32, %s5167_s27  ;;  %3499 = vrot.lane.b32.xlu2 %v6751_v9, %s5167_s27 }
 0x516   : > { %3160 = vst.msk [vmem:[#allocation5 + $0x6c] sm:$0xf] %vm851_vm5, %v3092_v45  ;;  %v3415_v45 = vld [vmem:[#allocation3 + $0x151] sm:$0xff] }
 0x517   : > { %v3100_v37 = vpop.permute.xlu1 %3099  ;;  %v3274_v33 = vpop.permute.xlu2 %3273  ;;  %v6819_v53 = vpack.c.bf16 %v3415_v45, %v3415_v45  ;;  %v3625_v45 = vld [vmem:[#allocation3 + $0xaa] sm:$0xff] }
 0x518   : > { %3164 = vst.msk [vmem:[#allocation5 + $0x7c] sm:$0xf] %vm851_vm5, %v3100_v37 }
 0x519   : > { %3363 = vst.msk [vmem:[#allocation5 + $0x18] sm:$0xf] %vm1076_vm6, %v3274_v33  ;;  %v3419_v33 = vld [vmem:[#allocation3 + $0x181] sm:$0xff] }
 0x51b   : > { %3501 = vrot.lane.b32.xlu0 %v6760_v60, %s5167_s27 }
 0x51d   : > { %v3098_v51 = vpop.permute.xlu0 %3097  ;;  %3509 = vrot.lane.b32.xlu1 %v3433_v46, %s5167_s27  ;;  %3505 = vrot.lane.b32.xlu2 %v3431_v15, %s5167_s27  ;;  %v6823_v46 = vpack.c.bf16 %v3417_v44, %v3417_v44  ;;  %v6890_v44 = vpack.c.bf16 %v3625_v45, %v3625_v45 }
 0x51e   : > { %3163 = vst.msk [vmem:[#allocation5 + $0x78] sm:$0xf] %vm851_vm5, %v3098_v51  ;;  %v3418_v51 = vld [vmem:[#allocation3 + $0x171] sm:$0xff] }
 0x51f   : > { %v3266_v28 = vpop.permute.xlu1 %3265  ;;  %v3280_v17 = vpop.permute.xlu2 %3279  ;;  %v6831_v34 = vpack.c.bf16 %v3418_v51, %v3418_v51 }
 0x520   : > { %3359 = vst.msk [vmem:[#allocation5 + $0x8] sm:$0xf] %vm1076_vm6, %v3266_v28 }
 0x521   : > { %3366 = vst.msk [vmem:[#allocation5 + $0x24] sm:$0xf] %vm1076_vm6, %v3280_v17  ;;  %v3420_v17 = vld [vmem:[#allocation3 + $0x189] sm:$0xff] }
 0x523   : > { %3507 = vrot.lane.b32.xlu0 %v3432_v56, %s5167_s27  ;;  %v3452_v56 = vpack.c.bf16 %v3420_v17, %v3420_v17 }
 0x525   : > { %v3264_v57 = vpop.permute.xlu0 %3263  ;;  %3515 = vrot.lane.b32.xlu1 %v6479_v41, %s5167_s27  ;;  %3511 = vrot.lane.b32.xlu2 %v3434_v4, %s5167_s27  ;;  %v3406_v41 = vld [vmem:[#allocation3 + $0xe1] sm:$0xff] }
 0x526   : > { %3358 = vst.msk [vmem:[#allocation5 + $0x4] sm:$0xf] %vm1076_vm6, %v3264_v57  ;;  %v3438_v43 = vpack.c.bf16 %v3406_v41, %v3406_v41  ;;  %v3613_v57 = vld [vmem:[#allocation3 + $0x1a] sm:$0xff] }
 0x527   : > { %v3272_v59 = vpop.permute.xlu1 %3271  ;;  %v3286_v5 = vpop.permute.xlu2 %3285  ;;  %v3645_v20 = vpack.c.bf16 %v3613_v57, %v3613_v57 }
 0x528   : > { %3362 = vst.msk [vmem:[#allocation5 + $0x14] sm:$0xf] %vm1076_vm6, %v3272_v59 }
 0x529   : > { %3369 = vst.msk [vmem:[#allocation5 + $0x30] sm:$0xf] %vm1076_vm6, %v3286_v5  ;;  %v3615_v5 = vld [vmem:[#allocation3 + $0x32] sm:$0xff] }
 0x52b   : > { %3513 = vrot.lane.b32.xlu0 %v3435_v19, %s5167_s27  ;;  %v6842_v19 = vpack.c.bf16 %v3615_v5, %v3615_v5 }
 0x52d   : > { %v3270_v47 = vpop.permute.xlu0 %3269  ;;  %3521 = vrot.lane.b32.xlu1 %v6496_v11, %s5167_s27  ;;  %3517 = vrot.lane.b32.xlu2 %v3437_v38, %s5167_s27  ;;  %v3409_v11 = vld [vmem:[#allocation3 + $0x109] sm:$0xff] }
 0x52e   : > { %3361 = vst.msk [vmem:[#allocation5 + $0x10] sm:$0xf] %vm1076_vm6, %v3270_v47  ;;  %v6793_v27 = vpack.c.bf16 %v3409_v11, %v3409_v11 }
 0x52f   : > { %v3278_v3 = vpop.permute.xlu1 %3277  ;;  %v3292_v24 = vpop.permute.xlu2 %3291 }
 0x530   : > { %3365 = vst.msk [vmem:[#allocation5 + $0x20] sm:$0xf] %vm1076_vm6, %v3278_v3  ;;  %v3618_v3 = vld [vmem:[#allocation3 + $0x52] sm:$0xff] }
 0x531   : > { %3372 = vst.msk [vmem:[#allocation5 + $0x3c] sm:$0xf] %vm1076_vm6, %v3292_v24  ;;  %v6855_v2 = vpack.c.bf16 %v3618_v3, %v3618_v3 }
 0x533   : > { %3519 = vrot.lane.b32.xlu0 %v3438_v43, %s5167_s27  ;;  %v3619_v43 = vld [vmem:[#allocation3 + $0x62] sm:$0xff] }
 0x535   : > { %v3276_v14 = vpop.permute.xlu0 %3275  ;;  %3527 = vrot.lane.b32.xlu1 %v6510_v22, %s5167_s27  ;;  %3523 = vrot.lane.b32.xlu2 %v6784_v40, %s5167_s27 }
 0x536   : > { %3364 = vst.msk [vmem:[#allocation5 + $0x1c] sm:$0xf] %vm1076_vm6, %v3276_v14 }
 0x537   : > { %v3284_v16 = vpop.permute.xlu1 %3283  ;;  %v3298_v48 = vpop.permute.xlu2 %3297 }
 0x538   : > { %3368 = vst.msk [vmem:[#allocation5 + $0x2c] sm:$0xf] %vm1076_vm6, %v3284_v16  ;;  %v3621_v16 = vld [vmem:[#allocation3 + $0x7a] sm:$0xff] }
 0x539   : > { %3375 = vst.msk [vmem:[#allocation5 + $0x48] sm:$0xf] %vm1076_vm6, %v3298_v48  ;;  %v6864_v48 = vpack.c.bf16 %v3619_v43, %v3619_v43  ;;  %v6868_v21 = vpack.c.bf16 %v3621_v16, %v3621_v16 }
 0x53b   : > { %3525 = vrot.lane.b32.xlu0 %v6793_v27, %s5167_s27 }
 0x53d   : > { %v3282_v22 = vpop.permute.xlu0 %3281  ;;  %3533 = vrot.lane.b32.xlu1 %v6523_v49, %s5167_s27  ;;  %3529 = vrot.lane.b32.xlu2 %v6797_v30, %s5167_s27 }
 0x53e   : > { %3367 = vst.msk [vmem:[#allocation5 + $0x28] sm:$0xf] %vm1076_vm6, %v3282_v22  ;;  %v3622_v22 = vld [vmem:[#allocation3 + $0x82] sm:$0xff] }
 0x53f   : > { %v3290_v12 = vpop.permute.xlu1 %3289  ;;  %v3304_v1 = vpop.permute.xlu2 %3303  ;;  %v6877_v50 = vpack.c.bf16 %v3622_v22, %v3622_v22 }
 0x540   : > { %3371 = vst.msk [vmem:[#allocation5 + $0x38] sm:$0xf] %vm1076_vm6, %v3290_v12 }
 0x541   : > { %3378 = vst.msk [vmem:[#allocation5 + $0x54] sm:$0xf] %vm1076_vm6, %v3304_v1  ;;  %v3624_v1 = vld [vmem:[#allocation3 + $0x9a] sm:$0xff] }
 0x543   : > { %3531 = vrot.lane.b32.xlu0 %v6806_v25, %s5167_s27 }
 0x545   : > { %v3288_v49 = vpop.permute.xlu0 %3287  ;;  %3539 = vrot.lane.b32.xlu1 %v6535_v61, %s5167_s27  ;;  %3535 = vrot.lane.b32.xlu2 %v6810_v0, %s5167_s27  ;;  %v3451_v61 = vpack.c.bf16 %v3419_v33, %v3419_v33  ;;  %v3627_v33 = vld [vmem:[#allocation3 + $0xc2] sm:$0xff] }
 0x546   : > { %3370 = vst.msk [vmem:[#allocation5 + $0x34] sm:$0xf] %vm1076_vm6, %v3288_v49  ;;  %v6881_v49 = vpack.c.bf16 %v3624_v1, %v3624_v1 }
 0x547   : > { %v3296_v58 = vpop.permute.xlu1 %3295  ;;  %v3310_v37 = vpop.permute.xlu2 %3309 }
 0x548   : > { %3374 = vst.msk [vmem:[#allocation5 + $0x44] sm:$0xf] %vm1076_vm6, %v3296_v58 }
 0x549   : > { %3381 = vst.msk [vmem:[#allocation5 + $0x60] sm:$0xf] %vm1076_vm6, %v3310_v37 }
 0x54b   : > { %3537 = vrot.lane.b32.xlu0 %v6819_v53, %s5167_s27 }
 0x54d   : > { %v3294_v15 = vpop.permute.xlu0 %3293  ;;  %3545 = vrot.lane.b32.xlu1 %v3451_v61, %s5167_s27  ;;  %3541 = vrot.lane.b32.xlu2 %v6823_v46, %s5167_s27  ;;  %v3659_v61 = vpack.c.bf16 %v3627_v33, %v3627_v33 }
 0x54e   : > { %3373 = vst.msk [vmem:[#allocation5 + $0x40] sm:$0xf] %vm1076_vm6, %v3294_v15  ;;  %v3628_v15 = vld [vmem:[#allocation3 + $0xca] sm:$0xff] }
 0x54f   : > { %v3302_v36 = vpop.permute.xlu1 %3301  ;;  %v3316_v28 = vpop.permute.xlu2 %3315  ;;  %v3660_v17 = vpack.c.bf16 %v3628_v15, %v3628_v15 }
 0x550   : > { %3377 = vst.msk [vmem:[#allocation5 + $0x50] sm:$0xf] %vm1076_vm6, %v3302_v36 }
 0x551   : > { %3384 = vst.msk [vmem:[#allocation5 + $0x6c] sm:$0xf] %vm1076_vm6, %v3316_v28  ;;  %v3630_v28 = vld [vmem:[#allocation3 + $0xe2] sm:$0xff] }
 0x553   : > { %3543 = vrot.lane.b32.xlu0 %v6831_v34, %s5167_s27 }
 0x555   : > { %v3300_v4 = vpop.permute.xlu0 %3299  ;;  %3711 = vrot.lane.b32.xlu1 %v6550_v63, %s5168_s28  ;;  %3547 = vrot.lane.b32.xlu2 %v3452_v56, %s5167_s27  ;;  %v3616_v63 = vld [vmem:[#allocation3 + $0x3a] sm:$0xff]  ;;  %v3662_v56 = vpack.c.bf16 %v3630_v28, %v3630_v28  ;;  %v3856_v28 = vld [vmem:[#allocation3 + $0x108] sm:$0xff] }
 0x556   : > { %3376 = vst.msk [vmem:[#allocation5 + $0x4c] sm:$0xf] %vm1076_vm6, %v3300_v4  ;;  %v6851_v24 = vpack.c.bf16 %v3616_v63, %v3616_v63 }
 0x557   : > { %v3308_v18 = vpop.permute.xlu1 %3307  ;;  %v3322_v59 = vpop.permute.xlu2 %3321 }
 0x558   : > { %3380 = vst.msk [vmem:[#allocation5 + $0x5c] sm:$0xf] %vm1076_vm6, %v3308_v18 }
 0x559   : > { %3387 = vst.msk [vmem:[#allocation5 + $0x78] sm:$0xf] %vm1076_vm6, %v3322_v59  ;;  %v3633_v59 = vld [vmem:[#allocation3 + $0x10a] sm:$0xff] }
 0x55b   : > { %3709 = vrot.lane.b32.xlu0 %v3645_v20, %s5168_s28  ;;  %v6908_v20 = vpack.c.bf16 %v3633_v59, %v3633_v59 }
 0x55d   : > { %v3306_v38 = vpop.permute.xlu0 %3305  ;;  %3717 = vrot.lane.b32.xlu1 %v6557_v29, %s5168_s28  ;;  %3713 = vrot.lane.b32.xlu2 %v6842_v19, %s5168_s28 }
 0x55e   : > { %3379 = vst.msk [vmem:[#allocation5 + $0x58] sm:$0xf] %vm1076_vm6, %v3306_v38 }
 0x55f   : > { %v3314_v47 = vpop.permute.xlu1 %3313  ;;  %v3488_v41 = vpop.permute.xlu2 %3487 }
 0x560   : > { %3383 = vst.msk [vmem:[#allocation5 + $0x68] sm:$0xf] %vm1076_vm6, %v3314_v47 }
 0x561   : > { %3582 = vst.msk [vmem:[#allocation5 + $0x4] sm:$0xf] %vm1301_vm7, %v3488_v41  ;;  %v3636_v41 = vld [vmem:[#allocation3 + $0x12a] sm:$0xff] }
 0x563   : > { %3715 = vrot.lane.b32.xlu0 %v6851_v24, %s5168_s28 }
 0x565   : > { %v3312_v29 = vpop.permute.xlu0 %3311  ;;  %3723 = vrot.lane.b32.xlu1 %v6564_v62, %s5168_s28  ;;  %3719 = vrot.lane.b32.xlu2 %v6855_v2, %s5168_s28 }
 0x566   : > { %3382 = vst.msk [vmem:[#allocation5 + $0x64] sm:$0xf] %vm1076_vm6, %v3312_v29  ;;  %v6921_v29 = vpack.c.bf16 %v3636_v41, %v3636_v41 }
 0x567   : > { %v3320_v14 = vpop.permute.xlu1 %3319  ;;  %v3494_v11 = vpop.permute.xlu2 %3493 }
 0x568   : > { %3386 = vst.msk [vmem:[#allocation5 + $0x74] sm:$0xf] %vm1076_vm6, %v3320_v14 }
 0x569   : > { %3585 = vst.msk [vmem:[#allocation5 + $0x10] sm:$0xf] %vm1301_vm7, %v3494_v11  ;;  %v4078_v11 = vld [vmem:[#allocation3 + $0xf1] sm:$0xff] }
 0x56a   : > { %v4110_v16 = vpack.c.bf16 %v4078_v11, %v4078_v11 }
 0x56b   : > { %3721 = vrot.lane.b32.xlu0 %v6864_v48, %s5168_s28 }
 0x56d   : > { %v3318_v62 = vpop.permute.xlu0 %3317  ;;  %3729 = vrot.lane.b32.xlu1 %v6571_v10, %s5168_s28  ;;  %3725 = vrot.lane.b32.xlu2 %v6868_v21, %s5168_s28 }
 0x56e   : > { %3385 = vst.msk [vmem:[#allocation5 + $0x70] sm:$0xf] %vm1076_vm6, %v3318_v62 }
 0x56f   : > { %v3486_v7 = vpop.permute.xlu1 %3485  ;;  %v3500_v12 = vpop.permute.xlu2 %3499 }
 0x570   : > { %3581 = vst.msk [vmem:[#allocation5] sm:$0xf] %vm1301_vm7, %v3486_v7 }
 0x571   : > { %3588 = vst.msk [vmem:[#allocation5 + $0x1c] sm:$0xf] %vm1301_vm7, %v3500_v12  ;;  %v4303_v12 = vld [vmem:[#allocation3 + $0xfa] sm:$0xff] }
 0x573   : > { %3727 = vrot.lane.b32.xlu0 %v6877_v50, %s5168_s28 }
 0x575   : > { %v3324_v10 = vpop.permute.xlu0 %3323  ;;  %3735 = vrot.lane.b32.xlu1 %v6578_v26, %s5168_s28  ;;  %3731 = vrot.lane.b32.xlu2 %v6881_v49, %s5168_s28 }
 0x576   : > { %3388 = vst.msk [vmem:[#allocation5 + $0x7c] sm:$0xf] %vm1076_vm6, %v3324_v10 }
 0x577   : > { %v3492_v58 = vpop.permute.xlu1 %3491  ;;  %v3506_v37 = vpop.permute.xlu2 %3505 }
 0x578   : > { %3584 = vst.msk [vmem:[#allocation5 + $0xc] sm:$0xf] %vm1301_vm7, %v3492_v58  ;;  %v3838_v58 = vld [vmem:[#allocation3 + $0x30] sm:$0xff] }
 0x579   : > { %3591 = vst.msk [vmem:[#allocation5 + $0x28] sm:$0xf] %vm1301_vm7, %v3506_v37  ;;  %v3870_v37 = vpack.c.bf16 %v3838_v58, %v3838_v58 }
 0x57b   : > { %3733 = vrot.lane.b32.xlu0 %v6890_v44, %s5168_s28 }
 0x57d   : > { %v3490_v26 = vpop.permute.xlu0 %3489  ;;  %3741 = vrot.lane.b32.xlu1 %v6585_v6, %s5168_s28  ;;  %3737 = vrot.lane.b32.xlu2 %v3659_v61, %s5168_s28  ;;  %v3631_v6 = vld [vmem:[#allocation3 + $0xf2] sm:$0xff] }
 0x57e   : > { %3583 = vst.msk [vmem:[#allocation5 + $0x8] sm:$0xf] %vm1301_vm7, %v3490_v26  ;;  %v3663_v5 = vpack.c.bf16 %v3631_v6, %v3631_v6  ;;  %v4081_v6 = vld [vmem:[#allocation3 + $0x111] sm:$0xff] }
 0x57f   : > { %v3498_v51 = vpop.permute.xlu1 %3497  ;;  %v3512_v36 = vpop.permute.xlu2 %3511 }
 0x580   : > { %3587 = vst.msk [vmem:[#allocation5 + $0x18] sm:$0xf] %vm1301_vm7, %v3498_v51 }
 0x581   : > { %3594 = vst.msk [vmem:[#allocation5 + $0x34] sm:$0xf] %vm1301_vm7, %v3512_v36 }
 0x583   : > { %3739 = vrot.lane.b32.xlu0 %v3660_v17, %s5168_s28  ;;  %v3888_v17 = vpack.c.bf16 %v3856_v28, %v3856_v28  ;;  %v4546_v28 = vld [vmem:[%s7344_s3 + $0x10] sm:$0x3] }
 0x585   : > { %v3496_v4 = vpop.permute.xlu0 %3495  ;;  %3747 = vrot.lane.b32.xlu1 %v6593_v55, %s5168_s28  ;;  %3743 = vrot.lane.b32.xlu2 %v3662_v56, %s5168_s28  ;;  %v3634_v55 = vld [vmem:[#allocation3 + $0x112] sm:$0xff] }
 0x586   : > { %3586 = vst.msk [vmem:[#allocation5 + $0x14] sm:$0xf] %vm1301_vm7, %v3496_v4  ;;  %v6917_v3 = vpack.c.bf16 %v3634_v55, %v3634_v55 }
 0x587   : > { %v3504_v57 = vpop.permute.xlu1 %3503  ;;  %v3518_v18 = vpop.permute.xlu2 %3517 }
 0x588   : > { %3590 = vst.msk [vmem:[#allocation5 + $0x24] sm:$0xf] %vm1301_vm7, %v3504_v57 }
 0x589   : > { %3597 = vst.msk [vmem:[#allocation5 + $0x40] sm:$0xf] %vm1301_vm7, %v3518_v18 }
 0x58b   : > { %3745 = vrot.lane.b32.xlu0 %v3663_v5, %s5168_s28 }
 0x58d   : > { %v3502_v38 = vpop.permute.xlu0 %3501  ;;  %3753 = vrot.lane.b32.xlu1 %v6601_v52, %s5168_s28  ;;  %3749 = vrot.lane.b32.xlu2 %v6908_v20, %s5168_s28 }
 0x58e   : > { %3589 = vst.msk [vmem:[#allocation5 + $0x20] sm:$0xf] %vm1301_vm7, %v3502_v38 }
 0x58f   : > { %v3510_v63 = vpop.permute.xlu1 %3509  ;;  %v3524_v47 = vpop.permute.xlu2 %3523 }
 0x590   : > { %3593 = vst.msk [vmem:[#allocation5 + $0x30] sm:$0xf] %vm1301_vm7, %v3510_v63  ;;  %v3841_v63 = vld [vmem:[#allocation3 + $0x50] sm:$0xff] }
 0x591   : > { %3600 = vst.msk [vmem:[#allocation5 + $0x4c] sm:$0xf] %vm1301_vm7, %v3524_v47 }
 0x593   : > { %3751 = vrot.lane.b32.xlu0 %v6917_v3, %s5168_s28 }
 0x595   : > { %v3508_v52 = vpop.permute.xlu0 %3507  ;;  %3759 = vrot.lane.b32.xlu1 %v6612_v42, %s5168_s28  ;;  %3755 = vrot.lane.b32.xlu2 %v6921_v29, %s5168_s28  ;;  %v3855_v42 = vld [vmem:[#allocation3 + $0xf8] sm:$0xff] }
 0x596   : > { %3592 = vst.msk [vmem:[#allocation5 + $0x2c] sm:$0xf] %vm1301_vm7, %v3508_v52  ;;  %v3887_v1 = vpack.c.bf16 %v3855_v42, %v3855_v42 }
 0x597   : > { %v3516_v43 = vpop.permute.xlu1 %3515  ;;  %v3530_v14 = vpop.permute.xlu2 %3529 }
 0x598   : > { %3596 = vst.msk [vmem:[#allocation5 + $0x3c] sm:$0xf] %vm1301_vm7, %v3516_v43 }
 0x599   : > { %3603 = vst.msk [vmem:[#allocation5 + $0x58] sm:$0xf] %vm1301_vm7, %v3530_v14  ;;  %v3858_v14 = vld [vmem:[#allocation3 + $0x120] sm:$0xff] }
 0x59b   : > { %3757 = vrot.lane.b32.xlu0 %v6605_v23, %s5168_s28  ;;  %v4335_v23 = vpack.c.bf16 %v4303_v12, %v4303_v12 }
 0x59d   : > { %v3514_v62 = vpop.permute.xlu0 %3513  ;;  %4190 = vrot.lane.b32.xlu1 %v4110_v16, %s5170_s30  ;;  %3966 = vrot.lane.b32.xlu2 %v6386_v54, %s5169_s29  ;;  %v3890_v16 = vpack.c.bf16 %v3858_v14, %v3858_v14 }
 0x59e   : > { %3595 = vst.msk [vmem:[#allocation5 + $0x38] sm:$0xf] %vm1301_vm7, %v3514_v62 }
 0x59f   : > { %v3522_v22 = vpop.permute.xlu1 %3521  ;;  %v3536_v7 = vpop.permute.xlu2 %3535 }
 0x5a0   : > { %3599 = vst.msk [vmem:[#allocation5 + $0x48] sm:$0xf] %vm1301_vm7, %v3522_v22 }
 0x5a1   : > { %3606 = vst.msk [vmem:[#allocation5 + $0x64] sm:$0xf] %vm1301_vm7, %v3536_v7 }
 0x5a3   : > { %3968 = vrot.lane.b32.xlu0 %v3887_v1, %s5169_s29 }
 0x5a5   : > { %v3520_v10 = vpop.permute.xlu0 %3519  ;;  %4416 = vrot.lane.b32.xlu1 %v4335_v23, %s5171_s6  ;;  %4192 = vrot.lane.b32.xlu2 %v6784_v40, %s5170_s30  ;;  %v3839_v40 = vld [vmem:[#allocation3 + $0x38] sm:$0xff]  ;;  %v3842_v23 = vld [vmem:[#allocation3 + $0x60] sm:$0xff] }
 0x5a6   : > { %3598 = vst.msk [vmem:[#allocation5 + $0x44] sm:$0xf] %vm1301_vm7, %v3520_v10  ;;  %v3871_v15 = vpack.c.bf16 %v3839_v40, %v3839_v40 }
 0x5a7   : > { %v3528_v54 = vpop.permute.xlu1 %3527  ;;  %v3542_v45 = vpop.permute.xlu2 %3541 }
 0x5a8   : > { %3602 = vst.msk [vmem:[#allocation5 + $0x54] sm:$0xf] %vm1301_vm7, %v3528_v54  ;;  %v3874_v54 = vpack.c.bf16 %v3842_v23, %v3842_v23 }
 0x5a9   : > { %3609 = vst.msk [vmem:[#allocation5 + $0x70] sm:$0xf] %vm1301_vm7, %v3542_v45 }
 0x5ab   : > { %4414 = vrot.lane.b32.xlu0 %v3663_v5, %s5171_s6  ;;  %v3840_v5 = vld [vmem:[#allocation3 + $0x48] sm:$0xff] }
 0x5ac   : > { %v3872_v38 = vpack.c.bf16 %v3840_v5, %v3840_v5  ;;  %v5128_v5 = vld [vmem:[%s7344_s3] sm:$0xff] }
 0x5ad   : > { %v3526_v33 = vpop.permute.xlu0 %3525  ;;  %4158 = vrot.lane.b32.xlu1 %v6730_v8, %s5170_s30  ;;  %3934 = vrot.lane.b32.xlu2 %v3870_v37, %s5169_s29  ;;  %v4291_v37 = vld [vmem:[#allocation3 + $0x6a] sm:$0xff] }
 0x5ae   : > { %3601 = vst.msk [vmem:[#allocation5 + $0x50] sm:$0xf] %vm1301_vm7, %v3526_v33  ;;  %v4323_v40 = vpack.c.bf16 %v4291_v37, %v4291_v37  ;;  %v3847_v37 = vld [vmem:[#allocation3 + $0x98] sm:$0xff] }
 0x5af   : > { %v3534_v61 = vpop.permute.xlu1 %3533  ;;  %v3548_v26 = vpop.permute.xlu2 %3547 }
 0x5b0   : > { %3605 = vst.msk [vmem:[#allocation5 + $0x60] sm:$0xf] %vm1301_vm7, %v3534_v61 }
 0x5b1   : > { %3612 = vst.msk [vmem:[#allocation5 + $0x7c] sm:$0xf] %vm1301_vm7, %v3548_v26 }
 0x5b3   : > { %3936 = vrot.lane.b32.xlu0 %v3871_v15, %s5169_s29  ;;  %v4084_v15 = vld [vmem:[#allocation3 + $0x139] sm:$0xff] }
 0x5b5   : > { %v3532_v51 = vpop.permute.xlu0 %3531  ;;  %4384 = vrot.lane.b32.xlu1 %v6851_v24, %s5171_s6  ;;  %4160 = vrot.lane.b32.xlu2 %v6722_v39, %s5170_s30  ;;  %v3857_v39 = vld [vmem:[#allocation3 + $0x110] sm:$0xff] }
 0x5b6   : > { %3604 = vst.msk [vmem:[#allocation5 + $0x5c] sm:$0xf] %vm1301_vm7, %v3532_v51  ;;  %v3889_v57 = vpack.c.bf16 %v3857_v39, %v3857_v39  ;;  %v3860_v51 = vld [vmem:[#allocation3 + $0x138] sm:$0xff] }
 0x5b7   : > { %v3540_v8 = vpop.permute.xlu1 %3539  ;;  %v3714_v36 = vpop.permute.xlu2 %3713 }
 0x5b8   : > { %3608 = vst.msk [vmem:[#allocation5 + $0x6c] sm:$0xf] %vm1301_vm7, %v3540_v8  ;;  %v4116_v8 = vpack.c.bf16 %v4084_v15, %v4084_v15 }
 0x5b9   : > { %3807 = vst.msk [vmem:[#allocation5 + $0x8] sm:$0xf] %vm1526_vm8, %v3714_v36  ;;  %v3892_v36 = vpack.c.bf16 %v3860_v51, %v3860_v51 }
 0x5bb   : > { %4382 = vrot.lane.b32.xlu0 %v6842_v19, %s5171_s6  ;;  %v4113_v19 = vpack.c.bf16 %v4081_v6, %v4081_v6 }
 0x5bd   : > { %v3538_v56 = vpop.permute.xlu0 %3537  ;;  %4194 = vrot.lane.b32.xlu1 %v6793_v27, %s5170_s30  ;;  %3970 = vrot.lane.b32.xlu2 %v3888_v17, %s5169_s29 }
 0x5be   : > { %3607 = vst.msk [vmem:[#allocation5 + $0x68] sm:$0xf] %vm1301_vm7, %v3538_v56  ;;  %v3861_v56 = vld [vmem:[#allocation3 + $0x140] sm:$0xff] }
 0x5bf   : > { %v3546_v24 = vpop.permute.xlu1 %3545  ;;  %v3720_v4 = vpop.permute.xlu2 %3719 }
 0x5c0   : > { %3611 = vst.msk [vmem:[#allocation5 + $0x78] sm:$0xf] %vm1301_vm7, %v3546_v24 }
 0x5c1   : > { %3810 = vst.msk [vmem:[#allocation5 + $0x14] sm:$0xf] %vm1526_vm8, %v3720_v4 }
 0x5c3   : > { %3972 = vrot.lane.b32.xlu0 %v3889_v57, %s5169_s29  ;;  %v3893_v57 = vpack.c.bf16 %v3861_v56, %v3861_v56 }
 0x5c5   : > { %v3544_v18 = vpop.permute.xlu0 %3543  ;;  %4420 = vrot.lane.b32.xlu1 %v6917_v3, %s5171_s6  ;;  %4196 = vrot.lane.b32.xlu2 %v4113_v19, %s5170_s30  ;;  %v3873_v3 = vpack.c.bf16 %v3841_v63, %v3841_v63  ;;  %v5129_v19 = vld [vmem:[%s7344_s3 + $0x8] sm:$0xff] }
 0x5c6   : > { %3610 = vst.msk [vmem:[#allocation5 + $0x74] sm:$0xf] %vm1301_vm7, %v3544_v18  ;;  %v3844_v63 = vld [vmem:[#allocation3 + $0x78] sm:$0xff] }
 0x5c7   : > { %v3712_v27 = vpop.permute.xlu1 %3711  ;;  %v3726_v59 = vpop.permute.xlu2 %3725 }
 0x5c8   : > { %3806 = vst.msk [vmem:[#allocation5 + $0x4] sm:$0xf] %vm1526_vm8, %v3712_v27 }
 0x5c9   : > { %3813 = vst.msk [vmem:[#allocation5 + $0x20] sm:$0xf] %vm1526_vm8, %v3726_v59  ;;  %v4308_v59 = vld [vmem:[#allocation3 + $0x13a] sm:$0xff] }
 0x5cb   : > { %4418 = vrot.lane.b32.xlu0 %v6908_v20, %s5171_s6 }
 0x5cd   : > { %v3710_v55 = vpop.permute.xlu0 %3709  ;;  %4162 = vrot.lane.b32.xlu1 %v6736_v31, %s5170_s30  ;;  %3938 = vrot.lane.b32.xlu2 %v3872_v38, %s5169_s29  ;;  %v4288_v31 = vld [vmem:[#allocation3 + $0x4a] sm:$0xff] }
 0x5ce   : > { %3805 = vst.msk [vmem:[#allocation5] sm:$0xf] %vm1526_vm8, %v3710_v55  ;;  %v4320_v11 = vpack.c.bf16 %v4288_v31, %v4288_v31 }
 0x5cf   : > { %v3718_v47 = vpop.permute.xlu1 %3717  ;;  %v3732_v41 = vpop.permute.xlu2 %3731 }
 0x5d0   : > { %3809 = vst.msk [vmem:[#allocation5 + $0x10] sm:$0xf] %vm1526_vm8, %v3718_v47  ;;  %v4340_v47 = vpack.c.bf16 %v4308_v59, %v4308_v59  ;;  %v4312_v59 = vld [vmem:[#allocation3 + $0x16a] sm:$0xff] }
 0x5d1   : > { %3816 = vst.msk [vmem:[#allocation5 + $0x2c] sm:$0xf] %vm1526_vm8, %v3732_v41 }
 0x5d3   : > { %3940 = vrot.lane.b32.xlu0 %v3873_v3, %s5169_s29  ;;  %v3845_v3 = vld [vmem:[#allocation3 + $0x80] sm:$0xff] }
 0x5d5   : > { %v3716_v20 = vpop.permute.xlu0 %3715  ;;  %4388 = vrot.lane.b32.xlu1 %v6855_v2, %s5171_s6  ;;  %4164 = vrot.lane.b32.xlu2 %v6745_v13, %s5170_s30  ;;  %v3859_v13 = vld [vmem:[#allocation3 + $0x128] sm:$0xff] }
 0x5d6   : > { %3808 = vst.msk [vmem:[#allocation5 + $0xc] sm:$0xf] %vm1526_vm8, %v3716_v20  ;;  %v3891_v22 = vpack.c.bf16 %v3859_v13, %v3859_v13 }
 0x5d7   : > { %v3724_v52 = vpop.permute.xlu1 %3723  ;;  %v3738_v43 = vpop.permute.xlu2 %3737 }
 0x5d8   : > { %3812 = vst.msk [vmem:[#allocation5 + $0x1c] sm:$0xf] %vm1526_vm8, %v3724_v52  ;;  %v3877_v52 = vpack.c.bf16 %v3845_v3, %v3845_v3 }
 0x5d9   : > { %3819 = vst.msk [vmem:[#allocation5 + $0x38] sm:$0xf] %vm1526_vm8, %v3738_v43 }
 0x5db   : > { %4386 = vrot.lane.b32.xlu0 %v4320_v11, %s5171_s6  ;;  %v3862_v11 = vld [vmem:[#allocation3 + $0x150] sm:$0xff] }
 0x5dd   : > { %v3722_v62 = vpop.permute.xlu0 %3721  ;;  %4198 = vrot.lane.b32.xlu1 %v6797_v30, %s5170_s30  ;;  %3974 = vrot.lane.b32.xlu2 %v3890_v16, %s5169_s29  ;;  %v4306_v30 = vld [vmem:[#allocation3 + $0x122] sm:$0xff]  ;;  %v3894_v16 = vpack.c.bf16 %v3862_v11, %v3862_v11 }
 0x5de   : > { %3811 = vst.msk [vmem:[#allocation5 + $0x18] sm:$0xf] %vm1526_vm8, %v3722_v62  ;;  %v4338_v10 = vpack.c.bf16 %v4306_v30, %v4306_v30 }
 0x5df   : > { %v3730_v2 = vpop.permute.xlu1 %3729  ;;  %v3744_v42 = vpop.permute.xlu2 %3743 }
 0x5e0   : > { %3815 = vst.msk [vmem:[#allocation5 + $0x28] sm:$0xf] %vm1526_vm8, %v3730_v2  ;;  %v4311_v2 = vld [vmem:[#allocation3 + $0x15a] sm:$0xff] }
 0x5e1   : > { %3822 = vst.msk [vmem:[#allocation5 + $0x44] sm:$0xf] %vm1526_vm8, %v3744_v42  ;;  %v4087_v42 = vld [vmem:[#allocation3 + $0x159] sm:$0xff] }
 0x5e3   : > { %3976 = vrot.lane.b32.xlu0 %v3891_v22, %s5169_s29 }
 0x5e5   : > { %v3728_v7 = vpop.permute.xlu0 %3727  ;;  %4424 = vrot.lane.b32.xlu1 %v6921_v29, %s5171_s6  ;;  %4200 = vrot.lane.b32.xlu2 %v6806_v25, %s5170_s30  ;;  %v3843_v25 = vld [vmem:[#allocation3 + $0x68] sm:$0xff] }
 0x5e6   : > { %3814 = vst.msk [vmem:[#allocation5 + $0x24] sm:$0xf] %vm1526_vm8, %v3728_v7  ;;  %v3875_v33 = vpack.c.bf16 %v3843_v25, %v3843_v25  ;;  %v4119_v7 = vpack.c.bf16 %v4087_v42, %v4087_v42 }
 0x5e7   : > { %v3736_v12 = vpop.permute.xlu1 %3735  ;;  %v3750_v1 = vpop.permute.xlu2 %3749 }
 0x5e8   : > { %3818 = vst.msk [vmem:[#allocation5 + $0x34] sm:$0xf] %vm1526_vm8, %v3736_v12  ;;  %v4310_v12 = vld [vmem:[#allocation3 + $0x152] sm:$0xff] }
 0x5e9   : > { %3825 = vst.msk [vmem:[#allocation5 + $0x50] sm:$0xf] %vm1526_vm8, %v3750_v1 }
 0x5eb   : > { %4422 = vrot.lane.b32.xlu0 %v4338_v10, %s5171_s6  ;;  %v4070_v10 = vld [vmem:[#allocation3 + $0x91] sm:$0xff] }
 0x5ec   : > { %v4102_v25 = vpack.c.bf16 %v4070_v10, %v4070_v10 }
 0x5ed   : > { %v3734_v45 = vpop.permute.xlu0 %3733  ;;  %4166 = vrot.lane.b32.xlu1 %v6734_v35, %s5170_s30  ;;  %3942 = vrot.lane.b32.xlu2 %v3874_v54, %s5169_s29  ;;  %v3846_v54 = vld [vmem:[#allocation3 + $0x90] sm:$0xff] }
 0x5ee   : > { %3817 = vst.msk [vmem:[#allocation5 + $0x30] sm:$0xf] %vm1526_vm8, %v3734_v45  ;;  %v4342_v45 = vpack.c.bf16 %v4310_v12, %v4310_v12  ;;  %v4090_v12 = vld [vmem:[#allocation3 + $0x181] sm:$0xff] }
 0x5ef   : > { %v3742_v29 = vpop.permute.xlu1 %3741  ;;  %v3756_v58 = vpop.permute.xlu2 %3755  ;;  %v4122_v10 = vpack.c.bf16 %v4090_v12, %v4090_v12 }
 0x5f0   : > { %3821 = vst.msk [vmem:[#allocation5 + $0x40] sm:$0xf] %vm1526_vm8, %v3742_v29  ;;  %v3878_v29 = vpack.c.bf16 %v3846_v54, %v3846_v54 }
 0x5f1   : > { %3828 = vst.msk [vmem:[#allocation5 + $0x5c] sm:$0xf] %vm1526_vm8, %v3756_v58 }
 0x5f3   : > { %3944 = vrot.lane.b32.xlu0 %v3875_v33, %s5169_s29 }
 0x5f5   : > { %v3740_v61 = vpop.permute.xlu0 %3739  ;;  %4392 = vrot.lane.b32.xlu1 %v4323_v40, %s5171_s6  ;;  %4168 = vrot.lane.b32.xlu2 %v6751_v9, %s5170_s30  ;;  %v4640_v9 = vunpack.c.l.b16 %v4546_v28 }
 0x5f6   : > { %3820 = vst.msk [vmem:[#allocation5 + $0x3c] sm:$0xf] %vm1526_vm8, %v3740_v61  ;;  %v4071_v61 = vld [vmem:[#allocation3 + $0x99] sm:$0xff] }
 0x5f7   : > { %v3748_v35 = vpop.permute.xlu1 %3747  ;;  %v3967_v26 = vpop.permute.xlu2 %3966  ;;  %v4643_v39 = vpack.c.b16 %v4640_v9, %v4640_v9  ;;  %v3864_v9 = vld [vmem:[#allocation3 + $0x168] sm:$0xff] }
 0x5f8   : > { %3824 = vst.msk [vmem:[#allocation5 + $0x4c] sm:$0xf] %vm1526_vm8, %v3748_v35  ;;  %v3879_v35 = vpack.c.bf16 %v3847_v37, %v3847_v37  ;;  %v4315_v37 = vld [vmem:[#allocation3 + $0x18a] sm:$0xff] }
 0x5f9   : > { %4046 = vst.msk [vmem:[#allocation5 + $0x40] sm:$0xf] %vm1752_vm9, %v3967_v26  ;;  %v4695_v6 = vsel %vm2420_vm11, %v4643_v39, 0  ;;  %v4103_v26 = vpack.c.bf16 %v4071_v61, %v4071_v61  ;;  %v4347_v61 = vpack.c.bf16 %v4315_v37, %v4315_v37 }
 0x5fa   : > { %5133 = vmatpush.bf16.msra.mxu3 %v4695_v6  ;;  %4702 = vmatpush.bf16.msra.mxu1 %v4695_v6 }
 0x5fb   : > { %4390 = vrot.lane.b32.xlu0 %v6864_v48, %s5171_s6  ;;  %v4309_v48 = vld [vmem:[#allocation3 + $0x142] sm:$0xff] }
 0x5fc   : > { %v4341_v18 = vpack.c.bf16 %v4309_v48, %v4309_v48 }
 0x5fd   : > { %v3746_v17 = vpop.permute.xlu0 %3745  ;;  %4202 = vrot.lane.b32.xlu1 %v4116_v8, %s5170_s30  ;;  %3978 = vrot.lane.b32.xlu2 %v3892_v36, %s5169_s29  ;;  %v4294_v8 = vld [vmem:[#allocation3 + $0x92] sm:$0xff] }
 0x5fe   : > { %3823 = vst.msk [vmem:[#allocation5 + $0x48] sm:$0xf] %vm1526_vm8, %v3746_v17  ;;  %5134 = vmatpush.bf16.msra.mxu3 %v5129_v19  ;;  %4703 = vmatpush.bf16.msra.mxu1 %v5129_v19  ;;  %v4326_v17 = vpack.c.bf16 %v4294_v8, %v4294_v8 }
 0x5ff   : > { %v3754_v24 = vpop.permute.xlu1 %3753  ;;  %v4193_v4 = vpop.permute.xlu2 %4192 }
 0x600   : > { %3827 = vst.msk [vmem:[#allocation5 + $0x58] sm:$0xf] %vm1526_vm8, %v3754_v24 }
 0x602   : > { %5135 = vmatpush.bf16.msra.mxu3 %v5128_v5  ;;  %4704 = vmatpush.bf16.msra.mxu1 %v5128_v5  ;;  %v4344_v5 = vpack.c.bf16 %v4312_v59, %v4312_v59  ;;  %v3868_v59 = vld [vmem:[#allocation3 + $0x198] sm:$0xff] }
 0x603   : > { %3980 = vrot.lane.b32.xlu0 %v3893_v57, %s5169_s29 }
 0x605   : > { %v3752_v27 = vpop.permute.xlu0 %3751  ;;  %4428 = vrot.lane.b32.xlu1 %v4341_v18, %s5171_s6  ;;  %4204 = vrot.lane.b32.xlu2 %v6810_v0, %s5170_s30  ;;  %v3876_v0 = vpack.c.bf16 %v3844_v63, %v3844_v63 }
 0x606   : > { %3826 = vst.msk [vmem:[#allocation5 + $0x54] sm:$0xf] %vm1526_vm8, %v3752_v27  ;;  %v3848_v27 = vld [vmem:[#allocation3 + $0xa8] sm:$0xff] }
 0x607   : > { %v3760_v38 = vpop.permute.xlu1 %3759  ;;  %v3935_v55 = vpop.permute.xlu2 %3934 }
 0x608   : > { %3830 = vst.msk [vmem:[#allocation5 + $0x64] sm:$0xf] %vm1526_vm8, %v3760_v38 }
 0x609   : > { %4030 = vst.msk [vmem:[#allocation5] sm:$0xf] %vm1752_vm9, %v3935_v55  ;;  %v4313_v55 = vld [vmem:[#allocation3 + $0x172] sm:$0xff] }
 0x60a   : > { %v4345_v3 = vpack.c.bf16 %v4313_v55, %v4313_v55  ;;  %v3900_v55 = vpack.c.bf16 %v3868_v59, %v3868_v59 }
 0x60b   : > { %4426 = vrot.lane.b32.xlu0 %v4340_v47, %s5171_s6 }
 0x60d   : > { %v3758_v41 = vpop.permute.xlu0 %3757  ;;  %4170 = vrot.lane.b32.xlu1 %v6760_v60, %s5170_s30  ;;  %3946 = vrot.lane.b32.xlu2 %v3876_v0, %s5169_s29  ;;  %v4073_v0 = vld [vmem:[#allocation3 + $0xb1] sm:$0xff] }
 0x60e   : > { %3829 = vst.msk [vmem:[#allocation5 + $0x60] sm:$0xf] %vm1526_vm8, %v3758_v41  ;;  %v3849_v41 = vld [vmem:[#allocation3 + $0xb0] sm:$0xff] }
 0x60f   : > { %v4191_v20 = vpop.permute.xlu1 %4190  ;;  %v4161_v31 = vpop.permute.xlu2 %4160 }
 0x610   : > { %4270 = vst.msk [vmem:[#allocation5 + $0x40] sm:$0xf] %vm1977_vm10, %v4191_v20  ;;  %v3881_v20 = vpack.c.bf16 %v3849_v41, %v3849_v41  ;;  %v4093_v41 = vld [vmem:[#allocation3 + $0x1a1] sm:$0xff] }
 0x613   : > { %3948 = vrot.lane.b32.xlu0 %v3877_v52, %s5169_s29 }
 0x615   : > { %v3969_v43 = vpop.permute.xlu0 %3968  ;;  %4396 = vrot.lane.b32.xlu1 %v6877_v50, %s5171_s6  ;;  %4172 = vrot.lane.b32.xlu2 %v6749_v32, %s5170_s30  ;;  %v3863_v32 = vld [vmem:[#allocation3 + $0x158] sm:$0xff] }
 0x616   : > { %4047 = vst.msk [vmem:[#allocation5 + $0x44] sm:$0xf] %vm1752_vm9, %v3969_v43  ;;  %v3895_v22 = vpack.c.bf16 %v3863_v32, %v3863_v32  ;;  %v4072_v43 = vld [vmem:[#allocation3 + $0xa9] sm:$0xff] }
 0x617   : > { %4271 = vst.msk [vmem:[#allocation5 + $0x44] sm:$0xf] %vm1977_vm10, %v4193_v4  ;;  %v4417_v60 = vpop.permute.xlu1 %4416  ;;  %v3971_v14 = vpop.permute.xlu2 %3970  ;;  %v3865_v4 = vld [vmem:[#allocation3 + $0x170] sm:$0xff]  ;;  %v4104_v11 = vpack.c.bf16 %v4072_v43, %v4072_v43  ;;  %v4316_v43 = vld [vmem:[#allocation3 + $0x19a] sm:$0xff] }
 0x618   : > { %4495 = vst.msk [vmem:[#allocation5 + $0x44] sm:$0xf] %vm2202_vm12, %v4417_v60  ;;  %v3897_v48 = vpack.c.bf16 %v3865_v4, %v3865_v4 }
 0x619   : > { %4048 = vst.msk [vmem:[#allocation5 + $0x48] sm:$0xf] %vm1752_vm9, %v3971_v14 }
 0x61b   : > { %4394 = vrot.lane.b32.xlu0 %v6868_v21, %s5171_s6  ;;  %v4343_v21 = vpack.c.bf16 %v4311_v2, %v4311_v2 }
 0x61d   : > { %v4415_v62 = vpop.permute.xlu0 %4414  ;;  %4206 = vrot.lane.b32.xlu1 %v6819_v53, %s5170_s30  ;;  %3982 = vrot.lane.b32.xlu2 %v3894_v16, %s5169_s29 }
 0x61e   : > { %4494 = vst.msk [vmem:[#allocation5 + $0x40] sm:$0xf] %vm2202_vm12, %v4415_v62  ;;  %v4297_v62 = vld [vmem:[#allocation3 + $0xb2] sm:$0xff] }
 0x61f   : > { %v4159_v50 = vpop.permute.xlu1 %4158  ;;  %v4197_v13 = vpop.permute.xlu2 %4196  ;;  %v4329_v2 = vpack.c.bf16 %v4297_v62, %v4297_v62  ;;  %v4348_v62 = vpack.c.bf16 %v4316_v43, %v4316_v43 }
 0x620   : > { %4254 = vst.msk [vmem:[#allocation5] sm:$0xf] %vm1977_vm10, %v4159_v50 }
 0x623   : > { %3984 = vrot.lane.b32.xlu0 %v3895_v22, %s5169_s29 }
 0x625   : > { %v3937_v30 = vpop.permute.xlu0 %3936  ;;  %4432 = vrot.lane.b32.xlu1 %v4343_v21, %s5171_s6  ;;  %4208 = vrot.lane.b32.xlu2 %v4119_v7, %s5170_s30  ;;  %v5120_v53 = vld [vmem:[#allocation5 + $0x40] sm:$0xff] }
 0x626   : > { %4031 = vst.msk [vmem:[#allocation5 + $0x4] sm:$0xf] %vm1752_vm9, %v3937_v30  ;;  %5082 = vmatmul.msk.bf16.vlgmr.msra.gmra.mxu3 %vm2371_vm13, %v5120_v53  ;;  %v4314_v53 = vld [vmem:[#allocation3 + $0x182] sm:$0xff] }
 0x627   : > { %4255 = vst.msk [vmem:[#allocation5 + $0x4] sm:$0xf] %vm1977_vm10, %v4161_v31  ;;  %v4385_v1 = vpop.permute.xlu1 %4384  ;;  %v3939_v23 = vpop.permute.xlu2 %3938 }
 0x628   : > { %4479 = vst.msk [vmem:[#allocation5 + $0x4] sm:$0xf] %vm2202_vm12, %v4385_v1 }
 0x629   : > { %4032 = vst.msk [vmem:[#allocation5 + $0x8] sm:$0xf] %vm1752_vm9, %v3939_v23  ;;  %v4346_v23 = vpack.c.bf16 %v4314_v53, %v4314_v53 }
 0x62b   : > { %4430 = vrot.lane.b32.xlu0 %v4342_v45, %s5171_s6 }
 0x62d   : > { %v4383_v58 = vpop.permute.xlu0 %4382  ;;  %4174 = vrot.lane.b32.xlu1 %v4102_v25, %s5170_s30  ;;  %3950 = vrot.lane.b32.xlu2 %v3878_v29, %s5169_s29 }
 0x62e   : > { %4478 = vst.msk [vmem:[#allocation5] sm:$0xf] %vm2202_vm12, %v4383_v58  ;;  %v3851_v58 = vld [vmem:[#allocation3 + $0xc8] sm:$0xff] }
 0x62f   : > { %v4195_v33 = vpop.permute.xlu1 %4194  ;;  %v4165_v40 = vpop.permute.xlu2 %4164 }
 0x630   : > { %4272 = vst.msk [vmem:[#allocation5 + $0x48] sm:$0xf] %vm1977_vm10, %v4195_v33 }
 0x633   : > { %3952 = vrot.lane.b32.xlu0 %v3879_v35, %s5169_s29 }
 0x635   : > { %v3973_v15 = vpop.permute.xlu0 %3972  ;;  %4400 = vrot.lane.b32.xlu1 %v6881_v49, %s5171_s6  ;;  %4176 = vrot.lane.b32.xlu2 %v4103_v26, %s5170_s30  ;;  %v5112_v51 = vld [vmem:[#allocation5] sm:$0xff]  ;;  %v3896_v49 = vpack.c.bf16 %v3864_v9, %v3864_v9 }
 0x636   : > { %4049 = vst.msk [vmem:[#allocation5 + $0x4c] sm:$0xf] %vm1752_vm9, %v3973_v15  ;;  %5074 = vmatmul.msk.bf16.vlgmr.msra.gmra.mxu1 %vm2371_vm13, %v5112_v51  ;;  %v3850_v15 = vld [vmem:[#allocation3 + $0xc0] sm:$0xff] }
 0x637   : > { %4273 = vst.msk [vmem:[#allocation5 + $0x4c] sm:$0xf] %vm1977_vm10, %v4197_v13  ;;  %v4421_v36 = vpop.permute.xlu1 %4420  ;;  %v3975_v28 = vpop.permute.xlu2 %3974  ;;  %v3867_v13 = vld [vmem:[#allocation3 + $0x188] sm:$0xff]  ;;  %v3882_v9 = vpack.c.bf16 %v3850_v15, %v3850_v15 }
 0x638   : > { %4497 = vst.msk [vmem:[#allocation5 + $0x4c] sm:$0xf] %vm2202_vm12, %v4421_v36  ;;  %v3899_v42 = vpack.c.bf16 %v3867_v13, %v3867_v13  ;;  %v4298_v36 = vld [vmem:[#allocation3 + $0xc2] sm:$0xff] }
 0x639   : > { %4050 = vst.msk [vmem:[#allocation5 + $0x50] sm:$0xf] %vm1752_vm9, %v3975_v28  ;;  %v4074_v28 = vld [vmem:[#allocation3 + $0xc1] sm:$0xff] }
 0x63b   : > { %4398 = vrot.lane.b32.xlu0 %v4326_v17, %s5171_s6  ;;  %v4330_v17 = vpack.c.bf16 %v4298_v36, %v4298_v36 }
 0x63d   : > { %v4419_v56 = vpop.permute.xlu0 %4418  ;;  %3986 = vrot.lane.b32.xlu1 %v3896_v49, %s5169_s29  ;;  %3761 = vrot.lane.b32.xlu2 %v4342_v45, %s5168_s28  ;;  %v4091_v45 = vld [vmem:[#allocation3 + $0x189] sm:$0xff]  ;;  %v4106_v49 = vpack.c.bf16 %v4074_v28, %v4074_v28 }
 0x63e   : > { %4496 = vst.msk [vmem:[#allocation5 + $0x48] sm:$0xf] %vm2202_vm12, %v4419_v56  ;;  %v4123_v33 = vpack.c.bf16 %v4091_v45, %v4091_v45 }
 0x63f   : > { %v4163_v39 = vpop.permute.xlu1 %4162  ;;  %v4201_v24 = vpop.permute.xlu2 %4200 }
 0x640   : > { %4256 = vst.msk [vmem:[#allocation5 + $0x8] sm:$0xf] %vm1977_vm10, %v4163_v39  ;;  %v4075_v39 = vld [vmem:[#allocation3 + $0xc9] sm:$0xff] }
 0x643   : > { %3763 = vrot.lane.b32.xlu0 %v4343_v21, %s5168_s28 }
 0x645   : > { %v3941_v6 = vpop.permute.xlu0 %3940  ;;  %4212 = vrot.lane.b32.xlu1 %v6831_v34, %s5170_s30  ;;  %3988 = vrot.lane.b32.xlu2 %v3897_v48, %s5169_s29  ;;  %v5121_v57 = vld [vmem:[#allocation5 + $0x48] sm:$0xff]  ;;  %v3880_v34 = vpack.c.bf16 %v3848_v27, %v3848_v27  ;;  %v4299_v48 = vld [vmem:[#allocation3 + $0xca] sm:$0xff] }
 0x646   : > { %4033 = vst.msk [vmem:[#allocation5 + $0xc] sm:$0xf] %vm1752_vm9, %v3941_v6  ;;  %5083 = vmatmul.msk.bf16.gmra.mxu3 %vm2371_vm13, %v5121_v57  ;;  %v4107_v6 = vpack.c.bf16 %v4075_v39, %v4075_v39  ;;  %v4331_v57 = vpack.c.bf16 %v4299_v48, %v4299_v48  ;;  %v4092_v27 = vld [vmem:[#allocation3 + $0x199] sm:$0xff] }
 0x647   : > { %4257 = vst.msk [vmem:[#allocation5 + $0xc] sm:$0xf] %vm1977_vm10, %v4165_v40  ;;  %v4389_v19 = vpop.permute.xlu1 %4388  ;;  %v3943_v18 = vpop.permute.xlu2 %3942  ;;  %v3883_v40 = vpack.c.bf16 %v3851_v58, %v3851_v58 }
 0x648   : > { %4481 = vst.msk [vmem:[#allocation5 + $0xc] sm:$0xf] %vm2202_vm12, %v4389_v19 }
 0x649   : > { %4034 = vst.msk [vmem:[#allocation5 + $0x10] sm:$0xf] %vm1752_vm9, %v3943_v18 }
 0x64b   : > { %4210 = vrot.lane.b32.xlu0 %v6823_v46, %s5170_s30  ;;  %v4105_v46 = vpack.c.bf16 %v4073_v0, %v4073_v0  ;;  %v4317_v0 = vld [vmem:[#allocation3 + $0x1a2] sm:$0xff] }
 0x64d   : > { %v4387_v38 = vpop.permute.xlu0 %4386  ;;  %3954 = vrot.lane.b32.xlu1 %v3880_v34, %s5169_s29  ;;  %4434 = vrot.lane.b32.xlu2 %v4344_v5, %s5171_s6 }
 0x64e   : > { %4480 = vst.msk [vmem:[#allocation5 + $0x8] sm:$0xf] %vm2202_vm12, %v4387_v38  ;;  %v4124_v38 = vpack.c.bf16 %v4092_v27, %v4092_v27 }
 0x64f   : > { %v4199_v63 = vpop.permute.xlu1 %4198  ;;  %v4169_v47 = vpop.permute.xlu2 %4168 }
 0x650   : > { %4274 = vst.msk [vmem:[#allocation5 + $0x50] sm:$0xf] %vm1977_vm10, %v4199_v63  ;;  %v3869_v63 = vld [vmem:[#allocation3 + $0x1a0] sm:$0xff] }
 0x653   : > { %4436 = vrot.lane.b32.xlu0 %v4345_v3, %s5171_s6 }
 0x655   : > { %v3977_v31 = vpop.permute.xlu0 %3976  ;;  %4180 = vrot.lane.b32.xlu1 %v4105_v46, %s5170_s30  ;;  %3956 = vrot.lane.b32.xlu2 %v3881_v20, %s5169_s29  ;;  %v5113_v52 = vld [vmem:[#allocation5 + $0x8] sm:$0xff]  ;;  %v3901_v20 = vpack.c.bf16 %v3869_v63, %v3869_v63 }
 0x656   : > { %4051 = vst.msk [vmem:[#allocation5 + $0x54] sm:$0xf] %vm1752_vm9, %v3977_v31  ;;  %5075 = vmatmul.msk.bf16.gmra.mxu1 %vm2371_vm13, %v5113_v52  ;;  %v4349_v31 = vpack.c.bf16 %v4317_v0, %v4317_v0  ;;  %v4125_v52 = vpack.c.bf16 %v4093_v41, %v4093_v41 }
 0x657   : > { %4275 = vst.msk [vmem:[#allocation5 + $0x54] sm:$0xf] %vm1977_vm10, %v4201_v24  ;;  %v4425_v60 = vpop.permute.xlu1 %4424  ;;  %v3979_v14 = vpop.permute.xlu2 %3978 }
 0x658   : > { %4499 = vst.msk [vmem:[#allocation5 + $0x54] sm:$0xf] %vm2202_vm12, %v4425_v60 }
 0x659   : > { %4052 = vst.msk [vmem:[#allocation5 + $0x58] sm:$0xf] %vm1752_vm9, %v3979_v14 }
 0x65b   : > { %4178 = vrot.lane.b32.xlu0 %v4104_v11, %s5170_s30 }
 0x65d   : > { %v4423_v16 = vpop.permute.xlu0 %4422  ;;  %3765 = vrot.lane.b32.xlu1 %v4344_v5, %s5168_s28  ;;  %4402 = vrot.lane.b32.xlu2 %v6890_v44, %s5171_s6  ;;  %v3866_v44 = vld [vmem:[#allocation3 + $0x180] sm:$0xff] }
 0x65e   : > { %4498 = vst.msk [vmem:[#allocation5 + $0x50] sm:$0xf] %vm2202_vm12, %v4423_v16  ;;  %v3898_v1 = vpack.c.bf16 %v3866_v44, %v3866_v44 }
 0x65f   : > { %v4167_v32 = vpop.permute.xlu1 %4166  ;;  %v4205_v50 = vpop.permute.xlu2 %4204 }
 0x660   : > { %4258 = vst.msk [vmem:[#allocation5 + $0x10] sm:$0xf] %vm1977_vm10, %v4167_v32  ;;  %v4076_v32 = vld [vmem:[#allocation3 + $0xd9] sm:$0xff] }
 0x661   : > { %v4108_v13 = vpack.c.bf16 %v4076_v32, %v4076_v32 }
 0x663   : > { %4404 = vrot.lane.b32.xlu0 %v4329_v2, %s5171_s6 }
 0x665   : > { %v3945_v22 = vpop.permute.xlu0 %3944  ;;  %3992 = vrot.lane.b32.xlu1 %v3899_v42, %s5169_s29  ;;  %3767 = vrot.lane.b32.xlu2 %v4345_v3, %s5168_s28  ;;  %v5122_v21 = vld [vmem:[#allocation5 + $0x50] sm:$0xff] }
 0x666   : > { %4035 = vst.msk [vmem:[#allocation5 + $0x14] sm:$0xf] %vm1752_vm9, %v3945_v22  ;;  %5084 = vmatmul.msk.bf16.gmra.mxu3 %vm2371_vm13, %v5122_v21  ;;  %v3853_v22 = vld [vmem:[#allocation3 + $0xe0] sm:$0xff] }
 0x667   : > { %4259 = vst.msk [vmem:[#allocation5 + $0x14] sm:$0xf] %vm1977_vm10, %v4169_v47  ;;  %v4393_v7 = vpop.permute.xlu1 %4392  ;;  %v3947_v30 = vpop.permute.xlu2 %3946  ;;  %v3885_v53 = vpack.c.bf16 %v3853_v22, %v3853_v22 }
 0x668   : > { %4483 = vst.msk [vmem:[#allocation5 + $0x14] sm:$0xf] %vm2202_vm12, %v4393_v7  ;;  %v4301_v7 = vld [vmem:[#allocation3 + $0xe2] sm:$0xff] }
 0x669   : > { %4036 = vst.msk [vmem:[#allocation5 + $0x18] sm:$0xf] %vm1752_vm9, %v3947_v30  ;;  %v4077_v30 = vld [vmem:[#allocation3 + $0xe1] sm:$0xff]  ;;  %v4333_v12 = vpack.c.bf16 %v4301_v7, %v4301_v7 }
 0x66b   : > { %3990 = vrot.lane.b32.xlu0 %v3898_v1, %s5169_s29  ;;  %v4109_v1 = vpack.c.bf16 %v4077_v30, %v4077_v30 }
 0x66d   : > { %v4391_v54 = vpop.permute.xlu0 %4390  ;;  %4438 = vrot.lane.b32.xlu1 %v4346_v23, %s5171_s6  ;;  %4214 = vrot.lane.b32.xlu2 %v4122_v10, %s5170_s30 }
 0x66e   : > { %4482 = vst.msk [vmem:[#allocation5 + $0x10] sm:$0xf] %vm2202_vm12, %v4391_v54  ;;  %v4300_v54 = vld [vmem:[#allocation3 + $0xda] sm:$0xff] }
 0x66f   : > { %v4203_v25 = vpop.permute.xlu1 %4202  ;;  %v4173_v29 = vpop.permute.xlu2 %4172  ;;  %v4332_v58 = vpack.c.bf16 %v4300_v54, %v4300_v54 }
 0x670   : > { %4276 = vst.msk [vmem:[#allocation5 + $0x58] sm:$0xf] %vm1977_vm10, %v4203_v25 }
 0x673   : > { %4216 = vrot.lane.b32.xlu0 %v4123_v33, %s5170_s30 }
 0x675   : > { %v3981_v35 = vpop.permute.xlu0 %3980  ;;  %3960 = vrot.lane.b32.xlu1 %v3883_v40, %s5169_s29  ;;  %4440 = vrot.lane.b32.xlu2 %v4347_v61, %s5171_s6  ;;  %v5114_v26 = vld [vmem:[#allocation5 + $0x10] sm:$0xff] }
 0x676   : > { %4053 = vst.msk [vmem:[#allocation5 + $0x5c] sm:$0xf] %vm1752_vm9, %v3981_v35  ;;  %5076 = vmatmul.msk.bf16.gmra.mxu1 %vm2371_vm13, %v5114_v26 }
 0x677   : > { %4277 = vst.msk [vmem:[#allocation5 + $0x5c] sm:$0xf] %vm1977_vm10, %v4205_v50  ;;  %v4429_v51 = vpop.permute.xlu1 %4428  ;;  %v3983_v8 = vpop.permute.xlu2 %3982  ;;  %v3852_v50 = vld [vmem:[#allocation3 + $0xd8] sm:$0xff] }
 0x678   : > { %4501 = vst.msk [vmem:[#allocation5 + $0x5c] sm:$0xf] %vm2202_vm12, %v4429_v51  ;;  %v3884_v2 = vpack.c.bf16 %v3852_v50, %v3852_v50 }
 0x679   : > { %4054 = vst.msk [vmem:[#allocation5 + $0x60] sm:$0xf] %vm1752_vm9, %v3983_v8 }
 0x67b   : > { %3958 = vrot.lane.b32.xlu0 %v3882_v9, %s5169_s29 }
 0x67d   : > { %v4427_v56 = vpop.permute.xlu0 %4426  ;;  %4406 = vrot.lane.b32.xlu1 %v4330_v17, %s5171_s6  ;;  %4182 = vrot.lane.b32.xlu2 %v4106_v49, %s5170_s30 }
 0x67e   : > { %4500 = vst.msk [vmem:[#allocation5 + $0x58] sm:$0xf] %vm2202_vm12, %v4427_v56 }
 0x67f   : > { %v4171_v24 = vpop.permute.xlu1 %4170  ;;  %v4209_v4 = vpop.permute.xlu2 %4208 }
 0x680   : > { %4260 = vst.msk [vmem:[#allocation5 + $0x18] sm:$0xf] %vm1977_vm10, %v4171_v24 }
 0x683   : > { %4184 = vrot.lane.b32.xlu0 %v4107_v6, %s5170_s30 }
 0x685   : > { %v3949_v19 = vpop.permute.xlu0 %3948  ;;  %3771 = vrot.lane.b32.xlu1 %v4347_v61, %s5168_s28  ;;  %4408 = vrot.lane.b32.xlu2 %v4331_v57, %s5171_s6  ;;  %v5123_v18 = vld [vmem:[#allocation5 + $0x58] sm:$0xff] }
 0x686   : > { %4037 = vst.msk [vmem:[#allocation5 + $0x1c] sm:$0xf] %vm1752_vm9, %v3949_v19  ;;  %5085 = vmatmul.msk.bf16.gmra.mxu3 %vm2371_vm13, %v5123_v18 }
 0x687   : > { %4261 = vst.msk [vmem:[#allocation5 + $0x1c] sm:$0xf] %vm1977_vm10, %v4173_v29  ;;  %v4397_v34 = vpop.permute.xlu1 %4396  ;;  %v3951_v5 = vpop.permute.xlu2 %3950  ;;  %v7182_v29 = vld [vmem:[%s7345_s4] ss:$0 sm:$0xff] }
 0x688   : > { %4485 = vst.msk [vmem:[#allocation5 + $0x1c] sm:$0xf] %vm2202_vm12, %v4397_v34 }
 0x689   : > { %4038 = vst.msk [vmem:[#allocation5 + $0x20] sm:$0xf] %vm1752_vm9, %v3951_v5 }
 0x68b   : > { %3769 = vrot.lane.b32.xlu0 %v4346_v23, %s5168_s28  ;;  %s7192_s28 = scalar_lea.vmem %s7346_s5, %s5092_s21 }
 0x68d   : > { %v4395_v47 = vpop.permute.xlu0 %4394  ;;  %4218 = vrot.lane.b32.xlu1 %v4124_v38, %s5170_s30  ;;  %3994 = vrot.lane.b32.xlu2 %v3900_v55, %s5169_s29 }
 0x68e   : > { %4484 = vst.msk [vmem:[#allocation5 + $0x18] sm:$0xf] %vm2202_vm12, %v4395_v47 }
 0x68f   : > { %v4207_v3 = vpop.permute.xlu1 %4206  ;;  %v4177_v46 = vpop.permute.xlu2 %4176 }
 0x690   : > { %4278 = vst.msk [vmem:[#allocation5 + $0x60] sm:$0xf] %vm1977_vm10, %v4207_v3 }
 0x693   : > { %3996 = vrot.lane.b32.xlu0 %v3901_v20, %s5169_s29 }
 0x695   : > { %v3985_v60 = vpop.permute.xlu0 %3984  ;;  %4444 = vrot.lane.b32.xlu1 %v4349_v31, %s5171_s6  ;;  %4220 = vrot.lane.b32.xlu2 %v4125_v52, %s5170_s30  ;;  %v5115_v14 = vld [vmem:[#allocation5 + $0x18] sm:$0xff] }
 0x696   : > { %4055 = vst.msk [vmem:[#allocation5 + $0x64] sm:$0xf] %vm1752_vm9, %v3985_v60  ;;  %5077 = vmatmul.msk.bf16.gmra.mxu1 %vm2371_vm13, %v5115_v14 }
 0x697   : > { %4279 = vst.msk [vmem:[#allocation5 + $0x64] sm:$0xf] %vm1977_vm10, %v4209_v4  ;;  %v4433_v11 = vpop.permute.xlu1 %4432  ;;  %v3762_v16 = vpop.permute.xlu2 %3761 }
 0x698   : > { %4503 = vst.msk [vmem:[#allocation5 + $0x64] sm:$0xf] %vm2202_vm12, %v4433_v11 }
 0x699   : > { %3831 = vst.msk [vmem:[#allocation5 + $0x68] sm:$0xf] %vm1526_vm8, %v3762_v16 }
 0x69b   : > { %4442 = vrot.lane.b32.xlu0 %v4348_v62, %s5171_s6 }
 0x69d   : > { %v4431_v42 = vpop.permute.xlu0 %4430  ;;  %4186 = vrot.lane.b32.xlu1 %v4108_v13, %s5170_s30  ;;  %3962 = vrot.lane.b32.xlu2 %v3884_v2, %s5169_s29 }
 0x69e   : > { %4502 = vst.msk [vmem:[#allocation5 + $0x60] sm:$0xf] %vm2202_vm12, %v4431_v42 }
 0x69f   : > { %v4175_v21 = vpop.permute.xlu1 %4174  ;;  %v3989_v44 = vpop.permute.xlu2 %3988 }
 0x6a0   : > { %4262 = vst.msk [vmem:[#allocation5 + $0x20] sm:$0xf] %vm1977_vm10, %v4175_v21 }
 0x6a3   : > { %3964 = vrot.lane.b32.xlu0 %v3885_v53, %s5169_s29 }
 0x6a5   : > { %v3953_v23 = vpop.permute.xlu0 %3952  ;;  %4412 = vrot.lane.b32.xlu1 %v4333_v12, %s5171_s6  ;;  %4188 = vrot.lane.b32.xlu2 %v4109_v1, %s5170_s30  ;;  %v5124_v10 = vld [vmem:[#allocation5 + $0x60] sm:$0xff] }
 0x6a6   : > { %4039 = vst.msk [vmem:[#allocation5 + $0x24] sm:$0xf] %vm1752_vm9, %v3953_v23  ;;  %5086 = vmatmul.msk.bf16.gmra.mxu3 %vm2371_vm13, %v5124_v10 }
 0x6a7   : > { %4263 = vst.msk [vmem:[#allocation5 + $0x24] sm:$0xf] %vm1977_vm10, %v4177_v46  ;;  %v4401_v45 = vpop.permute.xlu1 %4400  ;;  %v4435_v25 = vpop.permute.xlu2 %4434 }
 0x6a8   : > { %4487 = vst.msk [vmem:[#allocation5 + $0x24] sm:$0xf] %vm2202_vm12, %v4401_v45 }
 0x6a9   : > { %v4746_v37 = vpop.f32.mrf.mxu3 }
 0x6aa   : > { %v4747_v33 = vadd.f32 %v7182_v29, %v4746_v37 }
 0x6ab   : > { %4410 = vrot.lane.b32.xlu0 %v4332_v58, %s5171_s6 }
 0x6ac   : > { %v4802_v40 = vmax.f32 %v4747_v33, 0.0 }
 0x6ad   : > { %v4399_v61 = vpop.permute.xlu0 %4398 }
 0x6ae   : > { %4486 = vst.msk [vmem:[#allocation5 + $0x20] sm:$0xf] %vm2202_vm12, %v4399_v61 }
 0x6af   : > { %4834 = vst.msk [vmem:[%s7192_s28 + $0x80] sm:$0xff] %vm226_vm0, %v4802_v40  ;;  %v3987_v35 = vpop.permute.xlu1 %3986  ;;  %v3957_v26 = vpop.permute.xlu2 %3956 }
 0x6b0   : > { %4056 = vst.msk [vmem:[#allocation5 + $0x68] sm:$0xf] %vm1752_vm9, %v3987_v35 }
 0x6b1   : > { %4041 = vst.msk [vmem:[#allocation5 + $0x2c] sm:$0xf] %vm1752_vm9, %v3957_v26  ;;  %v4748_v15 = vpop.f32.mrf.mxu3 }
 0x6b2   : > { %v4749_v51 = vadd.f32 %v7182_v29, %v4748_v15 }
 0x6b3   : > { %v4706_v8 = vpop.f32.mrf.mxu1 }
 0x6b4   : > { %v4803_v36 = vmax.f32 %v4749_v51, 0.0  ;;  %v4707_v9 = vadd.f32 %v7182_v29, %v4706_v8 }
 0x6b5   : > { %v3764_v28 = vpop.permute.xlu0 %3763  ;;  %v5116_v17 = vld [vmem:[#allocation5 + $0x20] sm:$0xff] }
 0x6b6   : > { %3832 = vst.msk [vmem:[#allocation5 + $0x6c] sm:$0xf] %vm1526_vm8, %v3764_v28  ;;  %v4786_v49 = vmax.f32 %v4707_v9, 0.0  ;;  %5078 = vmatmul.msk.bf16.gmra.mxu1 %vm2371_vm13, %v5116_v17 }
 0x6b7   : > { %4835 = vst.msk [vmem:[%s7192_s28 + $0x88] sm:$0xff] %vm226_vm0, %v4803_v36  ;;  %v4213_v56 = vpop.permute.xlu1 %4212  ;;  %v4403_v39 = vpop.permute.xlu2 %4402 }
 0x6b8   : > { %4057 = vst.msk [vmem:[#allocation5 + $0x6c] sm:$0xf] %vm1752_vm9, %v3989_v44 }
 0x6b9   : > { %4818 = vst.msk [vmem:[%s7192_s28] sm:$0xff] %vm226_vm0, %v4786_v49 }
 0x6ba   : > { %4281 = vst.msk [vmem:[#allocation5 + $0x6c] sm:$0xf] %vm1977_vm10, %v4213_v56 }
 0x6bb   : > { %v4708_v24 = vpop.f32.mrf.mxu1 }
 0x6bc   : > { %v4709_v48 = vadd.f32 %v7182_v29, %v4708_v24 }
 0x6bd   : > { %v4211_v4 = vpop.permute.xlu0 %4210 }
 0x6be   : > { %4280 = vst.msk [vmem:[#allocation5 + $0x68] sm:$0xf] %vm1977_vm10, %v4211_v4  ;;  %v4787_v6 = vmax.f32 %v4709_v48, 0.0 }
 0x6bf   : > { %4504 = vst.msk [vmem:[#allocation5 + $0x68] sm:$0xf] %vm2202_vm12, %v4435_v25  ;;  %v3955_v57 = vpop.permute.xlu1 %3954  ;;  %v3768_v19 = vpop.permute.xlu2 %3767 }
 0x6c0   : > { %4040 = vst.msk [vmem:[#allocation5 + $0x28] sm:$0xf] %vm1752_vm9, %v3955_v57 }
 0x6c1   : > { %4819 = vst.msk [vmem:[%s7192_s28 + $0x8] sm:$0xff] %vm226_vm0, %v4787_v6 }
 0x6c2   : > { %3834 = vst.msk [vmem:[#allocation5 + $0x74] sm:$0xf] %vm1526_vm8, %v3768_v19 }
 0x6c5   : > { %v4437_v18 = vpop.permute.xlu0 %4436 }
 0x6c6   : > { %4505 = vst.msk [vmem:[#allocation5 + $0x6c] sm:$0xf] %vm2202_vm12, %v4437_v18 }
 0x6c7   : > { %v4181_v27 = vpop.permute.xlu1 %4180  ;;  %v4215_v59 = vpop.permute.xlu2 %4214 }
 0x6c8   : > { %4265 = vst.msk [vmem:[#allocation5 + $0x2c] sm:$0xf] %vm1977_vm10, %v4181_v27 }
 0x6c9   : > { %v4751_v34 = vpop.f32.mrf.mxu3 }
 0x6ca   : > { %v4752_v5 = vadd.f32 %v7182_v29, %v4751_v34 }
 0x6cc   : > { %v4804_v38 = vmax.f32 %v4752_v5, 0.0 }
 0x6cd   : > { %v4179_v55 = vpop.permute.xlu0 %4178  ;;  %v5125_v63 = vld [vmem:[#allocation5 + $0x68] sm:$0xff] }
 0x6ce   : > { %4264 = vst.msk [vmem:[#allocation5 + $0x28] sm:$0xf] %vm1977_vm10, %v4179_v55  ;;  %5087 = vmatmul.msk.bf16.gmra.mxu3 %vm2371_vm13, %v5125_v63 }
 0x6cf   : > { %4836 = vst.msk [vmem:[%s7192_s28 + $0x90] sm:$0xff] %vm226_vm0, %v4804_v38  ;;  %v3766_v47 = vpop.permute.xlu1 %3765  ;;  %v4441_v0 = vpop.permute.xlu2 %4440 }
 0x6d0   : > { %4488 = vst.msk [vmem:[#allocation5 + $0x28] sm:$0xf] %vm2202_vm12, %v4403_v39 }
 0x6d1   : > { %3833 = vst.msk [vmem:[#allocation5 + $0x70] sm:$0xf] %vm1526_vm8, %v3766_v47  ;;  %v4753_v41 = vpop.f32.mrf.mxu3 }
 0x6d2   : > { %v4754_v3 = vadd.f32 %v7182_v29, %v4753_v41 }
 0x6d3   : > { %v4711_v46 = vpop.f32.mrf.mxu1 }
 0x6d4   : > { %v4805_v20 = vmax.f32 %v4754_v3, 0.0  ;;  %v4712_v52 = vadd.f32 %v7182_v29, %v4711_v46 }
 0x6d5   : > { %v4405_v31 = vpop.permute.xlu0 %4404 }
 0x6d6   : > { %4489 = vst.msk [vmem:[#allocation5 + $0x2c] sm:$0xf] %vm2202_vm12, %v4405_v31  ;;  %v4788_v43 = vmax.f32 %v4712_v52, 0.0 }
 0x6d7   : > { %4837 = vst.msk [vmem:[%s7192_s28 + $0x98] sm:$0xff] %vm226_vm0, %v4805_v20  ;;  %v3993_v60 = vpop.permute.xlu1 %3992  ;;  %v4183_v14 = vpop.permute.xlu2 %4182 }
 0x6d8   : > { %4059 = vst.msk [vmem:[#allocation5 + $0x74] sm:$0xf] %vm1752_vm9, %v3993_v60 }
 0x6d9   : > { %4820 = vst.msk [vmem:[%s7192_s28 + $0x10] sm:$0xff] %vm226_vm0, %v4788_v43 }
 0x6db   : > { %v4713_v11 = vpop.f32.mrf.mxu1 }
 0x6dc   : > { %v4714_v62 = vadd.f32 %v7182_v29, %v4713_v11 }
 0x6dd   : > { %v3991_v16 = vpop.permute.xlu0 %3990  ;;  %v5117_v32 = vld [vmem:[#allocation5 + $0x28] sm:$0xff] }
 0x6de   : > { %4058 = vst.msk [vmem:[#allocation5 + $0x70] sm:$0xf] %vm1752_vm9, %v3991_v16  ;;  %v4789_v50 = vmax.f32 %v4714_v62, 0.0  ;;  %5079 = vmatmul.msk.bf16.gmra.mxu1 %vm2371_vm13, %v5117_v32 }
 0x6df   : > { %4282 = vst.msk [vmem:[#allocation5 + $0x70] sm:$0xf] %vm1977_vm10, %v4215_v59  ;;  %v4439_v13 = vpop.permute.xlu1 %4438  ;;  %v4409_v2 = vpop.permute.xlu2 %4408 }
 0x6e0   : > { %4506 = vst.msk [vmem:[#allocation5 + $0x70] sm:$0xf] %vm2202_vm12, %v4439_v13 }
 0x6e1   : > { %4821 = vst.msk [vmem:[%s7192_s28 + $0x18] sm:$0xff] %vm226_vm0, %v4789_v50 }
 0x6e5   : > { %v4217_v42 = vpop.permute.xlu0 %4216 }
 0x6e6   : > { %4283 = vst.msk [vmem:[#allocation5 + $0x74] sm:$0xf] %vm1977_vm10, %v4217_v42 }
 0x6e7   : > { %4507 = vst.msk [vmem:[#allocation5 + $0x74] sm:$0xf] %vm2202_vm12, %v4441_v0  ;;  %v3961_v22 = vpop.permute.xlu1 %3960  ;;  %v3995_v21 = vpop.permute.xlu2 %3994 }
 0x6e8   : > { %4043 = vst.msk [vmem:[#allocation5 + $0x34] sm:$0xf] %vm1752_vm9, %v3961_v22 }
 0x6e9   : > { %v4756_v44 = vpop.f32.mrf.mxu3 }
 0x6ea   : > { %v4757_v7 = vadd.f32 %v7182_v29, %v4756_v44 }
 0x6ec   : > { %v4806_v30 = vmax.f32 %v4757_v7, 0.0 }
 0x6ed   : > { %v3959_v53 = vpop.permute.xlu0 %3958 }
 0x6ee   : > { %4042 = vst.msk [vmem:[#allocation5 + $0x30] sm:$0xf] %vm1752_vm9, %v3959_v53  ;;  %v5126_v12 = vld [vmem:[#allocation5 + $0x70] sm:$0xff] }
 0x6ef   : > { %4838 = vst.msk [vmem:[%s7192_s28 + $0xa0] sm:$0xff] %vm226_vm0, %v4806_v30  ;;  %v4407_v1 = vpop.permute.xlu1 %4406  ;;  %v4221_v23 = vpop.permute.xlu2 %4220  ;;  %5088 = vmatmul.msk.bf16.gmra.mxu3 %vm2371_vm13, %v5126_v12 }
 0x6f0   : > { %4266 = vst.msk [vmem:[#allocation5 + $0x30] sm:$0xf] %vm1977_vm10, %v4183_v14 }
 0x6f1   : > { %4490 = vst.msk [vmem:[#allocation5 + $0x30] sm:$0xf] %vm2202_vm12, %v4407_v1  ;;  %v4758_v10 = vpop.f32.mrf.mxu3 }
 0x6f2   : > { %v4759_v54 = vadd.f32 %v7182_v29, %v4758_v10 }
 0x6f3   : > { %v4716_v45 = vpop.f32.mrf.mxu1 }
 0x6f4   : > { %v4807_v25 = vmax.f32 %v4759_v54, 0.0  ;;  %v4717_v37 = vadd.f32 %v7182_v29, %v4716_v45 }
 0x6f5   : > { %v4185_v58 = vpop.permute.xlu0 %4184 }
 0x6f6   : > { %4267 = vst.msk [vmem:[#allocation5 + $0x34] sm:$0xf] %vm1977_vm10, %v4185_v58  ;;  %v4790_v33 = vmax.f32 %v4717_v37, 0.0 }
 0x6f7   : > { %4839 = vst.msk [vmem:[%s7192_s28 + $0xa8] sm:$0xff] %vm226_vm0, %v4807_v25  ;;  %v3772_v40 = vpop.permute.xlu1 %3771  ;;  %v3963_v61 = vpop.permute.xlu2 %3962 }
 0x6f8   : > { %4491 = vst.msk [vmem:[#allocation5 + $0x34] sm:$0xf] %vm2202_vm12, %v4409_v2 }
 0x6f9   : > { %4822 = vst.msk [vmem:[%s7192_s28 + $0x20] sm:$0xff] %vm226_vm0, %v4790_v33 }
 0x6fa   : > { %3836 = vst.msk [vmem:[#allocation5 + $0x7c] sm:$0xf] %vm1526_vm8, %v3772_v40 }
 0x6fb   : > { %4044 = vst.msk [vmem:[#allocation5 + $0x38] sm:$0xf] %vm1752_vm9, %v3963_v61  ;;  %v4718_v35 = vpop.f32.mrf.mxu1 }
 0x6fc   : > { %v4719_v15 = vadd.f32 %v7182_v29, %v4718_v35 }
 0x6fd   : > { %v3770_v26 = vpop.permute.xlu0 %3769 }
 0x6fe   : > { %3835 = vst.msk [vmem:[#allocation5 + $0x78] sm:$0xf] %vm1526_vm8, %v3770_v26  ;;  %v4791_v51 = vmax.f32 %v4719_v15, 0.0 }
 0x6ff   : > { %4060 = vst.msk [vmem:[#allocation5 + $0x78] sm:$0xf] %vm1752_vm9, %v3995_v21  ;;  %v4219_v8 = vpop.permute.xlu1 %4218  ;;  %v5118_v36 = vld [vmem:[#allocation5 + $0x30] sm:$0xff]  ;;  %v4189_v59 = vpop.permute.xlu2 %4188 }
 0x700   : > { %4284 = vst.msk [vmem:[#allocation5 + $0x78] sm:$0xf] %vm1977_vm10, %v4219_v8  ;;  %5080 = vmatmul.msk.bf16.gmra.mxu1 %vm2371_vm13, %v5118_v36 }
 0x701   : > { %4823 = vst.msk [vmem:[%s7192_s28 + $0x28] sm:$0xff] %vm226_vm0, %v4791_v51 }
 0x705   : > { %v3997_v28 = vpop.permute.xlu0 %3996 }
 0x706   : > { %4061 = vst.msk [vmem:[#allocation5 + $0x7c] sm:$0xf] %vm1752_vm9, %v3997_v28 }
 0x707   : > { %4285 = vst.msk [vmem:[#allocation5 + $0x7c] sm:$0xf] %vm1977_vm10, %v4221_v23  ;;  %v4445_v9 = vpop.permute.xlu1 %4444 }
 0x708   : > { %4509 = vst.msk [vmem:[#allocation5 + $0x7c] sm:$0xf] %vm2202_vm12, %v4445_v9 }
 0x709   : > { %v4761_v17 = vpop.f32.mrf.mxu3 }
 0x70a   : > { %v4762_v49 = vadd.f32 %v7182_v29, %v4761_v17 }
 0x70c   : > { %v4808_v56 = vmax.f32 %v4762_v49, 0.0 }
 0x70d   : > { %v4443_v39 = vpop.permute.xlu0 %4442 }
 0x70e   : > { %4508 = vst.msk [vmem:[#allocation5 + $0x78] sm:$0xf] %vm2202_vm12, %v4443_v39 }
 0x70f   : > { %4840 = vst.msk [vmem:[%s7192_s28 + $0xb0] sm:$0xff] %vm226_vm0, %v4808_v56  ;;  %v4187_v24 = vpop.permute.xlu1 %4186 }
 0x710   : > { %4268 = vst.msk [vmem:[#allocation5 + $0x38] sm:$0xf] %vm1977_vm10, %v4187_v24 }
 0x711   : > { %v4763_v4 = vpop.f32.mrf.mxu3 }
 0x712   : > { %v4764_v48 = vadd.f32 %v7182_v29, %v4763_v4 }
 0x713   : > { %v4721_v6 = vpop.f32.mrf.mxu1 }
 0x714   : > { %v4809_v57 = vmax.f32 %v4764_v48, 0.0  ;;  %v4722_v18 = vadd.f32 %v7182_v29, %v4721_v6 }
 0x715   : > { %v3965_v19 = vpop.permute.xlu0 %3964  ;;  %v5127_v27 = vld [vmem:[#allocation5 + $0x78] sm:$0xff] }
 0x716   : > { %4045 = vst.msk [vmem:[#allocation5 + $0x3c] sm:$0xf] %vm1752_vm9, %v3965_v19  ;;  %v4792_v34 = vmax.f32 %v4722_v18, 0.0  ;;  %5089 = vmatmul.msk.bf16.gmra.mxu3 %vm2371_vm13, %v5127_v27 }
 0x717   : > { %4841 = vst.msk [vmem:[%s7192_s28 + $0xb8] sm:$0xff] %vm226_vm0, %v4809_v57  ;;  %v4413_v5 = vpop.permute.xlu1 %4412 }
 0x718   : > { %4269 = vst.msk [vmem:[#allocation5 + $0x3c] sm:$0xf] %vm1977_vm10, %v4189_v59 }
 0x719   : > { %4824 = vst.msk [vmem:[%s7192_s28 + $0x30] sm:$0xff] %vm226_vm0, %v4792_v34 }
 0x71a   : > { %4493 = vst.msk [vmem:[#allocation5 + $0x3c] sm:$0xf] %vm2202_vm12, %v4413_v5 }
 0x71b   : > { %v4723_v38 = vpop.f32.mrf.mxu1 }
 0x71c   : > { %v4724_v63 = vadd.f32 %v7182_v29, %v4723_v38 }
 0x71d   : > { %v4411_v55 = vpop.permute.xlu0 %4410 }
 0x71e   : > { %4492 = vst.msk [vmem:[#allocation5 + $0x38] sm:$0xf] %vm2202_vm12, %v4411_v55  ;;  %v4793_v47 = vmax.f32 %v4724_v63, 0.0 }
 0x720   : > { %4825 = vst.msk [vmem:[%s7192_s28 + $0x38] sm:$0xff] %vm226_vm0, %v4793_v47 }
 0x725   : > { %v5119_v0 = vld [vmem:[#allocation5 + $0x38] sm:$0xff] }
 0x726   : > { %5081 = vmatmul.msk.bf16.gmra.mxu1 %vm2371_vm13, %v5119_v0 }
 0x729   : > { %v4766_v41 = vpop.f32.mrf.mxu3 }
 0x72a   : > { %v4767_v3 = vadd.f32 %v7182_v29, %v4766_v41 }
 0x72c   : > { %v4810_v46 = vmax.f32 %v4767_v3, 0.0 }
 0x72e   : > { %4842 = vst.msk [vmem:[%s7192_s28 + $0xc0] sm:$0xff] %vm226_vm0, %v4810_v46 }
 0x731   : > { %v4768_v20 = vpop.f32.mrf.mxu3 }
 0x732   : > { %v4769_v31 = vadd.f32 %v7182_v29, %v4768_v20 }
 0x733   : > { %v4726_v52 = vpop.f32.mrf.mxu1 }
 0x734   : > { %v4811_v43 = vmax.f32 %v4769_v31, 0.0  ;;  %v4727_v60 = vadd.f32 %v7182_v29, %v4726_v52 }
 0x736   : > { %4843 = vst.msk [vmem:[%s7192_s28 + $0xc8] sm:$0xff] %vm226_vm0, %v4811_v43  ;;  %v4794_v14 = vmax.f32 %v4727_v60, 0.0 }
 0x738   : > { %4826 = vst.msk [vmem:[%s7192_s28 + $0x40] sm:$0xff] %vm226_vm0, %v4794_v14 }
 0x73b   : > { %v4728_v11 = vpop.f32.mrf.mxu1 }
 0x73c   : > { %v4729_v16 = vadd.f32 %v7182_v29, %v4728_v11 }
 0x73e   : > { %v4795_v62 = vmax.f32 %v4729_v16, 0.0 }
 0x740   : > { %4827 = vst.msk [vmem:[%s7192_s28 + $0x48] sm:$0xff] %vm226_vm0, %v4795_v62 }
 0x751   : > { %v4771_v32 = vpop.f32.mrf.mxu3 }
 0x752   : > { %v4772_v50 = vadd.f32 %v7182_v29, %v4771_v32 }
 0x754   : > { %v4812_v13 = vmax.f32 %v4772_v50, 0.0 }
 0x756   : > { %4844 = vst.msk [vmem:[%s7192_s28 + $0xd0] sm:$0xff] %vm226_vm0, %v4812_v13 }
 0x759   : > { %v4773_v2 = vpop.f32.mrf.mxu3 }
 0x75a   : > { %v4774_v42 = vadd.f32 %v7182_v29, %v4773_v2 }
 0x75b   : > { %v4731_v22 = vpop.f32.mrf.mxu1 }
 0x75c   : > { %v4813_v21 = vmax.f32 %v4774_v42, 0.0  ;;  %v4732_v44 = vadd.f32 %v7182_v29, %v4731_v22 }
 0x75e   : > { %4845 = vst.msk [vmem:[%s7192_s28 + $0xd8] sm:$0xff] %vm226_vm0, %v4813_v21  ;;  %v4796_v7 = vmax.f32 %v4732_v44, 0.0 }
 0x760   : > { %4828 = vst.msk [vmem:[%s7192_s28 + $0x50] sm:$0xff] %vm226_vm0, %v4796_v7 }
 0x763   : > { %v4733_v30 = vpop.f32.mrf.mxu1 }
 0x764   : > { %v4734_v53 = vadd.f32 %v7182_v29, %v4733_v30 }
 0x766   : > { %v4797_v12 = vmax.f32 %v4734_v53, 0.0 }
 0x768   : > { %4829 = vst.msk [vmem:[%s7192_s28 + $0x58] sm:$0xff] %vm226_vm0, %v4797_v12 }
 0x772   : > { %v4776_v1 = vpop.f32.mrf.mxu3 }
 0x773   : > { %v4777_v23 = vadd.f32 %v7182_v29, %v4776_v1 }
 0x775   : > { %v4814_v10 = vmax.f32 %v4777_v23, 0.0 }
 0x777   : > { %4846 = vst.msk [vmem:[%s7192_s28 + $0xe0] sm:$0xff] %vm226_vm0, %v4814_v10 }
 0x77a   : > { %v4778_v54 = vpop.f32.mrf.mxu3 }
 0x77b   : > { %v4779_v45 = vadd.f32 %v7182_v29, %v4778_v54 }
 0x77d   : > { %v4815_v25 = vmax.f32 %v4779_v45, 0.0  ;;  %v4736_v58 = vpop.f32.mrf.mxu1 }
 0x77e   : > { %v4737_v37 = vadd.f32 %v7182_v29, %v4736_v58 }
 0x77f   : > { %4847 = vst.msk [vmem:[%s7192_s28 + $0xe8] sm:$0xff] %vm226_vm0, %v4815_v25 }
 0x780   : > { %v4798_v33 = vmax.f32 %v4737_v37, 0.0 }
 0x782   : > { %4830 = vst.msk [vmem:[%s7192_s28 + $0x60] sm:$0xff] %vm226_vm0, %v4798_v33 }
 0x785   : > { %v4738_v40 = vpop.f32.mrf.mxu1 }
 0x786   : > { %v4739_v61 = vadd.f32 %v7182_v29, %v4738_v40 }
 0x788   : > { %v4799_v35 = vmax.f32 %v4739_v61, 0.0 }
 0x78a   : > { %4831 = vst.msk [vmem:[%s7192_s28 + $0x68] sm:$0xff] %vm226_vm0, %v4799_v35 }
 0x799   : > { %v4781_v26 = vpop.f32.mrf.mxu3 }
 0x79a   : > { %v4782_v15 = vadd.f32 %v7182_v29, %v4781_v26 }
 0x79c   : > { %v4816_v51 = vmax.f32 %v4782_v15, 0.0 }
 0x79e   : > { %4848 = vst.msk [vmem:[%s7192_s28 + $0xf0] sm:$0xff] %vm226_vm0, %v4816_v51 }
 0x7a1   : > { %v4783_v8 = vpop.f32.mrf.mxu3 }
 0x7a2   : > { %v4784_v36 = vadd.f32 %v7182_v29, %v4783_v8 }
 0x7a3   : > { %v4741_v28 = vpop.f32.mrf.mxu1 }
 0x7a4   : > { %v4817_v9 = vmax.f32 %v4784_v36, 0.0  ;;  %v4742_v17 = vadd.f32 %v7182_v29, %v4741_v28 }
 0x7a6   : > { %4849 = vst.msk [vmem:[%s7192_s28 + $0xf8] sm:$0xff] %vm226_vm0, %v4817_v9  ;;  %v4800_v49 = vmax.f32 %v4742_v17, 0.0 }
 0x7a8   : > { %4832 = vst.msk [vmem:[%s7192_s28 + $0x70] sm:$0xff] %vm226_vm0, %v4800_v49 }
 0x7ab   : > { %v4743_v56 = vpop.f32.mrf.mxu1 }
 0x7ac   : > { %v4744_v39 = vadd.f32 %v7182_v29, %v4743_v56 }
 0x7ae   : > { %v4801_v24 = vmax.f32 %v4744_v39, 0.0 }
 0x7b0   : > { %4833 = vst.msk [vmem:[%s7192_s28 + $0x78] sm:$0xff] %vm226_vm0, %v4801_v24 }
 0x7b1 PF: > { %s15_s18 = sadd.s32 1, %s5161_s18  }
 0x7b2   : > { %p12_p4 = scmp.ge.s32.totalorder %s15_s18, 4  }
 0x7b4   :  { %14 = sbr.rel (!%p12_p4) target bundleno = 1 (0x1), region = 76 }

</bundles_post_ra>
